<compile_context>
chip_gen: v6e
topology: v6e:2x2x1
jax: 0.10.0
libtpu: 0.0.40
codegen_flags: <defaults>
</compile_context>

<pallas_src>
import functools
import math

import jax
import jax.numpy as jnp
import numpy as np
from jax.experimental import pallas as pl
from jax.experimental.pallas import tpu as pltpu

LN_EPS = 1e-5  # torch.nn.LayerNorm default


def _gelu_tanh(x):
    # TODO(synk): nn.GELU default is the exact erf form; the tanh approximation is used
    # in-kernel (max abs deviation ~3e-4); the pure-JAX reference keeps exact erf GELU.
    c = math.sqrt(2.0 / math.pi)
    return 0.5 * x * (1.0 + jnp.tanh(c * (x + 0.044715 * (x * x * x))))


def _layernorm(x, g, b):
    mu = jnp.mean(x, axis=-1, keepdims=True)
    xc = x - mu
    var = jnp.mean(xc * xc, axis=-1, keepdims=True)
    return xc * jax.lax.rsqrt(var + LN_EPS) * g + b


def _make_kernel(N, C, num_heads, bt):
    HD = C // num_heads
    HN = num_heads * N
    bf16 = jnp.bfloat16

    def kernel(x_ref, g1_ref, b1_ref, wqkv_ref, wp_ref, bp_ref,
               g2_ref, b2_ref, w1_ref, bm1_ref, w2_ref, bm2_ref,
               o_ref, z_ref):
        x = x_ref[...]                                              # (M, C) f32

        # ---- LayerNorm 1 (f32) ----
        y1 = _layernorm(x, g1_ref[...], b1_ref[...])

        # ---- fused QKV projection: bf16 operands, f32 accumulation.
        #      (attention scale already folded into the Q columns of the weight) ----
        qkv = jnp.dot(y1.astype(bf16), wqkv_ref[...],
                      preferred_element_type=jnp.float32).astype(bf16)   # (M, 3C)

        # ---- masks (loop-invariant; built once per grid step, no int division) ----
        lane = jax.lax.broadcasted_iota(jnp.int32, (1, HN), 1)           # (1, HN)
        seg_masks = [(lane >= h * N) & (lane < (h + 1) * N)
                     for h in range(num_heads)]                          # per-head lanes
        row = jax.lax.broadcasted_iota(jnp.int32, (HN, 1), 0)
        col = jax.lax.broadcasted_iota(jnp.int32, (1, C), 1)

        def head_block(h):
            return ((row >= h * N) & (row < (h + 1) * N)) & \
                   ((col >= h * HD) & (col < (h + 1) * HD))

        kv_mask = head_block(0)
        for h in range(1, num_heads):
            kv_mask = kv_mask | head_block(h)                            # (HN, C) bool

        # ---- multi-head self-attention, one image per (unrolled) iteration ----
        for b in range(bt):
            r0 = b * N
            qb = qkv[r0:r0 + N, 0:C]                                     # (N, C) bf16
            kb = qkv[r0:r0 + N, C:2 * C]                                 # (N, C) bf16
            vb = qkv[r0:r0 + N, 2 * C:3 * C]                             # (N, C) bf16

            # Block-diagonal expansion of K and V -> one lane-dense MXU call for
            # ALL heads (no (N, HD) sub-lane slices, no masked per-head stores).
            kexp = jnp.where(kv_mask, jnp.concatenate([kb] * num_heads, axis=0), 0)
            vexp = jnp.where(kv_mask, jnp.concatenate([vb] * num_heads, axis=0), 0)

            # logits[n, h*N + m] = q_h[n] . k_h[m]  (scale pre-folded), f32 accum.
            s = jax.lax.dot_general(qb, kexp, (((1,), (1,)), ((), ())),
                                    preferred_element_type=jnp.float32)  # (N, HN)

            # Segmented (per-head) softmax along lane segments of length N, in f32.
            m_full = jnp.zeros_like(s)
            for msk in seg_masks:
                m_h = jnp.max(jnp.where(msk, s, -1e30), axis=-1, keepdims=True)
                m_full = jnp.where(msk, m_h, m_full)
            e = jnp.exp(s - m_full)
            r_full = jnp.zeros_like(s)
            for msk in seg_masks:
                d_h = jnp.sum(jnp.where(msk, e, 0.0), axis=-1, keepdims=True)
                r_full = jnp.where(msk, pl.reciprocal(d_h, approx=True), r_full)
            p = (e * r_full).astype(bf16)                                # (N, HN)

            # (N, HN) @ (HN, C) -> head-concatenated (N, C); single full-width store.
            zb = jnp.dot(p, vexp, preferred_element_type=jnp.float32)
            z_ref[r0:r0 + N, :] = zb.astype(bf16)

        # ---- attention output projection + residual 1 ----
        z = jnp.dot(z_ref[...], wp_ref[...],
                    preferred_element_type=jnp.float32) + bp_ref[...]
        x1 = x + z

        # ---- LayerNorm 2 + MLP + residual 2 ----
        y2 = _layernorm(x1, g2_ref[...], b2_ref[...])
        hmid = jnp.dot(y2.astype(bf16), w1_ref[...],
                       preferred_element_type=jnp.float32) + bm1_ref[...]
        hmid = _gelu_tanh(hmid)
        o_ref[...] = x1 + jnp.dot(hmid.astype(bf16), w2_ref[...],
                                  preferred_element_type=jnp.float32) + bm2_ref[...]

    return kernel


def _pick_bt(B, N):
    """Largest images-per-step keeping >= 4 grid steps (>= 2 per v7x core), M <= 512."""
    best = 1
    for bt in range(1, B + 1):
        if B % bt == 0 and bt * N <= 512 and B // bt >= 4:
            best = bt
    if best == 1:
        for bt in range(1, B + 1):
            if B % bt == 0 and bt * N <= 512 and B // bt >= 2:
                best = bt
    return best


def transformer_block_pallas(x, g1, b1, wqkv, wproj, bproj, g2, b2,
                             w1, bm1, w2, bm2, *, num_heads, bt=None):
    """Fused Transformer block.  Weights use (in, out) layout: y = x @ W + b."""
    B, H, W, C = x.shape
    N = H * W
    hidden = w1.shape[1]
    assert C % num_heads == 0
    HD = C // num_heads
    if bt is None:
        bt = _pick_bt(B, N)
    assert B % bt == 0
    M = bt * N
    scale = HD ** (-0.5)

    f32, bf16 = jnp.float32, jnp.bfloat16
    # Fold the attention scale into the Q columns of the fused QKV weight (host side,
    # trace-time constant work) -> the kernel never multiplies the (M, 3C) slab by scale.
    wqkv_s = jnp.concatenate([wqkv[:, :C] * scale, wqkv[:, C:]], axis=1)

    args = (
        x.reshape(B * N, C).astype(f32),
        g1.reshape(1, C).astype(f32), b1.reshape(1, C).astype(f32),
        wqkv_s.astype(bf16),                                   # bf16 weights: full MXU rate
        wproj.astype(bf16), bproj.reshape(1, C).astype(f32),
        g2.reshape(1, C).astype(f32), b2.reshape(1, C).astype(f32),
        w1.astype(bf16), bm1.reshape(1, hidden).astype(f32),
        w2.astype(bf16), bm2.reshape(1, C).astype(f32),
    )

    const = lambda b: (0, 0)
    # TODO(synk): at real VOLO widths (C=384-512) single-buffer the grid-constant weight
    # BlockSpecs (pipeline_mode=pl.Buffered(1)) so double-buffered copies don't eat VMEM.
    out = pl.pallas_call(
        _make_kernel(N, C, num_heads, bt),
        out_shape=jax.ShapeDtypeStruct((B * N, C), f32),
        grid_spec=pltpu.PrefetchScalarGridSpec(
            num_scalar_prefetch=0,
            grid=(B // bt,),
            in_specs=[
                pl.BlockSpec((M, C), lambda b: (b, 0)),        # x tokens
                pl.BlockSpec((1, C), const),                   # ln1 gamma
                pl.BlockSpec((1, C), const),                   # ln1 beta
                pl.BlockSpec((C, 3 * C), const),               # Wqkv (scale folded, bf16)
                pl.BlockSpec((C, C), const),                   # Wproj (bf16)
                pl.BlockSpec((1, C), const),                   # bproj
                pl.BlockSpec((1, C), const),                   # ln2 gamma
                pl.BlockSpec((1, C), const),                   # ln2 beta
                pl.BlockSpec((C, hidden), const),              # mlp fc1 W (bf16)
                pl.BlockSpec((1, hidden), const),              # mlp fc1 b
                pl.BlockSpec((hidden, C), const),              # mlp fc2 W (bf16)
                pl.BlockSpec((1, C), const),                   # mlp fc2 b
            ],
            out_specs=pl.BlockSpec((M, C), lambda b: (b, 0)),
            scratch_shapes=[pltpu.VMEM((M, C), bf16)],         # attention-output slab
        ),
        compiler_params=pltpu.CompilerParams(
            dimension_semantics=("parallel",),
            vmem_limit_bytes=32 * 1024 * 1024),
    )(*args)
    return out.reshape(B, H, W, C)


def transformer_block_ref(x, g1, b1, wqkv, wproj, bproj, g2, b2,
                          w1, bm1, w2, bm2, *, num_heads):
    """Pure-JAX reference mirroring the PyTorch Transformer.forward (eval mode)."""
    B, H, W, C = x.shape
    N = H * W
    hd = C // num_heads
    scale = hd ** (-0.5)
    xf = x.reshape(B, N, C).astype(jnp.float32)

    def ln(t, g, b):
        mu = jnp.mean(t, -1, keepdims=True)
        var = jnp.mean((t - mu) ** 2, -1, keepdims=True)
        return (t - mu) / jnp.sqrt(var + LN_EPS) * g + b

    y1 = ln(xf, g1, b1)
    qkv = jnp.einsum('bnc,cd->bnd', y1, wqkv, precision='highest')
    qkv = qkv.reshape(B, N, 3, num_heads, hd).transpose(2, 0, 3, 1, 4)
    q, k, v = qkv[0], qkv[1], qkv[2]
    attn = jnp.einsum('bhnd,bhmd->bhnm', q, k, precision='highest') * scale
    attn = jax.nn.softmax(attn, axis=-1)
    z = jnp.einsum('bhnm,bhmd->bhnd', attn, v, precision='highest')
    z = z.transpose(0, 2, 1, 3).reshape(B, N, C)
    z = jnp.einsum('bnc,cd->bnd', z, wproj, precision='highest') + bproj
    x1 = xf + z

    y2 = ln(x1, g2, b2)
    h = jnp.einsum('bnc,cd->bnd', y2, w1, precision='highest') + bm1
    h = jax.nn.gelu(h, approximate=False)       # nn.GELU default (exact erf)
    out = x1 + jnp.einsum('bnd,dc->bnc', h, w2, precision='highest') + bm2
    return out.reshape(B, H, W, C)


if __name__ == "__main__":
    # Deterministic configuration: lane-dense C = 128, B=8 so the auto-picked bt=2 gives
    # grid=4 (>= 2 steps per v7x TensorCore) with an MXU-friendly M = 128 token slab.
    B, H, W, C = 8, 8, 8, 128
    num_heads, mlp_ratio = 4, 4
    HID = C * mlp_ratio

    key = jax.random.PRNGKey(0)
    ks = jax.random.split(key, 12)
    x = jax.random.normal(ks[0], (B, H, W, C), jnp.float32)
    g1 = 1.0 + 0.1 * jax.random.normal(ks[1], (C,), jnp.float32)
    b1 = 0.1 * jax.random.normal(ks[2], (C,), jnp.float32)
    wqkv = 0.05 * jax.random.normal(ks[3], (C, 3 * C), jnp.float32)   # qkv_bias=False
    wproj = 0.05 * jax.random.normal(ks[4], (C, C), jnp.float32)
    bproj = 0.05 * jax.random.normal(ks[5], (C,), jnp.float32)
    g2 = 1.0 + 0.1 * jax.random.normal(ks[6], (C,), jnp.float32)
    b2 = 0.1 * jax.random.normal(ks[7], (C,), jnp.float32)
    w1 = 0.05 * jax.random.normal(ks[8], (C, HID), jnp.float32)
    bm1 = 0.05 * jax.random.normal(ks[9], (HID,), jnp.float32)
    w2 = 0.05 * jax.random.normal(ks[10], (HID, C), jnp.float32)
    bm2 = 0.05 * jax.random.normal(ks[11], (C,), jnp.float32)

    run = functools.partial(transformer_block_pallas, num_heads=num_heads)
    out = jax.jit(run)(x, g1, b1, wqkv, wproj, bproj, g2, b2, w1, bm1, w2, bm2)
    out = jax.block_until_ready(out)

    ref = transformer_block_ref(x, g1, b1, wqkv, wproj, bproj, g2, b2,
                                w1, bm1, w2, bm2, num_heads=num_heads)
    # bf16 matmul operands (f32 accumulation) -> tolerance loosened vs the pure-f32 run.
    np.testing.assert_allclose(np.asarray(out), np.asarray(ref),
                               rtol=2e-2, atol=2e-2)
    print("KERNEL_OK")
</pallas_src>

<mosaic_0001>
module attributes {stable_mosaic.version = 11 : i64} {
  func.func @kernel(%arg0: i32, %arg1: memref<128x128xf32, #tpu.memory_space<vmem>>, %arg2: memref<1x128xf32, #tpu.memory_space<vmem>>, %arg3: memref<1x128xf32, #tpu.memory_space<vmem>>, %arg4: memref<128x384xbf16, #tpu.memory_space<vmem>>, %arg5: memref<128x128xbf16, #tpu.memory_space<vmem>>, %arg6: memref<1x128xf32, #tpu.memory_space<vmem>>, %arg7: memref<1x128xf32, #tpu.memory_space<vmem>>, %arg8: memref<1x128xf32, #tpu.memory_space<vmem>>, %arg9: memref<128x512xbf16, #tpu.memory_space<vmem>>, %arg10: memref<1x512xf32, #tpu.memory_space<vmem>>, %arg11: memref<512x128xbf16, #tpu.memory_space<vmem>>, %arg12: memref<1x128xf32, #tpu.memory_space<vmem>>, %arg13: memref<128x128xf32, #tpu.memory_space<vmem>>, %arg14: memref<128x128xbf16, #tpu.memory_space<vmem>>) attributes {dimension_semantics = [#tpu.dimension_semantics<parallel>], iteration_bounds = array<i64: 4>, scalar_prefetch = 0 : i64, scratch_operands = 1 : i64, tpu.core_type = #tpu.core_type<tc>, window_params = [{transform_indices = @transform_0, window_bounds = array<i64: 128, 128>}, {pipeline_mode = #tpu.pipeline_mode<synchronous>, transform_indices = @transform_1, window_bounds = array<i64: 1, 128>}, {pipeline_mode = #tpu.pipeline_mode<synchronous>, transform_indices = @transform_2, window_bounds = array<i64: 1, 128>}, {pipeline_mode = #tpu.pipeline_mode<synchronous>, transform_indices = @transform_3, window_bounds = array<i64: 128, 384>}, {pipeline_mode = #tpu.pipeline_mode<synchronous>, transform_indices = @transform_4, window_bounds = array<i64: 128, 128>}, {pipeline_mode = #tpu.pipeline_mode<synchronous>, transform_indices = @transform_5, window_bounds = array<i64: 1, 128>}, {pipeline_mode = #tpu.pipeline_mode<synchronous>, transform_indices = @transform_6, window_bounds = array<i64: 1, 128>}, {pipeline_mode = #tpu.pipeline_mode<synchronous>, transform_indices = @transform_7, window_bounds = array<i64: 1, 128>}, {pipeline_mode = #tpu.pipeline_mode<synchronous>, transform_indices = @transform_8, window_bounds = array<i64: 128, 512>}, {pipeline_mode = #tpu.pipeline_mode<synchronous>, transform_indices = @transform_9, window_bounds = array<i64: 1, 512>}, {pipeline_mode = #tpu.pipeline_mode<synchronous>, transform_indices = @transform_10, window_bounds = array<i64: 512, 128>}, {pipeline_mode = #tpu.pipeline_mode<synchronous>, transform_indices = @transform_11, window_bounds = array<i64: 1, 128>}, {transform_indices = @transform_12, window_bounds = array<i64: 128, 128>}]} {
    %c0 = arith.constant 0 : index
    %c0_0 = arith.constant 0 : index
    %0 = vector.load %arg1[%c0, %c0_0] : memref<128x128xf32, #tpu.memory_space<vmem>>, vector<128x128xf32>
    %c0_1 = arith.constant 0 : index
    %c0_2 = arith.constant 0 : index
    %1 = vector.load %arg2[%c0_1, %c0_2] : memref<1x128xf32, #tpu.memory_space<vmem>>, vector<1x128xf32>
    %c0_3 = arith.constant 0 : index
    %c0_4 = arith.constant 0 : index
    %2 = vector.load %arg3[%c0_3, %c0_4] : memref<1x128xf32, #tpu.memory_space<vmem>>, vector<1x128xf32>
    %cst = arith.constant dense<0.000000e+00> : vector<128xf32>
    %3 = vector.multi_reduction <add>, %0, %cst [1] : vector<128x128xf32> to vector<128xf32>
    %4 = vector.shape_cast %3 : vector<128xf32> to vector<128x1xf32>
    %cst_5 = arith.constant 1.280000e+02 : f32
    %5 = vector.broadcast %cst_5 : f32 to vector<128x1xf32>
    %6 = arith.divf %4, %5 : vector<128x1xf32>
    %7 = vector.broadcast %6 : vector<128x1xf32> to vector<128x128xf32>
    %8 = arith.subf %0, %7 : vector<128x128xf32>
    %9 = arith.mulf %8, %8 : vector<128x128xf32>
    %cst_6 = arith.constant dense<0.000000e+00> : vector<128xf32>
    %10 = vector.multi_reduction <add>, %9, %cst_6 [1] : vector<128x128xf32> to vector<128xf32>
    %11 = vector.shape_cast %10 : vector<128xf32> to vector<128x1xf32>
    %cst_7 = arith.constant 1.280000e+02 : f32
    %12 = vector.broadcast %cst_7 : f32 to vector<128x1xf32>
    %13 = arith.divf %11, %12 : vector<128x1xf32>
    %cst_8 = arith.constant 9.99999974E-6 : f32
    %14 = vector.broadcast %cst_8 : f32 to vector<128x1xf32>
    %15 = arith.addf %13, %14 : vector<128x1xf32>
    %16 = math.rsqrt %15 : vector<128x1xf32>
    %17 = vector.broadcast %16 : vector<128x1xf32> to vector<128x128xf32>
    %18 = arith.mulf %8, %17 : vector<128x128xf32>
    %19 = vector.broadcast %1 : vector<1x128xf32> to vector<128x128xf32>
    %20 = arith.mulf %18, %19 : vector<128x128xf32>
    %21 = vector.broadcast %2 : vector<1x128xf32> to vector<128x128xf32>
    %22 = arith.addf %20, %21 : vector<128x128xf32>
    %23 = arith.truncf %22 : vector<128x128xf32> to vector<128x128xbf16>
    %c0_9 = arith.constant 0 : index
    %c0_10 = arith.constant 0 : index
    %24 = vector.load %arg4[%c0_9, %c0_10] : memref<128x384xbf16, #tpu.memory_space<vmem>>, vector<128x384xbf16>
    %cst_11 = arith.constant dense<0.000000e+00> : vector<128x384xf32>
    %25 = tpu.matmul %23, %24, %cst_11 {dimension_numbers = #tpu.dot_dimension_numbers<[1], [0], [0], [1], [0, 0, 1, 1], [], []>} : vector<128x128xbf16>, vector<128x384xbf16>, vector<128x384xf32> -> vector<128x384xf32>
    %26 = arith.truncf %25 : vector<128x384xf32> to vector<128x384xbf16>
    %27 = tpu.iota {dimensions = array<i32: 1>} : vector<1x256xi32>
    %c0_i32 = arith.constant 0 : i32
    %28 = vector.broadcast %c0_i32 : i32 to vector<1x256xi32>
    %29 = arith.cmpi sge, %27, %28 : vector<1x256xi32>
    %c64_i32 = arith.constant 64 : i32
    %30 = vector.broadcast %c64_i32 : i32 to vector<1x256xi32>
    %31 = arith.cmpi slt, %27, %30 : vector<1x256xi32>
    %32 = arith.andi %29, %31 : vector<1x256xi1>
    %c64_i32_12 = arith.constant 64 : i32
    %33 = vector.broadcast %c64_i32_12 : i32 to vector<1x256xi32>
    %34 = arith.cmpi sge, %27, %33 : vector<1x256xi32>
    %c128_i32 = arith.constant 128 : i32
    %35 = vector.broadcast %c128_i32 : i32 to vector<1x256xi32>
    %36 = arith.cmpi slt, %27, %35 : vector<1x256xi32>
    %37 = arith.andi %34, %36 : vector<1x256xi1>
    %c128_i32_13 = arith.constant 128 : i32
    %38 = vector.broadcast %c128_i32_13 : i32 to vector<1x256xi32>
    %39 = arith.cmpi sge, %27, %38 : vector<1x256xi32>
    %c192_i32 = arith.constant 192 : i32
    %40 = vector.broadcast %c192_i32 : i32 to vector<1x256xi32>
    %41 = arith.cmpi slt, %27, %40 : vector<1x256xi32>
    %42 = arith.andi %39, %41 : vector<1x256xi1>
    %c192_i32_14 = arith.constant 192 : i32
    %43 = vector.broadcast %c192_i32_14 : i32 to vector<1x256xi32>
    %44 = arith.cmpi sge, %27, %43 : vector<1x256xi32>
    %c256_i32 = arith.constant 256 : i32
    %45 = vector.broadcast %c256_i32 : i32 to vector<1x256xi32>
    %46 = arith.cmpi slt, %27, %45 : vector<1x256xi32>
    %47 = arith.andi %44, %46 : vector<1x256xi1>
    %48 = tpu.iota {dimensions = array<i32: 0>} : vector<256x1xi32>
    %49 = tpu.iota {dimensions = array<i32: 1>} : vector<1x128xi32>
    %c0_i32_15 = arith.constant 0 : i32
    %50 = vector.broadcast %c0_i32_15 : i32 to vector<256x1xi32>
    %51 = arith.cmpi sge, %48, %50 : vector<256x1xi32>
    %c64_i32_16 = arith.constant 64 : i32
    %52 = vector.broadcast %c64_i32_16 : i32 to vector<256x1xi32>
    %53 = arith.cmpi slt, %48, %52 : vector<256x1xi32>
    %54 = arith.andi %51, %53 : vector<256x1xi1>
    %c0_i32_17 = arith.constant 0 : i32
    %55 = vector.broadcast %c0_i32_17 : i32 to vector<1x128xi32>
    %56 = arith.cmpi sge, %49, %55 : vector<1x128xi32>
    %c32_i32 = arith.constant 32 : i32
    %57 = vector.broadcast %c32_i32 : i32 to vector<1x128xi32>
    %58 = arith.cmpi slt, %49, %57 : vector<1x128xi32>
    %59 = arith.andi %56, %58 : vector<1x128xi1>
    %60 = vector.broadcast %54 : vector<256x1xi1> to vector<256x128xi1>
    %61 = vector.broadcast %59 : vector<1x128xi1> to vector<256x128xi1>
    %62 = arith.andi %60, %61 : vector<256x128xi1>
    %c64_i32_18 = arith.constant 64 : i32
    %63 = vector.broadcast %c64_i32_18 : i32 to vector<256x1xi32>
    %64 = arith.cmpi sge, %48, %63 : vector<256x1xi32>
    %c128_i32_19 = arith.constant 128 : i32
    %65 = vector.broadcast %c128_i32_19 : i32 to vector<256x1xi32>
    %66 = arith.cmpi slt, %48, %65 : vector<256x1xi32>
    %67 = arith.andi %64, %66 : vector<256x1xi1>
    %c32_i32_20 = arith.constant 32 : i32
    %68 = vector.broadcast %c32_i32_20 : i32 to vector<1x128xi32>
    %69 = arith.cmpi sge, %49, %68 : vector<1x128xi32>
    %c64_i32_21 = arith.constant 64 : i32
    %70 = vector.broadcast %c64_i32_21 : i32 to vector<1x128xi32>
    %71 = arith.cmpi slt, %49, %70 : vector<1x128xi32>
    %72 = arith.andi %69, %71 : vector<1x128xi1>
    %73 = vector.broadcast %67 : vector<256x1xi1> to vector<256x128xi1>
    %74 = vector.broadcast %72 : vector<1x128xi1> to vector<256x128xi1>
    %75 = arith.andi %73, %74 : vector<256x128xi1>
    %76 = arith.ori %62, %75 : vector<256x128xi1>
    %c128_i32_22 = arith.constant 128 : i32
    %77 = vector.broadcast %c128_i32_22 : i32 to vector<256x1xi32>
    %78 = arith.cmpi sge, %48, %77 : vector<256x1xi32>
    %c192_i32_23 = arith.constant 192 : i32
    %79 = vector.broadcast %c192_i32_23 : i32 to vector<256x1xi32>
    %80 = arith.cmpi slt, %48, %79 : vector<256x1xi32>
    %81 = arith.andi %78, %80 : vector<256x1xi1>
    %c64_i32_24 = arith.constant 64 : i32
    %82 = vector.broadcast %c64_i32_24 : i32 to vector<1x128xi32>
    %83 = arith.cmpi sge, %49, %82 : vector<1x128xi32>
    %c96_i32 = arith.constant 96 : i32
    %84 = vector.broadcast %c96_i32 : i32 to vector<1x128xi32>
    %85 = arith.cmpi slt, %49, %84 : vector<1x128xi32>
    %86 = arith.andi %83, %85 : vector<1x128xi1>
    %87 = vector.broadcast %81 : vector<256x1xi1> to vector<256x128xi1>
    %88 = vector.broadcast %86 : vector<1x128xi1> to vector<256x128xi1>
    %89 = arith.andi %87, %88 : vector<256x128xi1>
    %90 = arith.ori %76, %89 : vector<256x128xi1>
    %c192_i32_25 = arith.constant 192 : i32
    %91 = vector.broadcast %c192_i32_25 : i32 to vector<256x1xi32>
    %92 = arith.cmpi sge, %48, %91 : vector<256x1xi32>
    %c256_i32_26 = arith.constant 256 : i32
    %93 = vector.broadcast %c256_i32_26 : i32 to vector<256x1xi32>
    %94 = arith.cmpi slt, %48, %93 : vector<256x1xi32>
    %95 = arith.andi %92, %94 : vector<256x1xi1>
    %c96_i32_27 = arith.constant 96 : i32
    %96 = vector.broadcast %c96_i32_27 : i32 to vector<1x128xi32>
    %97 = arith.cmpi sge, %49, %96 : vector<1x128xi32>
    %c128_i32_28 = arith.constant 128 : i32
    %98 = vector.broadcast %c128_i32_28 : i32 to vector<1x128xi32>
    %99 = arith.cmpi slt, %49, %98 : vector<1x128xi32>
    %100 = arith.andi %97, %99 : vector<1x128xi1>
    %101 = vector.broadcast %95 : vector<256x1xi1> to vector<256x128xi1>
    %102 = vector.broadcast %100 : vector<1x128xi1> to vector<256x128xi1>
    %103 = arith.andi %101, %102 : vector<256x128xi1>
    %104 = arith.ori %90, %103 : vector<256x128xi1>
    %105 = vector.extract_strided_slice %26 {offsets = [0, 0], sizes = [64, 128], strides = [1, 1]} : vector<128x384xbf16> to vector<64x128xbf16>
    %106 = vector.extract_strided_slice %26 {offsets = [0, 128], sizes = [64, 128], strides = [1, 1]} : vector<128x384xbf16> to vector<64x128xbf16>
    %107 = vector.extract_strided_slice %26 {offsets = [0, 256], sizes = [64, 128], strides = [1, 1]} : vector<128x384xbf16> to vector<64x128xbf16>
    %108 = tpu.concatenate %106, %106, %106, %106 in 0 : vector<64x128xbf16>, vector<64x128xbf16>, vector<64x128xbf16>, vector<64x128xbf16> -> vector<256x128xbf16>
    %c0_i32_29 = arith.constant 0 : i32
    %109 = arith.sitofp %c0_i32_29 : i32 to bf16
    %110 = vector.broadcast %109 : bf16 to vector<256x128xbf16>
    %111 = arith.select %104, %108, %110 : vector<256x128xi1>, vector<256x128xbf16>
    %112 = tpu.concatenate %107, %107, %107, %107 in 0 : vector<64x128xbf16>, vector<64x128xbf16>, vector<64x128xbf16>, vector<64x128xbf16> -> vector<256x128xbf16>
    %c0_i32_30 = arith.constant 0 : i32
    %113 = arith.sitofp %c0_i32_30 : i32 to bf16
    %114 = vector.broadcast %113 : bf16 to vector<256x128xbf16>
    %115 = arith.select %104, %112, %114 : vector<256x128xi1>, vector<256x128xbf16>
    %cst_31 = arith.constant dense<0.000000e+00> : vector<64x256xf32>
    %116 = tpu.matmul %105, %111, %cst_31 {dimension_numbers = #tpu.dot_dimension_numbers<[1], [1], [0], [0], [0, 0, 1, 0], [], []>} : vector<64x128xbf16>, vector<256x128xbf16>, vector<64x256xf32> -> vector<64x256xf32>
    %cst_32 = arith.constant 0.000000e+00 : f32
    %117 = vector.broadcast %cst_32 : f32 to vector<64x256xf32>
    %cst_33 = arith.constant -1.000000e+30 : f32
    %118 = vector.shape_cast %32 : vector<1x256xi1> to vector<1x256xi1>
    %119 = vector.broadcast %118 : vector<1x256xi1> to vector<64x256xi1>
    %120 = vector.broadcast %cst_33 : f32 to vector<64x256xf32>
    %121 = arith.select %119, %116, %120 : vector<64x256xi1>, vector<64x256xf32>
    %cst_34 = arith.constant dense<0xFF800000> : vector<64xf32>
    %122 = vector.multi_reduction <maximumf>, %121, %cst_34 [1] : vector<64x256xf32> to vector<64xf32>
    %123 = vector.shape_cast %122 : vector<64xf32> to vector<64x1xf32>
    %124 = vector.shape_cast %32 : vector<1x256xi1> to vector<1x256xi1>
    %125 = vector.broadcast %124 : vector<1x256xi1> to vector<64x256xi1>
    %126 = vector.shape_cast %123 : vector<64x1xf32> to vector<64x1xf32>
    %127 = vector.broadcast %126 : vector<64x1xf32> to vector<64x256xf32>
    %128 = arith.select %125, %127, %117 : vector<64x256xi1>, vector<64x256xf32>
    %cst_35 = arith.constant -1.000000e+30 : f32
    %129 = vector.shape_cast %37 : vector<1x256xi1> to vector<1x256xi1>
    %130 = vector.broadcast %129 : vector<1x256xi1> to vector<64x256xi1>
    %131 = vector.broadcast %cst_35 : f32 to vector<64x256xf32>
    %132 = arith.select %130, %116, %131 : vector<64x256xi1>, vector<64x256xf32>
    %cst_36 = arith.constant dense<0xFF800000> : vector<64xf32>
    %133 = vector.multi_reduction <maximumf>, %132, %cst_36 [1] : vector<64x256xf32> to vector<64xf32>
    %134 = vector.shape_cast %133 : vector<64xf32> to vector<64x1xf32>
    %135 = vector.shape_cast %37 : vector<1x256xi1> to vector<1x256xi1>
    %136 = vector.broadcast %135 : vector<1x256xi1> to vector<64x256xi1>
    %137 = vector.shape_cast %134 : vector<64x1xf32> to vector<64x1xf32>
    %138 = vector.broadcast %137 : vector<64x1xf32> to vector<64x256xf32>
    %139 = arith.select %136, %138, %128 : vector<64x256xi1>, vector<64x256xf32>
    %cst_37 = arith.constant -1.000000e+30 : f32
    %140 = vector.shape_cast %42 : vector<1x256xi1> to vector<1x256xi1>
    %141 = vector.broadcast %140 : vector<1x256xi1> to vector<64x256xi1>
    %142 = vector.broadcast %cst_37 : f32 to vector<64x256xf32>
    %143 = arith.select %141, %116, %142 : vector<64x256xi1>, vector<64x256xf32>
    %cst_38 = arith.constant dense<0xFF800000> : vector<64xf32>
    %144 = vector.multi_reduction <maximumf>, %143, %cst_38 [1] : vector<64x256xf32> to vector<64xf32>
    %145 = vector.shape_cast %144 : vector<64xf32> to vector<64x1xf32>
    %146 = vector.shape_cast %42 : vector<1x256xi1> to vector<1x256xi1>
    %147 = vector.broadcast %146 : vector<1x256xi1> to vector<64x256xi1>
    %148 = vector.shape_cast %145 : vector<64x1xf32> to vector<64x1xf32>
    %149 = vector.broadcast %148 : vector<64x1xf32> to vector<64x256xf32>
    %150 = arith.select %147, %149, %139 : vector<64x256xi1>, vector<64x256xf32>
    %cst_39 = arith.constant -1.000000e+30 : f32
    %151 = vector.shape_cast %47 : vector<1x256xi1> to vector<1x256xi1>
    %152 = vector.broadcast %151 : vector<1x256xi1> to vector<64x256xi1>
    %153 = vector.broadcast %cst_39 : f32 to vector<64x256xf32>
    %154 = arith.select %152, %116, %153 : vector<64x256xi1>, vector<64x256xf32>
    %cst_40 = arith.constant dense<0xFF800000> : vector<64xf32>
    %155 = vector.multi_reduction <maximumf>, %154, %cst_40 [1] : vector<64x256xf32> to vector<64xf32>
    %156 = vector.shape_cast %155 : vector<64xf32> to vector<64x1xf32>
    %157 = vector.shape_cast %47 : vector<1x256xi1> to vector<1x256xi1>
    %158 = vector.broadcast %157 : vector<1x256xi1> to vector<64x256xi1>
    %159 = vector.shape_cast %156 : vector<64x1xf32> to vector<64x1xf32>
    %160 = vector.broadcast %159 : vector<64x1xf32> to vector<64x256xf32>
    %161 = arith.select %158, %160, %150 : vector<64x256xi1>, vector<64x256xf32>
    %162 = arith.subf %116, %161 : vector<64x256xf32>
    %163 = math.exp %162 : vector<64x256xf32>
    %cst_41 = arith.constant 0.000000e+00 : f32
    %164 = vector.broadcast %cst_41 : f32 to vector<64x256xf32>
    %cst_42 = arith.constant 0.000000e+00 : f32
    %165 = vector.shape_cast %32 : vector<1x256xi1> to vector<1x256xi1>
    %166 = vector.broadcast %165 : vector<1x256xi1> to vector<64x256xi1>
    %167 = vector.broadcast %cst_42 : f32 to vector<64x256xf32>
    %168 = arith.select %166, %163, %167 : vector<64x256xi1>, vector<64x256xf32>
    %cst_43 = arith.constant dense<0.000000e+00> : vector<64xf32>
    %169 = vector.multi_reduction <add>, %168, %cst_43 [1] : vector<64x256xf32> to vector<64xf32>
    %170 = vector.shape_cast %169 : vector<64xf32> to vector<64x1xf32>
    %171 = tpu.reciprocal %170 {approx = true} : vector<64x1xf32> -> vector<64x1xf32>
    %172 = vector.shape_cast %32 : vector<1x256xi1> to vector<1x256xi1>
    %173 = vector.broadcast %172 : vector<1x256xi1> to vector<64x256xi1>
    %174 = vector.shape_cast %171 : vector<64x1xf32> to vector<64x1xf32>
    %175 = vector.broadcast %174 : vector<64x1xf32> to vector<64x256xf32>
    %176 = arith.select %173, %175, %164 : vector<64x256xi1>, vector<64x256xf32>
    %cst_44 = arith.constant 0.000000e+00 : f32
    %177 = vector.shape_cast %37 : vector<1x256xi1> to vector<1x256xi1>
    %178 = vector.broadcast %177 : vector<1x256xi1> to vector<64x256xi1>
    %179 = vector.broadcast %cst_44 : f32 to vector<64x256xf32>
    %180 = arith.select %178, %163, %179 : vector<64x256xi1>, vector<64x256xf32>
    %cst_45 = arith.constant dense<0.000000e+00> : vector<64xf32>
    %181 = vector.multi_reduction <add>, %180, %cst_45 [1] : vector<64x256xf32> to vector<64xf32>
    %182 = vector.shape_cast %181 : vector<64xf32> to vector<64x1xf32>
    %183 = tpu.reciprocal %182 {approx = true} : vector<64x1xf32> -> vector<64x1xf32>
    %184 = vector.shape_cast %37 : vector<1x256xi1> to vector<1x256xi1>
    %185 = vector.broadcast %184 : vector<1x256xi1> to vector<64x256xi1>
    %186 = vector.shape_cast %183 : vector<64x1xf32> to vector<64x1xf32>
    %187 = vector.broadcast %186 : vector<64x1xf32> to vector<64x256xf32>
    %188 = arith.select %185, %187, %176 : vector<64x256xi1>, vector<64x256xf32>
    %cst_46 = arith.constant 0.000000e+00 : f32
    %189 = vector.shape_cast %42 : vector<1x256xi1> to vector<1x256xi1>
    %190 = vector.broadcast %189 : vector<1x256xi1> to vector<64x256xi1>
    %191 = vector.broadcast %cst_46 : f32 to vector<64x256xf32>
    %192 = arith.select %190, %163, %191 : vector<64x256xi1>, vector<64x256xf32>
    %cst_47 = arith.constant dense<0.000000e+00> : vector<64xf32>
    %193 = vector.multi_reduction <add>, %192, %cst_47 [1] : vector<64x256xf32> to vector<64xf32>
    %194 = vector.shape_cast %193 : vector<64xf32> to vector<64x1xf32>
    %195 = tpu.reciprocal %194 {approx = true} : vector<64x1xf32> -> vector<64x1xf32>
    %196 = vector.shape_cast %42 : vector<1x256xi1> to vector<1x256xi1>
    %197 = vector.broadcast %196 : vector<1x256xi1> to vector<64x256xi1>
    %198 = vector.shape_cast %195 : vector<64x1xf32> to vector<64x1xf32>
    %199 = vector.broadcast %198 : vector<64x1xf32> to vector<64x256xf32>
    %200 = arith.select %197, %199, %188 : vector<64x256xi1>, vector<64x256xf32>
    %cst_48 = arith.constant 0.000000e+00 : f32
    %201 = vector.shape_cast %47 : vector<1x256xi1> to vector<1x256xi1>
    %202 = vector.broadcast %201 : vector<1x256xi1> to vector<64x256xi1>
    %203 = vector.broadcast %cst_48 : f32 to vector<64x256xf32>
    %204 = arith.select %202, %163, %203 : vector<64x256xi1>, vector<64x256xf32>
    %cst_49 = arith.constant dense<0.000000e+00> : vector<64xf32>
    %205 = vector.multi_reduction <add>, %204, %cst_49 [1] : vector<64x256xf32> to vector<64xf32>
    %206 = vector.shape_cast %205 : vector<64xf32> to vector<64x1xf32>
    %207 = tpu.reciprocal %206 {approx = true} : vector<64x1xf32> -> vector<64x1xf32>
    %208 = vector.shape_cast %47 : vector<1x256xi1> to vector<1x256xi1>
    %209 = vector.broadcast %208 : vector<1x256xi1> to vector<64x256xi1>
    %210 = vector.shape_cast %207 : vector<64x1xf32> to vector<64x1xf32>
    %211 = vector.broadcast %210 : vector<64x1xf32> to vector<64x256xf32>
    %212 = arith.select %209, %211, %200 : vector<64x256xi1>, vector<64x256xf32>
    %213 = arith.mulf %163, %212 : vector<64x256xf32>
    %214 = arith.truncf %213 : vector<64x256xf32> to vector<64x256xbf16>
    %cst_50 = arith.constant dense<0.000000e+00> : vector<64x128xf32>
    %215 = tpu.matmul %214, %115, %cst_50 {dimension_numbers = #tpu.dot_dimension_numbers<[1], [0], [0], [1], [0, 0, 1, 1], [], []>} : vector<64x256xbf16>, vector<256x128xbf16>, vector<64x128xf32> -> vector<64x128xf32>
    %216 = arith.truncf %215 : vector<64x128xf32> to vector<64x128xbf16>
    %c0_51 = arith.constant 0 : index
    %c0_52 = arith.constant 0 : index
    %217 = vector.load %arg14[%c0_51, %c0_52] : memref<128x128xbf16, #tpu.memory_space<vmem>>, vector<64x128xbf16>
    tpu.vector_store %arg14[%c0_51, %c0_52], %216 {strides = array<i32>} : memref<128x128xbf16, #tpu.memory_space<vmem>>, vector<64x128xbf16>,
    %218 = vector.extract_strided_slice %26 {offsets = [64, 0], sizes = [64, 128], strides = [1, 1]} : vector<128x384xbf16> to vector<64x128xbf16>
    %219 = vector.extract_strided_slice %26 {offsets = [64, 128], sizes = [64, 128], strides = [1, 1]} : vector<128x384xbf16> to vector<64x128xbf16>
    %220 = vector.extract_strided_slice %26 {offsets = [64, 256], sizes = [64, 128], strides = [1, 1]} : vector<128x384xbf16> to vector<64x128xbf16>
    %221 = tpu.concatenate %219, %219, %219, %219 in 0 : vector<64x128xbf16>, vector<64x128xbf16>, vector<64x128xbf16>, vector<64x128xbf16> -> vector<256x128xbf16>
    %c0_i32_53 = arith.constant 0 : i32
    %222 = arith.sitofp %c0_i32_53 : i32 to bf16
    %223 = vector.broadcast %222 : bf16 to vector<256x128xbf16>
    %224 = arith.select %104, %221, %223 : vector<256x128xi1>, vector<256x128xbf16>
    %225 = tpu.concatenate %220, %220, %220, %220 in 0 : vector<64x128xbf16>, vector<64x128xbf16>, vector<64x128xbf16>, vector<64x128xbf16> -> vector<256x128xbf16>
    %c0_i32_54 = arith.constant 0 : i32
    %226 = arith.sitofp %c0_i32_54 : i32 to bf16
    %227 = vector.broadcast %226 : bf16 to vector<256x128xbf16>
    %228 = arith.select %104, %225, %227 : vector<256x128xi1>, vector<256x128xbf16>
    %cst_55 = arith.constant dense<0.000000e+00> : vector<64x256xf32>
    %229 = tpu.matmul %218, %224, %cst_55 {dimension_numbers = #tpu.dot_dimension_numbers<[1], [1], [0], [0], [0, 0, 1, 0], [], []>} : vector<64x128xbf16>, vector<256x128xbf16>, vector<64x256xf32> -> vector<64x256xf32>
    %cst_56 = arith.constant 0.000000e+00 : f32
    %230 = vector.broadcast %cst_56 : f32 to vector<64x256xf32>
    %cst_57 = arith.constant -1.000000e+30 : f32
    %231 = vector.shape_cast %32 : vector<1x256xi1> to vector<1x256xi1>
    %232 = vector.broadcast %231 : vector<1x256xi1> to vector<64x256xi1>
    %233 = vector.broadcast %cst_57 : f32 to vector<64x256xf32>
    %234 = arith.select %232, %229, %233 : vector<64x256xi1>, vector<64x256xf32>
    %cst_58 = arith.constant dense<0xFF800000> : vector<64xf32>
    %235 = vector.multi_reduction <maximumf>, %234, %cst_58 [1] : vector<64x256xf32> to vector<64xf32>
    %236 = vector.shape_cast %235 : vector<64xf32> to vector<64x1xf32>
    %237 = vector.shape_cast %32 : vector<1x256xi1> to vector<1x256xi1>
    %238 = vector.broadcast %237 : vector<1x256xi1> to vector<64x256xi1>
    %239 = vector.shape_cast %236 : vector<64x1xf32> to vector<64x1xf32>
    %240 = vector.broadcast %239 : vector<64x1xf32> to vector<64x256xf32>
    %241 = arith.select %238, %240, %230 : vector<64x256xi1>, vector<64x256xf32>
    %cst_59 = arith.constant -1.000000e+30 : f32
    %242 = vector.shape_cast %37 : vector<1x256xi1> to vector<1x256xi1>
    %243 = vector.broadcast %242 : vector<1x256xi1> to vector<64x256xi1>
    %244 = vector.broadcast %cst_59 : f32 to vector<64x256xf32>
    %245 = arith.select %243, %229, %244 : vector<64x256xi1>, vector<64x256xf32>
    %cst_60 = arith.constant dense<0xFF800000> : vector<64xf32>
    %246 = vector.multi_reduction <maximumf>, %245, %cst_60 [1] : vector<64x256xf32> to vector<64xf32>
    %247 = vector.shape_cast %246 : vector<64xf32> to vector<64x1xf32>
    %248 = vector.shape_cast %37 : vector<1x256xi1> to vector<1x256xi1>
    %249 = vector.broadcast %248 : vector<1x256xi1> to vector<64x256xi1>
    %250 = vector.shape_cast %247 : vector<64x1xf32> to vector<64x1xf32>
    %251 = vector.broadcast %250 : vector<64x1xf32> to vector<64x256xf32>
    %252 = arith.select %249, %251, %241 : vector<64x256xi1>, vector<64x256xf32>
    %cst_61 = arith.constant -1.000000e+30 : f32
    %253 = vector.shape_cast %42 : vector<1x256xi1> to vector<1x256xi1>
    %254 = vector.broadcast %253 : vector<1x256xi1> to vector<64x256xi1>
    %255 = vector.broadcast %cst_61 : f32 to vector<64x256xf32>
    %256 = arith.select %254, %229, %255 : vector<64x256xi1>, vector<64x256xf32>
    %cst_62 = arith.constant dense<0xFF800000> : vector<64xf32>
    %257 = vector.multi_reduction <maximumf>, %256, %cst_62 [1] : vector<64x256xf32> to vector<64xf32>
    %258 = vector.shape_cast %257 : vector<64xf32> to vector<64x1xf32>
    %259 = vector.shape_cast %42 : vector<1x256xi1> to vector<1x256xi1>
    %260 = vector.broadcast %259 : vector<1x256xi1> to vector<64x256xi1>
    %261 = vector.shape_cast %258 : vector<64x1xf32> to vector<64x1xf32>
    %262 = vector.broadcast %261 : vector<64x1xf32> to vector<64x256xf32>
    %263 = arith.select %260, %262, %252 : vector<64x256xi1>, vector<64x256xf32>
    %cst_63 = arith.constant -1.000000e+30 : f32
    %264 = vector.shape_cast %47 : vector<1x256xi1> to vector<1x256xi1>
    %265 = vector.broadcast %264 : vector<1x256xi1> to vector<64x256xi1>
    %266 = vector.broadcast %cst_63 : f32 to vector<64x256xf32>
    %267 = arith.select %265, %229, %266 : vector<64x256xi1>, vector<64x256xf32>
    %cst_64 = arith.constant dense<0xFF800000> : vector<64xf32>
    %268 = vector.multi_reduction <maximumf>, %267, %cst_64 [1] : vector<64x256xf32> to vector<64xf32>
    %269 = vector.shape_cast %268 : vector<64xf32> to vector<64x1xf32>
    %270 = vector.shape_cast %47 : vector<1x256xi1> to vector<1x256xi1>
    %271 = vector.broadcast %270 : vector<1x256xi1> to vector<64x256xi1>
    %272 = vector.shape_cast %269 : vector<64x1xf32> to vector<64x1xf32>
    %273 = vector.broadcast %272 : vector<64x1xf32> to vector<64x256xf32>
    %274 = arith.select %271, %273, %263 : vector<64x256xi1>, vector<64x256xf32>
    %275 = arith.subf %229, %274 : vector<64x256xf32>
    %276 = math.exp %275 : vector<64x256xf32>
    %cst_65 = arith.constant 0.000000e+00 : f32
    %277 = vector.broadcast %cst_65 : f32 to vector<64x256xf32>
    %cst_66 = arith.constant 0.000000e+00 : f32
    %278 = vector.shape_cast %32 : vector<1x256xi1> to vector<1x256xi1>
    %279 = vector.broadcast %278 : vector<1x256xi1> to vector<64x256xi1>
    %280 = vector.broadcast %cst_66 : f32 to vector<64x256xf32>
    %281 = arith.select %279, %276, %280 : vector<64x256xi1>, vector<64x256xf32>
    %cst_67 = arith.constant dense<0.000000e+00> : vector<64xf32>
    %282 = vector.multi_reduction <add>, %281, %cst_67 [1] : vector<64x256xf32> to vector<64xf32>
    %283 = vector.shape_cast %282 : vector<64xf32> to vector<64x1xf32>
    %284 = tpu.reciprocal %283 {approx = true} : vector<64x1xf32> -> vector<64x1xf32>
    %285 = vector.shape_cast %32 : vector<1x256xi1> to vector<1x256xi1>
    %286 = vector.broadcast %285 : vector<1x256xi1> to vector<64x256xi1>
    %287 = vector.shape_cast %284 : vector<64x1xf32> to vector<64x1xf32>
    %288 = vector.broadcast %287 : vector<64x1xf32> to vector<64x256xf32>
    %289 = arith.select %286, %288, %277 : vector<64x256xi1>, vector<64x256xf32>
    %cst_68 = arith.constant 0.000000e+00 : f32
    %290 = vector.shape_cast %37 : vector<1x256xi1> to vector<1x256xi1>
    %291 = vector.broadcast %290 : vector<1x256xi1> to vector<64x256xi1>
    %292 = vector.broadcast %cst_68 : f32 to vector<64x256xf32>
    %293 = arith.select %291, %276, %292 : vector<64x256xi1>, vector<64x256xf32>
    %cst_69 = arith.constant dense<0.000000e+00> : vector<64xf32>
    %294 = vector.multi_reduction <add>, %293, %cst_69 [1] : vector<64x256xf32> to vector<64xf32>
    %295 = vector.shape_cast %294 : vector<64xf32> to vector<64x1xf32>
    %296 = tpu.reciprocal %295 {approx = true} : vector<64x1xf32> -> vector<64x1xf32>
    %297 = vector.shape_cast %37 : vector<1x256xi1> to vector<1x256xi1>
    %298 = vector.broadcast %297 : vector<1x256xi1> to vector<64x256xi1>
    %299 = vector.shape_cast %296 : vector<64x1xf32> to vector<64x1xf32>
    %300 = vector.broadcast %299 : vector<64x1xf32> to vector<64x256xf32>
    %301 = arith.select %298, %300, %289 : vector<64x256xi1>, vector<64x256xf32>
    %cst_70 = arith.constant 0.000000e+00 : f32
    %302 = vector.shape_cast %42 : vector<1x256xi1> to vector<1x256xi1>
    %303 = vector.broadcast %302 : vector<1x256xi1> to vector<64x256xi1>
    %304 = vector.broadcast %cst_70 : f32 to vector<64x256xf32>
    %305 = arith.select %303, %276, %304 : vector<64x256xi1>, vector<64x256xf32>
    %cst_71 = arith.constant dense<0.000000e+00> : vector<64xf32>
    %306 = vector.multi_reduction <add>, %305, %cst_71 [1] : vector<64x256xf32> to vector<64xf32>
    %307 = vector.shape_cast %306 : vector<64xf32> to vector<64x1xf32>
    %308 = tpu.reciprocal %307 {approx = true} : vector<64x1xf32> -> vector<64x1xf32>
    %309 = vector.shape_cast %42 : vector<1x256xi1> to vector<1x256xi1>
    %310 = vector.broadcast %309 : vector<1x256xi1> to vector<64x256xi1>
    %311 = vector.shape_cast %308 : vector<64x1xf32> to vector<64x1xf32>
    %312 = vector.broadcast %311 : vector<64x1xf32> to vector<64x256xf32>
    %313 = arith.select %310, %312, %301 : vector<64x256xi1>, vector<64x256xf32>
    %cst_72 = arith.constant 0.000000e+00 : f32
    %314 = vector.shape_cast %47 : vector<1x256xi1> to vector<1x256xi1>
    %315 = vector.broadcast %314 : vector<1x256xi1> to vector<64x256xi1>
    %316 = vector.broadcast %cst_72 : f32 to vector<64x256xf32>
    %317 = arith.select %315, %276, %316 : vector<64x256xi1>, vector<64x256xf32>
    %cst_73 = arith.constant dense<0.000000e+00> : vector<64xf32>
    %318 = vector.multi_reduction <add>, %317, %cst_73 [1] : vector<64x256xf32> to vector<64xf32>
    %319 = vector.shape_cast %318 : vector<64xf32> to vector<64x1xf32>
    %320 = tpu.reciprocal %319 {approx = true} : vector<64x1xf32> -> vector<64x1xf32>
    %321 = vector.shape_cast %47 : vector<1x256xi1> to vector<1x256xi1>
    %322 = vector.broadcast %321 : vector<1x256xi1> to vector<64x256xi1>
    %323 = vector.shape_cast %320 : vector<64x1xf32> to vector<64x1xf32>
    %324 = vector.broadcast %323 : vector<64x1xf32> to vector<64x256xf32>
    %325 = arith.select %322, %324, %313 : vector<64x256xi1>, vector<64x256xf32>
    %326 = arith.mulf %276, %325 : vector<64x256xf32>
    %327 = arith.truncf %326 : vector<64x256xf32> to vector<64x256xbf16>
    %cst_74 = arith.constant dense<0.000000e+00> : vector<64x128xf32>
    %328 = tpu.matmul %327, %228, %cst_74 {dimension_numbers = #tpu.dot_dimension_numbers<[1], [0], [0], [1], [0, 0, 1, 1], [], []>} : vector<64x256xbf16>, vector<256x128xbf16>, vector<64x128xf32> -> vector<64x128xf32>
    %329 = arith.truncf %328 : vector<64x128xf32> to vector<64x128xbf16>
    %c64 = arith.constant 64 : index
    %c0_75 = arith.constant 0 : index
    %330 = vector.load %arg14[%c64, %c0_75] : memref<128x128xbf16, #tpu.memory_space<vmem>>, vector<64x128xbf16>
    tpu.vector_store %arg14[%c64, %c0_75], %329 {strides = array<i32>} : memref<128x128xbf16, #tpu.memory_space<vmem>>, vector<64x128xbf16>,
    %c0_76 = arith.constant 0 : index
    %c0_77 = arith.constant 0 : index
    %331 = vector.load %arg14[%c0_76, %c0_77] : memref<128x128xbf16, #tpu.memory_space<vmem>>, vector<128x128xbf16>
    %c0_78 = arith.constant 0 : index
    %c0_79 = arith.constant 0 : index
    %332 = vector.load %arg5[%c0_78, %c0_79] : memref<128x128xbf16, #tpu.memory_space<vmem>>, vector<128x128xbf16>
    %cst_80 = arith.constant dense<0.000000e+00> : vector<128x128xf32>
    %333 = tpu.matmul %331, %332, %cst_80 {dimension_numbers = #tpu.dot_dimension_numbers<[1], [0], [0], [1], [0, 0, 1, 1], [], []>} : vector<128x128xbf16>, vector<128x128xbf16>, vector<128x128xf32> -> vector<128x128xf32>
    %c0_81 = arith.constant 0 : index
    %c0_82 = arith.constant 0 : index
    %334 = vector.load %arg6[%c0_81, %c0_82] : memref<1x128xf32, #tpu.memory_space<vmem>>, vector<1x128xf32>
    %335 = vector.broadcast %334 : vector<1x128xf32> to vector<128x128xf32>
    %336 = arith.addf %333, %335 : vector<128x128xf32>
    %337 = arith.addf %0, %336 : vector<128x128xf32>
    %c0_83 = arith.constant 0 : index
    %c0_84 = arith.constant 0 : index
    %338 = vector.load %arg7[%c0_83, %c0_84] : memref<1x128xf32, #tpu.memory_space<vmem>>, vector<1x128xf32>
    %c0_85 = arith.constant 0 : index
    %c0_86 = arith.constant 0 : index
    %339 = vector.load %arg8[%c0_85, %c0_86] : memref<1x128xf32, #tpu.memory_space<vmem>>, vector<1x128xf32>
    %cst_87 = arith.constant dense<0.000000e+00> : vector<128xf32>
    %340 = vector.multi_reduction <add>, %337, %cst_87 [1] : vector<128x128xf32> to vector<128xf32>
    %341 = vector.shape_cast %340 : vector<128xf32> to vector<128x1xf32>
    %cst_88 = arith.constant 1.280000e+02 : f32
    %342 = vector.broadcast %cst_88 : f32 to vector<128x1xf32>
    %343 = arith.divf %341, %342 : vector<128x1xf32>
    %344 = vector.broadcast %343 : vector<128x1xf32> to vector<128x128xf32>
    %345 = arith.subf %337, %344 : vector<128x128xf32>
    %346 = arith.mulf %345, %345 : vector<128x128xf32>
    %cst_89 = arith.constant dense<0.000000e+00> : vector<128xf32>
    %347 = vector.multi_reduction <add>, %346, %cst_89 [1] : vector<128x128xf32> to vector<128xf32>
    %348 = vector.shape_cast %347 : vector<128xf32> to vector<128x1xf32>
    %cst_90 = arith.constant 1.280000e+02 : f32
    %349 = vector.broadcast %cst_90 : f32 to vector<128x1xf32>
    %350 = arith.divf %348, %349 : vector<128x1xf32>
    %cst_91 = arith.constant 9.99999974E-6 : f32
    %351 = vector.broadcast %cst_91 : f32 to vector<128x1xf32>
    %352 = arith.addf %350, %351 : vector<128x1xf32>
    %353 = math.rsqrt %352 : vector<128x1xf32>
    %354 = vector.broadcast %353 : vector<128x1xf32> to vector<128x128xf32>
    %355 = arith.mulf %345, %354 : vector<128x128xf32>
    %356 = vector.broadcast %338 : vector<1x128xf32> to vector<128x128xf32>
    %357 = arith.mulf %355, %356 : vector<128x128xf32>
    %358 = vector.broadcast %339 : vector<1x128xf32> to vector<128x128xf32>
    %359 = arith.addf %357, %358 : vector<128x128xf32>
    %360 = arith.truncf %359 : vector<128x128xf32> to vector<128x128xbf16>
    %c0_92 = arith.constant 0 : index
    %c0_93 = arith.constant 0 : index
    %361 = vector.load %arg9[%c0_92, %c0_93] : memref<128x512xbf16, #tpu.memory_space<vmem>>, vector<128x512xbf16>
    %cst_94 = arith.constant dense<0.000000e+00> : vector<128x512xf32>
    %362 = tpu.matmul %360, %361, %cst_94 {dimension_numbers = #tpu.dot_dimension_numbers<[1], [0], [0], [1], [0, 0, 1, 1], [], []>} : vector<128x128xbf16>, vector<128x512xbf16>, vector<128x512xf32> -> vector<128x512xf32>
    %c0_95 = arith.constant 0 : index
    %c0_96 = arith.constant 0 : index
    %363 = vector.load %arg10[%c0_95, %c0_96] : memref<1x512xf32, #tpu.memory_space<vmem>>, vector<1x512xf32>
    %364 = vector.broadcast %363 : vector<1x512xf32> to vector<128x512xf32>
    %365 = arith.addf %362, %364 : vector<128x512xf32>
    %cst_97 = arith.constant 5.000000e-01 : f32
    %366 = vector.broadcast %cst_97 : f32 to vector<128x512xf32>
    %367 = arith.mulf %366, %365 : vector<128x512xf32>
    %368 = arith.mulf %365, %365 : vector<128x512xf32>
    %369 = arith.mulf %368, %365 : vector<128x512xf32>
    %cst_98 = arith.constant 4.471500e-02 : f32
    %370 = vector.broadcast %cst_98 : f32 to vector<128x512xf32>
    %371 = arith.mulf %370, %369 : vector<128x512xf32>
    %372 = arith.addf %365, %371 : vector<128x512xf32>
    %cst_99 = arith.constant 0.797884583 : f32
    %373 = vector.broadcast %cst_99 : f32 to vector<128x512xf32>
    %374 = arith.mulf %373, %372 : vector<128x512xf32>
    %375 = math.tanh %374 : vector<128x512xf32>
    %cst_100 = arith.constant 1.000000e+00 : f32
    %376 = vector.broadcast %cst_100 : f32 to vector<128x512xf32>
    %377 = arith.addf %376, %375 : vector<128x512xf32>
    %378 = arith.mulf %367, %377 : vector<128x512xf32>
    %379 = arith.truncf %378 : vector<128x512xf32> to vector<128x512xbf16>
    %c0_101 = arith.constant 0 : index
    %c0_102 = arith.constant 0 : index
    %380 = vector.load %arg11[%c0_101, %c0_102] : memref<512x128xbf16, #tpu.memory_space<vmem>>, vector<512x128xbf16>
    %cst_103 = arith.constant dense<0.000000e+00> : vector<128x128xf32>
    %381 = tpu.matmul %379, %380, %cst_103 {dimension_numbers = #tpu.dot_dimension_numbers<[1], [0], [0], [1], [0, 0, 1, 1], [], []>} : vector<128x512xbf16>, vector<512x128xbf16>, vector<128x128xf32> -> vector<128x128xf32>
    %382 = arith.addf %337, %381 : vector<128x128xf32>
    %c0_104 = arith.constant 0 : index
    %c0_105 = arith.constant 0 : index
    %383 = vector.load %arg12[%c0_104, %c0_105] : memref<1x128xf32, #tpu.memory_space<vmem>>, vector<1x128xf32>
    %384 = vector.broadcast %383 : vector<1x128xf32> to vector<128x128xf32>
    %385 = arith.addf %382, %384 : vector<128x128xf32>
    %c0_106 = arith.constant 0 : index
    %c0_107 = arith.constant 0 : index
    %386 = vector.load %arg13[%c0_106, %c0_107] : memref<128x128xf32, #tpu.memory_space<vmem>>, vector<128x128xf32>
    tpu.vector_store %arg13[%c0_106, %c0_107], %385 {strides = array<i32>} : memref<128x128xf32, #tpu.memory_space<vmem>>, vector<128x128xf32>,
    return
  }
  func.func @transform_0(%arg0: i32) -> (i32, i32) {
    %c0_i32 = arith.constant 0 : i32
    %c0_i32_0 = arith.constant 0 : i32
    return %arg0, %c0_i32 : i32, i32
  }
  func.func @transform_1(%arg0: i32) -> (i32, i32) {
    %c0_i32 = arith.constant 0 : i32
    %c0_i32_0 = arith.constant 0 : i32
    %c0_i32_1 = arith.constant 0 : i32
    return %c0_i32, %c0_i32_0 : i32, i32
  }
  func.func @transform_2(%arg0: i32) -> (i32, i32) {
    %c0_i32 = arith.constant 0 : i32
    %c0_i32_0 = arith.constant 0 : i32
    %c0_i32_1 = arith.constant 0 : i32
    return %c0_i32, %c0_i32_0 : i32, i32
  }
  func.func @transform_3(%arg0: i32) -> (i32, i32) {
    %c0_i32 = arith.constant 0 : i32
    %c0_i32_0 = arith.constant 0 : i32
    %c0_i32_1 = arith.constant 0 : i32
    return %c0_i32, %c0_i32_0 : i32, i32
  }
  func.func @transform_4(%arg0: i32) -> (i32, i32) {
    %c0_i32 = arith.constant 0 : i32
    %c0_i32_0 = arith.constant 0 : i32
    %c0_i32_1 = arith.constant 0 : i32
    return %c0_i32, %c0_i32_0 : i32, i32
  }
  func.func @transform_5(%arg0: i32) -> (i32, i32) {
    %c0_i32 = arith.constant 0 : i32
    %c0_i32_0 = arith.constant 0 : i32
    %c0_i32_1 = arith.constant 0 : i32
    return %c0_i32, %c0_i32_0 : i32, i32
  }
  func.func @transform_6(%arg0: i32) -> (i32, i32) {
    %c0_i32 = arith.constant 0 : i32
    %c0_i32_0 = arith.constant 0 : i32
    %c0_i32_1 = arith.constant 0 : i32
    return %c0_i32, %c0_i32_0 : i32, i32
  }
  func.func @transform_7(%arg0: i32) -> (i32, i32) {
    %c0_i32 = arith.constant 0 : i32
    %c0_i32_0 = arith.constant 0 : i32
    %c0_i32_1 = arith.constant 0 : i32
    return %c0_i32, %c0_i32_0 : i32, i32
  }
  func.func @transform_8(%arg0: i32) -> (i32, i32) {
    %c0_i32 = arith.constant 0 : i32
    %c0_i32_0 = arith.constant 0 : i32
    %c0_i32_1 = arith.constant 0 : i32
    return %c0_i32, %c0_i32_0 : i32, i32
  }
  func.func @transform_9(%arg0: i32) -> (i32, i32) {
    %c0_i32 = arith.constant 0 : i32
    %c0_i32_0 = arith.constant 0 : i32
    %c0_i32_1 = arith.constant 0 : i32
    return %c0_i32, %c0_i32_0 : i32, i32
  }
  func.func @transform_10(%arg0: i32) -> (i32, i32) {
    %c0_i32 = arith.constant 0 : i32
    %c0_i32_0 = arith.constant 0 : i32
    %c0_i32_1 = arith.constant 0 : i32
    return %c0_i32, %c0_i32_0 : i32, i32
  }
  func.func @transform_11(%arg0: i32) -> (i32, i32) {
    %c0_i32 = arith.constant 0 : i32
    %c0_i32_0 = arith.constant 0 : i32
    %c0_i32_1 = arith.constant 0 : i32
    return %c0_i32, %c0_i32_0 : i32, i32
  }
  func.func @transform_12(%arg0: i32) -> (i32, i32) {
    %c0_i32 = arith.constant 0 : i32
    %c0_i32_0 = arith.constant 0 : i32
    return %arg0, %c0_i32 : i32, i32
  }
}

</mosaic_0001>

<bundles_post_ra>
// kernel: transformer_block_pallas.1
= control target key start
LH: loop header
LB: loop body
LE: loop exit
PB: predicated region body
PF: predicated region fallthrough
CT: control target
= control target key end

     0   :  { %s9519_s0 = inlined_call_operand.vmem [shape: f32[512,128], index: 0, kind: input, shape index: {}]   ;;  %s9520_s1 = inlined_call_operand.vmem [shape: f32[1,128], index: 1, kind: input, shape index: {}]   ;;  %s9521_s2 = inlined_call_operand.vmem [shape: f32[1,128], index: 2, kind: input, shape index: {}]   ;;  %s9522_s3 = inlined_call_operand.vmem [shape: bf16[128,384], index: 3, kind: input, shape index: {}]   ;;  %s9523_s4 = inlined_call_operand.vmem [shape: bf16[128,128], index: 4, kind: input, shape index: {}]   ;;  %s9524_s5 = inlined_call_operand.vmem [shape: f32[1,128], index: 5, kind: input, shape index: {}]   ;;  %s9525_s6 = inlined_call_operand.vmem [shape: f32[1,128], index: 6, kind: input, shape index: {}]   ;;  %s9526_s7 = inlined_call_operand.vmem [shape: f32[1,128], index: 7, kind: input, shape index: {}]   ;;  %s9527_s8 = inlined_call_operand.vmem [shape: bf16[128,512], index: 8, kind: input, shape index: {}]   ;;  %s9528_s9 = inlined_call_operand.vmem [shape: f32[1,512], index: 9, kind: input, shape index: {}]   ;;  %s9529_s10 = inlined_call_operand.vmem [shape: bf16[512,128], index: 10, kind: input, shape index: {}]   ;;  %s9530_s11 = inlined_call_operand.vmem [shape: f32[1,128], index: 11, kind: input, shape index: {}]   ;;  %s9531_s12 = inlined_call_operand.hbm [shape: f32[512,128], index: 12, kind: output, shape index: {}]  }
   0x1   :  { %9573 = sst [smem:[#allocation43_spill]] %s9519_s0 }
   0x2   :  { %9574 = sst [smem:[#allocation44_spill]] %s9520_s1 }
   0x3   :  { %17 = vsyncpa [#allocation4], 0 }
   0x4   :  { %19 = vsyncpa [#allocation4 + $0x1], 0  ;;  %s6931_s21 = smov 0   ;;  %s6933_s22 = smov 0  }
   0x5   :  { %s6935_s23 = smov 0   ;;  %s6937_s24 = smov 0  }
   0x6 LB: > { %s6952_s25 = sadd.s32 4294967295, %s6860_s24   ;;  %s5660_s26 = sadd.s32 4294967294, %s6860_s24   ;;  %s6860_s24 = sphi %s6937_s24, %s9665_s24   ;;  %s6856_s23 = sphi %s6935_s23, %s9664_s23   ;;  %s6852_s22 = sphi %s6933_s22, %s9663_s22   ;;  %s6848_s21 = sphi %s6931_s21, %s9662_s21  }
   0x7   : > { %s6956_s27 = sadd.s32 1, %s6860_s24   ;;  %s289_s28 = sadd.s32 1, %s6856_s23 }
   0x8   : > { %s286_s29 = ssub.s32 %s6860_s24, %s6956_s27  ;;  %p299_p0 = scmp.ne.s32.totalorder %s6856_s23, %s6852_s22 }
   0x9   : > { %p287_p1 = scmp.eq.s32.totalorder %s286_s29, 0  ;;  %p300_p2 = scmp.eq.s32.totalorder %s6952_s25, 3 }
   0xa   : > { %p305_p3 = scmp.ne.s32.totalorder %s6852_s22, %s6848_s21  ;;  %p306_p4 = scmp.eq.s32.totalorder %s5660_s26, 3 }
   0xb   : > { %s6967_s30 = scalar_select %p287_p1, %s6856_s23, %s289_s28  }
   0xc   : > { %p6969_p5 = por %p300_p2, %p299_p0  ;;  %p6973_p6 = por %p306_p4, %p305_p3 }
   0xd   : > { %p5663_p7 = scmp.ge.s32.totalorder %s6860_s24, 1  ;;  %p366_p8 = scmp.lt.s32.totalorder %s6860_s24, 5 }
   0xf   : > { %p367_p9 = pnand %p5663_p7, %p366_p8 }
  0x11   : > { %370 = sbr.rel (%p367_p9) target bundleno = 3031 (0xbd7), region = 68 }
  0x16   : > { %s5665_s15 = sshll.u32 %s6952_s25, 4  ;;  %s9577_s0 = sld [smem:[#allocation43_spill]]  ;;  %v6272_v8 = vld [vmem:[%s9522_s3 + $0xac] ss:$12 sps:$4 sm:$0xff]   ;;  %v6274_v9 = vld [vmem:[%s9522_s3 + $0xa8] ss:$12 sps:$4 sm:$0xff]  }
  0x17   : > { %p409_p10 = scmp.lt.s32.totalorder %s5665_s15, 63  ;;  %823 = vmatprep.subr.bf16.mxu0 %v6272_v8  ;;  %v6275_v41 = vld [vmem:[%s9522_s3 + $0x94] ss:$12 sps:$4 sm:$0xff]   ;;  %v6277_v42 = vld [vmem:[%s9522_s3 + $0xb0] ss:$12 sps:$4 sm:$0xff]   ;;  %v6862_v8 = vmov 0  }
  0x18   : > { %824 = vmatpush1.bf16.msra.mxu0 %v6274_v9  ;;  %v6278_v43 = vld [vmem:[%s9522_s3 + $0x90] ss:$12 sps:$4 sm:$0xff]   ;;  %6150 = vmatprep.subr.bf16.mxu1 %v6277_v42  ;;  %v6281_v47 = vld [vmem:[%s9522_s3 + $0x98] ss:$12 sps:$4 sm:$0xff]   ;;  %v6285_v52 = vld [vmem:[%s9522_s3 + $0x80] ss:$12 sps:$4 sm:$0xff]  }
  0x19   : > { %s9667_s15 = smov (!%p409_p10, %s5665_s15), 63  ;;  %825 = vmatprep.subr.bf16.mxu0 %v6275_v41  ;;  %6151 = vmatpush3.bf16.msra.mxu1 %v6277_v42  ;;  %v6279_v46 = vld [vmem:[%s9522_s3 + $0x7c] ss:$12 sps:$4 sm:$0xff]   ;;  %v6282_v48 = vld [vmem:[%s9522_s3 + $0x78] ss:$12 sps:$4 sm:$0xff]   ;;  %s9578_s1 = sld [smem:[#allocation44_spill]] }
  0x1a   : > { %s5666_s16 = sshll.u32 %s9667_s15, 3  ;;  %6152 = vmatprep.subr.bf16.mxu1 %v6281_v47  ;;  %v6283_v51 = vld [vmem:[%s9522_s3 + $0x64] ss:$12 sps:$4 sm:$0xff]   ;;  %v6286_v53 = vld [vmem:[%s9522_s3 + $0x60] ss:$12 sps:$4 sm:$0xff]   ;;  %855 = vmatprep.mubr.bf16.mxu0 %v6862_v8  ;;  %s405_s29 = sand.u32 1, %s6852_s22  }
  0x1b   : > { %v6287_v56 = vld [vmem:[%s9522_s3 + $0x4c] ss:$12 sps:$4 sm:$0xff]   ;;  %v6289_v57 = vld [vmem:[%s9522_s3 + $0x68] ss:$12 sps:$4 sm:$0xff]   ;;  %v6293_v62 = vld [vmem:[%s9522_s3 + $0x50] ss:$12 sps:$4 sm:$0xff]  }
  0x1c   : > { %s6983_s19 = scalar_lea.vmem %s9577_s0, %s5666_s16  ;;  %826 = vmatpush1.bf16.msra.mxu0 %v6278_v43  ;;  %v6290_v58 = vld [vmem:[%s9522_s3 + $0x48] ss:$12 sps:$4 sm:$0xff]   ;;  %v6294_v63 = vld [vmem:[%s9522_s3 + $0x30] ss:$12 sps:$4 sm:$0xff]   ;;  %s5664_s15 = sshll.u32 %s405_s29, 7 }
  0x1d   : > { %v416_v0 = vld [vmem:[%s6983_s19] sm:$0xff]  ;;  %v418_v1 = vld [vmem:[%s6983_s19 + $0x10] sm:$0xff]  ;;  %v417_v2 = vld [vmem:[%s6983_s19 + $0x8] sm:$0xff]  ;;  %827 = vmatprep.subr.bf16.mxu0 %v6279_v46  ;;  %6153 = vmatpush3.bf16.msra.mxu1 %v6281_v47  ;;  %s9420_s0 = scalar_lea.vmem [#allocation3], %s5664_s15  ;;  %s5814_s17 = sshll.u32 %s6952_s25, 11 }
  0x1e   : > { %434 = vadd.xlane.f32.xlu0 %v416_v0  ;;  %438 = vadd.xlane.f32.xlu1 %v418_v1  ;;  %v419_v3 = vld [vmem:[%s6983_s19 + $0x18] sm:$0xff]  ;;  %v420_v4 = vld [vmem:[%s6983_s19 + $0x20] sm:$0xff]  ;;  %v421_v5 = vld [vmem:[%s6983_s19 + $0x28] sm:$0xff]  ;;  %s5598_s18 = sshll.u32 %s9420_s0, 4  ;;  %s9471_s28 = scalar_lea.hbm %s9531_s12, %s5814_s17  ;;  %s9473_s18 = int_to_ptr.vmem [resolvable:$true] %s5598_s18 }
  0x1f   : > { %v422_v6 = vld [vmem:[%s6983_s19 + $0x30] sm:$0xff]  ;;  %v423_v7 = vld [vmem:[%s6983_s19 + $0x38] sm:$0xff]  ;;  %v7041_v45 = vld [vmem:[%s6983_s19 + $0x40] sm:$0xff]  ;;  %6154 = vmatprep.subr.bf16.mxu1 %v6285_v52  ;;  %s9479_s15 = scalar_lea.sflag [#allocation4], %s405_s29  ;;  %s6800_s25 = scalar_lea.vmem %s9473_s18, 2048 }
  0x20   : > { %v7054_v49 = vld [vmem:[%s6983_s19 + $0x48] sm:$0xff]  ;;  %v7057_v50 = vld [vmem:[%s6983_s19 + $0x50] sm:$0xff]  ;;  %828 = vmatpush1.bf16.msra.mxu0 %v6282_v48  ;;  %v7071_v54 = vld [vmem:[%s6983_s19 + $0x58] sm:$0xff]  ;;  %p6801_p11 = scmp.ne.s32.totalorder %s9473_s18, %s6800_s25  ;;  %s6863_s16 = smov [#allocation3]  }
  0x21   : > { %v7074_v55 = vld [vmem:[%s6983_s19 + $0x60] sm:$0xff]  ;;  %829 = vmatprep.subr.bf16.mxu0 %v6283_v51  ;;  %6155 = vmatpush3.bf16.msra.mxu1 %v6285_v52  ;;  %v7088_v59 = vld [vmem:[%s6983_s19 + $0x68] sm:$0xff]  ;;  %v7091_v60 = vld [vmem:[%s6983_s19 + $0x70] sm:$0xff] }
  0x22   : > { %436 = vadd.xlane.f32.xlu0 %v417_v2  ;;  %440 = vadd.xlane.f32.xlu1 %v419_v3  ;;  %v6291_v61 = vld [vmem:[%s9522_s3 + $0x34] ss:$12 sps:$4 sm:$0xff]   ;;  %p6802_p12 = pnand %p6801_p11, %p6969_p5 }
  0x23   : > { %6156 = vmatprep.subr.bf16.mxu1 %v6289_v57 }
  0x24   : > { %830 = vmatpush1.bf16.msra.mxu0 %v6286_v53  ;;  %p6803_p13 = pneg %p6802_p12 }
  0x25   : > { %831 = vmatprep.subr.bf16.mxu0 %v6287_v56  ;;  %6157 = vmatpush3.bf16.msra.mxu1 %v6289_v57  ;;  %v7139_v56 = vld [vmem:[%s9578_s1] ss:$0 sm:$0xff] }
  0x26   : > { %442 = vadd.xlane.f32.xlu0 %v420_v4  ;;  %444 = vadd.xlane.f32.xlu1 %v421_v5 }
  0x27   : > { %6158 = vmatprep.subr.bf16.mxu1 %v6293_v62 }
  0x28   : > { %832 = vmatpush1.bf16.msra.mxu0 %v6290_v58 }
  0x29   : > { %833 = vmatprep.subr.bf16.mxu0 %v6291_v61  ;;  %6159 = vmatpush3.bf16.msra.mxu1 %v6293_v62 }
  0x2a   : > { %446 = vadd.xlane.f32.xlu0 %v422_v6  ;;  %448 = vadd.xlane.f32.xlu1 %v423_v7 }
  0x2c   : > { %834 = vmatpush1.bf16.msra.mxu0 %v6294_v63 }
  0xa7   : > { %v435_v10 = vpop.xlane.xlu0 %434  ;;  %v439_v11 = vpop.xlane.xlu1 %438 }
  0xa8   : > { %v467_v12 = vmul.f32 0.0078125, %v435_v10  ;;  %v469_v13 = vmul.f32 0.0078125, %v439_v11 }
  0xaa   : > { %v6999_v14 = vsub.f32 %v416_v0, %v467_v12  ;;  %v7001_v15 = vsub.f32 %v418_v1, %v469_v13  ;;  %v7105_v0 = vld [vmem:[%s6983_s19 + $0x78] sm:$0xff] }
  0xab   : > { %v437_v16 = vpop.xlane.xlu0 %436  ;;  %v441_v17 = vpop.xlane.xlu1 %440  ;;  %v6295_v1 = vld [vmem:[%s9522_s3 + $0x1c] ss:$12 sps:$4 sm:$0xff]  }
  0xac   : > { %v468_v18 = vmul.f32 0.0078125, %v437_v16  ;;  %v499_v19 = vmul.f32 %v6999_v14, %v6999_v14  ;;  %v470_v20 = vmul.f32 0.0078125, %v441_v17  ;;  %v501_v21 = vmul.f32 %v7001_v15, %v7001_v15  ;;  %835 = vmatprep.subr.bf16.mxu0 %v6295_v1 }
  0xae   : > { %515 = vadd.xlane.f32.xlu0 %v499_v19  ;;  %v7007_v22 = vsub.f32 %v417_v2, %v468_v18  ;;  %v7009_v23 = vsub.f32 %v419_v3, %v470_v20  ;;  %v6297_v2 = vld [vmem:[%s9522_s3 + $0x38] ss:$12 sps:$4 sm:$0xff]  }
  0xaf   : > { %v443_v24 = vpop.xlane.xlu0 %442  ;;  %v445_v25 = vpop.xlane.xlu1 %444  ;;  %v6298_v3 = vld [vmem:[%s9522_s3 + $0x18] ss:$12 sps:$4 sm:$0xff]   ;;  %6160 = vmatprep.subr.bf16.mxu1 %v6297_v2 }
  0xb0   : > { %v471_v26 = vmul.f32 0.0078125, %v443_v24  ;;  %v500_v27 = vmul.f32 %v7007_v22, %v7007_v22  ;;  %v472_v28 = vmul.f32 0.0078125, %v445_v25  ;;  %v502_v29 = vmul.f32 %v7009_v23, %v7009_v23  ;;  %836 = vmatpush1.bf16.msra.mxu0 %v6298_v3  ;;  %6161 = vmatpush3.bf16.msra.mxu1 %v6297_v2 }
  0xb2   : > { %519 = vadd.xlane.f32.xlu0 %v501_v21  ;;  %517 = vadd.xlane.f32.xlu1 %v500_v27  ;;  %v7015_v30 = vsub.f32 %v420_v4, %v471_v26  ;;  %v7017_v31 = vsub.f32 %v421_v5, %v472_v28  ;;  %v6299_v4 = vld [vmem:[%s9522_s3 + $0x4] ss:$12 sps:$4 sm:$0xff]   ;;  %v6301_v5 = vld [vmem:[%s9522_s3 + $0x20] ss:$12 sps:$4 sm:$0xff]  }
  0xb3   : > { %v447_v32 = vpop.xlane.xlu0 %446  ;;  %v449_v33 = vpop.xlane.xlu1 %448  ;;  %837 = vmatprep.subr.bf16.mxu0 %v6299_v4  ;;  %6162 = vmatprep.subr.bf16.mxu1 %v6301_v5 }
  0xb4   : > { %v473_v34 = vmul.f32 0.0078125, %v447_v32  ;;  %v503_v35 = vmul.f32 %v7015_v30, %v7015_v30  ;;  %v474_v36 = vmul.f32 0.0078125, %v449_v33  ;;  %v504_v37 = vmul.f32 %v7017_v31, %v7017_v31  ;;  %6163 = vmatpush3.bf16.msra.mxu1 %v6301_v5 }
  0xb6   : > { %521 = vadd.xlane.f32.xlu1 %v502_v29  ;;  %523 = vadd.xlane.f32.xlu0 %v503_v35  ;;  %v7023_v38 = vsub.f32 %v422_v6, %v473_v34  ;;  %v7025_v39 = vsub.f32 %v423_v7, %v474_v36  ;;  %v6302_v6 = vld [vmem:[%s9522_s3] ss:$12 sps:$4 sm:$0xff]   ;;  %v6303_v7 = vld [vmem:[%s9522_s3 + $0x8] ss:$12 sps:$4 sm:$0xff]  }
  0xb7   : > { %838 = vmatpush1.bf16.msra.mxu0 %v6302_v6  ;;  %6164 = vmatprep.subr.bf16.mxu1 %v6303_v7 }
  0xb8   : > { %v505_v40 = vmul.f32 %v7023_v38, %v7023_v38  ;;  %v506_v44 = vmul.f32 %v7025_v39, %v7025_v39  ;;  %6165 = vmatpush3.bf16.msra.mxu1 %v6303_v7 }
  0xba   : > { %525 = vadd.xlane.f32.xlu1 %v504_v37  ;;  %527 = vadd.xlane.f32.xlu0 %v505_v40 }
  0xbe   : > { %529 = vadd.xlane.f32.xlu1 %v506_v44  ;;  %450 = vadd.xlane.f32.xlu0 %v7041_v45 }
  0xc2   : > { %452 = vadd.xlane.f32.xlu1 %v7054_v49  ;;  %454 = vadd.xlane.f32.xlu0 %v7057_v50 }
  0xc6   : > { %456 = vadd.xlane.f32.xlu1 %v7071_v54  ;;  %458 = vadd.xlane.f32.xlu0 %v7074_v55 }
  0xca   : > { %460 = vadd.xlane.f32.xlu1 %v7088_v59  ;;  %462 = vadd.xlane.f32.xlu0 %v7091_v60 }
  0xce   : > { %464 = vadd.xlane.f32.xlu1 %v7105_v0 }
 0x137   : > { %v516_v9 = vpop.xlane.xlu0 %515 }
 0x138   : > { %v547_v10 = vmul.f32 0.0078125, %v516_v9 }
 0x13a   : > { %v563_v11 = vadd.f32 1e-05, %v547_v10 }
 0x13b   : > { %v518_v12 = vpop.xlane.xlu1 %517  ;;  %v520_v13 = vpop.xlane.xlu0 %519 }
 0x13c   : > { %6400 = vrsqrt.f32 %v563_v11  ;;  %v548_v16 = vmul.f32 0.0078125, %v518_v12  ;;  %v549_v17 = vmul.f32 0.0078125, %v520_v13 }
 0x13e   : > { %v564_v18 = vadd.f32 1e-05, %v548_v16  ;;  %v565_v19 = vadd.f32 1e-05, %v549_v17 }
 0x13f   : > { %v522_v20 = vpop.xlane.xlu1 %521  ;;  %v524_v21 = vpop.xlane.xlu0 %523 }
 0x140   : > { %6402 = vrsqrt.f32 %v564_v18  ;;  %v550_v24 = vmul.f32 0.0078125, %v522_v20  ;;  %v551_v25 = vmul.f32 0.0078125, %v524_v21 }
 0x141   : > { %6404 = vrsqrt.f32 %v565_v19 }
 0x142   : > { %v566_v26 = vadd.f32 1e-05, %v550_v24  ;;  %v567_v27 = vadd.f32 1e-05, %v551_v25 }
 0x143   : > { %v526_v28 = vpop.xlane.xlu1 %525  ;;  %v528_v29 = vpop.xlane.xlu0 %527 }
 0x144   : > { %6406 = vrsqrt.f32 %v566_v26  ;;  %v552_v32 = vmul.f32 0.0078125, %v526_v28  ;;  %v553_v33 = vmul.f32 0.0078125, %v528_v29 }
 0x145   : > { %6408 = vrsqrt.f32 %v567_v27 }
 0x146   : > { %v568_v34 = vadd.f32 1e-05, %v552_v32  ;;  %v569_v35 = vadd.f32 1e-05, %v553_v33 }
 0x147   : > { %v530_v36 = vpop.xlane.xlu1 %529  ;;  %v451_v37 = vpop.xlane.xlu0 %450 }
 0x148   : > { %6410 = vrsqrt.f32 %v568_v34  ;;  %v554_v40 = vmul.f32 0.0078125, %v530_v36  ;;  %v475_v41 = vmul.f32 0.0078125, %v451_v37 }
 0x149   : > { %v6401_v42 = vpop.eup %6400  ;;  %6412 = vrsqrt.f32 %v569_v35 }
 0x14a   : > { %v570_v43 = vadd.f32 1e-05, %v554_v40  ;;  %v7131_v44 = vsub.f32 %v7041_v45, %v475_v41  ;;  %v595_v48 = vmul.f32 %v6401_v42, %v6999_v14 }
 0x14b   : > { %v453_v46 = vpop.xlane.xlu1 %452  ;;  %v455_v47 = vpop.xlane.xlu0 %454 }
 0x14c   : > { %6414 = vrsqrt.f32 %v570_v43  ;;  %v476_v51 = vmul.f32 0.0078125, %v453_v46  ;;  %v477_v52 = vmul.f32 0.0078125, %v455_v47  ;;  %v507_v53 = vmul.f32 %v7131_v44, %v7131_v44 }
 0x14d   : > { %v6403_v57 = vpop.eup %6402  ;;  %v617_v1 = vmul.f32 %v7139_v56, %v595_v48 }
 0x14e   : > { %v6405_v58 = vpop.eup %6404  ;;  %531 = vadd.xlane.f32.xlu0 %v507_v53  ;;  %v7142_v45 = vsub.f32 %v7054_v49, %v476_v51  ;;  %v7145_v61 = vsub.f32 %v7057_v50, %v477_v52  ;;  %v596_v14 = vmul.f32 %v6403_v57, %v7007_v22  ;;  %v7157_v50 = vld [vmem:[%s9521_s2] ss:$0 sm:$0xff] }
 0x14f   : > { %v457_v62 = vpop.xlane.xlu1 %456  ;;  %v459_v63 = vpop.xlane.xlu0 %458  ;;  %v597_v2 = vmul.f32 %v6405_v58, %v7001_v15  ;;  %v639_v13 = vadd.f32 %v7157_v50, %v617_v1 }
 0x150   : > { %v478_v3 = vmul.f32 0.0078125, %v457_v62  ;;  %v479_v4 = vmul.f32 0.0078125, %v459_v63  ;;  %v508_v5 = vmul.f32 %v7142_v45, %v7142_v45  ;;  %v509_v49 = vmul.f32 %v7145_v61, %v7145_v61 }
 0x151   : > { %v6407_v22 = vpop.eup %6406  ;;  %v618_v6 = vmul.f32 %v7139_v56, %v596_v14  ;;  %v619_v17 = vmul.f32 %v7139_v56, %v597_v2 }
 0x152   : > { %v6409_v7 = vpop.eup %6408  ;;  %533 = vadd.xlane.f32.xlu1 %v508_v5  ;;  %535 = vadd.xlane.f32.xlu0 %v509_v49  ;;  %v7161_v15 = vsub.f32 %v7071_v54, %v478_v3  ;;  %v7164_v9 = vsub.f32 %v7074_v55, %v479_v4  ;;  %v598_v10 = vmul.f32 %v6407_v22, %v7009_v23 }
 0x153   : > { %v461_v11 = vpop.xlane.xlu1 %460  ;;  %v463_v12 = vpop.xlane.xlu0 %462  ;;  %v640_v16 = vadd.f32 %v7157_v50, %v618_v6  ;;  %v599_v18 = vmul.f32 %v6409_v7, %v7015_v30  ;;  %v641_v32 = vadd.f32 %v7157_v50, %v619_v17 }
 0x154   : > { %v480_v19 = vmul.f32 0.0078125, %v461_v11  ;;  %v481_v20 = vmul.f32 0.0078125, %v463_v12  ;;  %v510_v54 = vmul.f32 %v7161_v15, %v7161_v15  ;;  %v511_v55 = vmul.f32 %v7164_v9, %v7164_v9 }
 0x155   : > { %v6411_v21 = vpop.eup %6410  ;;  %v655_v23 = vpack.c.bf16 %v640_v16, %v639_v13  ;;  %v620_v24 = vmul.f32 %v7139_v56, %v598_v10  ;;  %v621_v25 = vmul.f32 %v7139_v56, %v599_v18 }
 0x156   : > { %v6413_v26 = vpop.eup %6412  ;;  %537 = vadd.xlane.f32.xlu1 %v510_v54  ;;  %539 = vadd.xlane.f32.xlu0 %v511_v55  ;;  %v7178_v27 = vsub.f32 %v7088_v59, %v480_v19  ;;  %v7181_v30 = vsub.f32 %v7091_v60, %v481_v20  ;;  %v600_v28 = vmul.f32 %v6411_v21, %v7017_v31 }
 0x157   : > { %856 = vmatmul.mubr.bf16.vlgmr.msra.gmra.mxu0 %v655_v23  ;;  %6166 = vmatprep.mubr.bf16.mxu1 %v655_v23  ;;  %v465_v29 = vpop.xlane.xlu1 %464  ;;  %v642_v33 = vadd.f32 %v7157_v50, %v620_v24  ;;  %v601_v34 = vmul.f32 %v6413_v26, %v7023_v38  ;;  %v643_v40 = vadd.f32 %v7157_v50, %v621_v25 }
 0x158   : > { %v482_v35 = vmul.f32 0.0078125, %v465_v29  ;;  %v512_v36 = vmul.f32 %v7178_v27, %v7178_v27  ;;  %v513_v59 = vmul.f32 %v7181_v30, %v7181_v30  ;;  %865 = vmatprep.mubr.bf16.mxu0 %v6862_v8  ;;  %v622_v31 = vmul.f32 %v7139_v56, %v600_v28 }
 0x159   : > { %v6415_v60 = vpop.eup %6414  ;;  %v656_v37 = vpack.c.bf16 %v642_v33, %v641_v32  ;;  %v623_v41 = vmul.f32 %v7139_v56, %v601_v34 }
 0x15a   : > { %541 = vadd.xlane.f32.xlu1 %v512_v36  ;;  %543 = vadd.xlane.f32.xlu0 %v513_v59  ;;  %v7196_v38 = vsub.f32 %v7105_v0, %v482_v35  ;;  %v644_v42 = vadd.f32 %v7157_v50, %v622_v31  ;;  %v602_v43 = vmul.f32 %v6415_v60, %v7025_v39 }
 0x15b   : > { %6167 = vmatmul.mubr.bf16.vlgmr.msra.gmra.mxu1 %v656_v37  ;;  %v645_v51 = vadd.f32 %v7157_v50, %v623_v41 }
 0x15c   : > { %v514_v46 = vmul.f32 %v7196_v38, %v7196_v38  ;;  %v657_v47 = vpack.c.bf16 %v644_v42, %v643_v40  ;;  %v624_v48 = vmul.f32 %v7139_v56, %v602_v43 }
 0x15e   : > { %545 = vadd.xlane.f32.xlu1 %v514_v46  ;;  %6170 = vmatprep.mubr.bf16.mxu1 %v657_v47  ;;  %v646_v52 = vadd.f32 %v7157_v50, %v624_v48 }
 0x15f   : > { %866 = vmatmul.mubr.bf16.gmra.mxu0 %v656_v37 }
 0x160   : > { %v658_v0 = vpack.c.bf16 %v646_v52, %v645_v51  ;;  %875 = vmatprep.mubr.bf16.mxu0 %v6862_v8 }
 0x163   : > { %6171 = vmatmul.mubr.bf16.gmra.mxu1 %v658_v0 }
 0x167   : > { %876 = vmatmul.mubr.bf16.gmra.mxu0 %v657_v47 }
 0x168   : > { %885 = vmatprep.mubr.bf16.mxu0 %v6862_v8 }
 0x16f   : > { %886 = vmatmul.mubr.bf16.gmra.mxu0 %v658_v0 }
 0x170   : > { %895 = vmatprep.mubr.bf16.mxu0 %v6862_v8 }
 0x1d7   : > { %v532_v39 = vpop.xlane.xlu0 %531 }
 0x1d8   : > { %v555_v53 = vmul.f32 0.0078125, %v532_v39 }
 0x1da   : > { %v571_v57 = vadd.f32 1e-05, %v555_v53 }
 0x1db   : > { %v534_v58 = vpop.xlane.xlu1 %533  ;;  %v536_v14 = vpop.xlane.xlu0 %535 }
 0x1dc   : > { %6416 = vrsqrt.f32 %v571_v57  ;;  %v556_v62 = vmul.f32 0.0078125, %v534_v58  ;;  %v557_v63 = vmul.f32 0.0078125, %v536_v14 }
 0x1de   : > { %v572_v1 = vadd.f32 1e-05, %v556_v62  ;;  %v573_v2 = vadd.f32 1e-05, %v557_v63 }
 0x1df   : > { %v538_v3 = vpop.xlane.xlu1 %537  ;;  %v540_v4 = vpop.xlane.xlu0 %539 }
 0x1e0   : > { %6418 = vrsqrt.f32 %v572_v1  ;;  %v558_v5 = vmul.f32 0.0078125, %v538_v3  ;;  %v559_v49 = vmul.f32 0.0078125, %v540_v4 }
 0x1e1   : > { %6420 = vrsqrt.f32 %v573_v2 }
 0x1e2   : > { %v574_v22 = vadd.f32 1e-05, %v558_v5  ;;  %v575_v6 = vadd.f32 1e-05, %v559_v49 }
 0x1e3   : > { %v542_v7 = vpop.xlane.xlu1 %541  ;;  %v544_v10 = vpop.xlane.xlu0 %543 }
 0x1e4   : > { %6422 = vrsqrt.f32 %v574_v22  ;;  %v560_v11 = vmul.f32 0.0078125, %v542_v7  ;;  %v561_v12 = vmul.f32 0.0078125, %v544_v10 }
 0x1e5   : > { %6424 = vrsqrt.f32 %v575_v6 }
 0x1e6   : > { %v576_v13 = vadd.f32 1e-05, %v560_v11  ;;  %v577_v16 = vadd.f32 1e-05, %v561_v12 }
 0x1e7   : > { %v546_v17 = vpop.xlane.xlu1 %545 }
 0x1e8   : > { %6426 = vrsqrt.f32 %v576_v13  ;;  %v562_v18 = vmul.f32 0.0078125, %v546_v17 }
 0x1e9   : > { %v6417_v19 = vpop.eup %6416  ;;  %6428 = vrsqrt.f32 %v577_v16 }
 0x1ea   : > { %v578_v20 = vadd.f32 1e-05, %v562_v18  ;;  %v603_v54 = vmul.f32 %v6417_v19, %v7131_v44 }
 0x1ec   : > { %6430 = vrsqrt.f32 %v578_v20  ;;  %v625_v24 = vmul.f32 %v7139_v56, %v603_v54 }
 0x1ed   : > { %v6419_v55 = vpop.eup %6418 }
 0x1ee   : > { %v6421_v21 = vpop.eup %6420  ;;  %v604_v23 = vmul.f32 %v6419_v55, %v7142_v45  ;;  %v647_v33 = vadd.f32 %v7157_v50, %v625_v24 }
 0x1ef   : > { %v605_v25 = vmul.f32 %v6421_v21, %v7145_v61 }
 0x1f0   : > { %v626_v26 = vmul.f32 %v7139_v56, %v604_v23 }
 0x1f1   : > { %v6423_v28 = vpop.eup %6422  ;;  %v627_v29 = vmul.f32 %v7139_v56, %v605_v25 }
 0x1f2   : > { %v6425_v32 = vpop.eup %6424  ;;  %v648_v34 = vadd.f32 %v7157_v50, %v626_v26  ;;  %v606_v44 = vmul.f32 %v6423_v28, %v7161_v15 }
 0x1f3   : > { %v607_v35 = vmul.f32 %v6425_v32, %v7164_v9  ;;  %v649_v61 = vadd.f32 %v7157_v50, %v627_v29 }
 0x1f4   : > { %v659_v36 = vpack.c.bf16 %v648_v34, %v647_v33  ;;  %v628_v45 = vmul.f32 %v7139_v56, %v606_v44 }
 0x1f5   : > { %v6427_v59 = vpop.eup %6426  ;;  %v629_v40 = vmul.f32 %v7139_v56, %v607_v35 }
 0x1f6   : > { %v6429_v31 = vpop.eup %6428  ;;  %896 = vmatmul.mubr.bf16.gmra.mxu0 %v659_v36  ;;  %6174 = vmatprep.mubr.bf16.mxu1 %v659_v36  ;;  %v650_v60 = vadd.f32 %v7157_v50, %v628_v45  ;;  %v608_v37 = vmul.f32 %v6427_v59, %v7178_v27 }
 0x1f7   : > { %905 = vmatprep.mubr.bf16.mxu0 %v6862_v8  ;;  %v609_v15 = vmul.f32 %v6429_v31, %v7181_v30  ;;  %v651_v43 = vadd.f32 %v7157_v50, %v629_v40 }
 0x1f8   : > { %v660_v9 = vpack.c.bf16 %v650_v60, %v649_v61  ;;  %v630_v41 = vmul.f32 %v7139_v56, %v608_v37 }
 0x1f9   : > { %v6431_v42 = vpop.eup %6430  ;;  %v631_v48 = vmul.f32 %v7139_v56, %v609_v15 }
 0x1fa   : > { %6175 = vmatmul.mubr.bf16.gmra.mxu1 %v660_v9  ;;  %v652_v46 = vadd.f32 %v7157_v50, %v630_v41  ;;  %v610_v47 = vmul.f32 %v6431_v42, %v7196_v38 }
 0x1fb   : > { %v653_v30 = vadd.f32 %v7157_v50, %v631_v48 }
 0x1fc   : > { %v661_v27 = vpack.c.bf16 %v652_v46, %v651_v43  ;;  %v632_v51 = vmul.f32 %v7139_v56, %v610_v47  ;;  %v1057_v56 = vlaneseq }
 0x1fe   : > { %906 = vmatmul.mubr.bf16.gmra.mxu0 %v660_v9  ;;  %6178 = vmatprep.mubr.bf16.mxu1 %v661_v27  ;;  %v654_v52 = vadd.f32 %v7157_v50, %v632_v51  ;;  %v7243_v1 = vand.u32 127, %v1057_v56 }
 0x1ff   : > { %915 = vmatprep.mubr.bf16.mxu0 %v6862_v8 }
 0x200   : > { %v662_v0 = vpack.c.bf16 %v654_v52, %v653_v30  ;;  %vm1062_vm0 = vcmp.lt.s32.totalorder %v7243_v1, 64  ;;  %vm1409_vm1 = vcmp.ge.s32.totalorder %v7243_v1, 32  ;;  %vm1865_vm2 = vcmp.ge.s32.totalorder %v7243_v1, 96 }
 0x201   : > { %vm1410_vm3 = vmand %vm1409_vm1, %vm1062_vm0  ;;  %vm1066_vm6 = vcmp.ge.s32.totalorder %v7243_v1, 64  ;;  %vm1637_vm7 = vcmp.lt.s32.totalorder %v7243_v1, 96  ;;  %vm1213_vm10 = vcmp.lt.s32.totalorder %v7243_v1, 32 }
 0x202   : > { %6179 = vmatmul.mubr.bf16.gmra.mxu1 %v662_v0  ;;  %vm7254_vm4 = vmpackc.low %vm1865_vm2, %vm1865_vm2 }
 0x203   : > { %vm7258_vm5 = vmpackc.low %vm1410_vm3, %vm1410_vm3 }
 0x204   : > { %vm1638_vm8 = vmand %vm1066_vm6, %vm1637_vm7 }
 0x205   : > { %vm7286_vm9 = vmpackc.low %vm1638_vm8, %vm1638_vm8 }
 0x206   : > { %916 = vmatmul.mubr.bf16.gmra.mxu0 %v661_v27  ;;  %vm7299_vm11 = vmpackc.low %vm1213_vm10, %vm1213_vm10 }
 0x207   : > { %925 = vmatprep.mubr.bf16.mxu0 %v6862_v8 }
 0x20e   : > { %926 = vmatmul.mubr.bf16.gmra.mxu0 %v662_v0 }
 0x217   : > { %v857_v38 = vpop.f32.mrf.mxu0 }
 0x219   : > { %v7235_v39 = vpop.f32.mrf.mxu0 }
 0x21b   : > { %v861_v53 = vpop.f32.mrf.mxu0  ;;  %v6168_v57 = vpop.f32.mrf.mxu1 }
 0x21c   : > { %v7237_v58 = vpack.c.bf16 %v861_v53, %v857_v38 }
 0x21d   : > { %v7239_v14 = vpop.f32.mrf.mxu0  ;;  %v970_v62 = vpop.f32.mrf.mxu1 }
 0x21e   : > { %5894 = vmatprep.mubr.bf16.mxu0 %v7237_v58  ;;  %v1034_v52 = vpack.c.bf16 %v7239_v14, %v7235_v39 }
 0x21f   : > { %v867_v50 = vpop.f32.mrf.mxu0  ;;  %v6169_v63 = vpop.f32.mrf.mxu1 }
 0x220   : > { %v1038_v55 = vpack.c.bf16 %v6169_v63, %v6168_v57  ;;  %v2025_v53 = vsel %vm7254_vm4, %v1034_v52, 0  ;;  %v2017_v57 = vsel %vm7258_vm5, %v1034_v52, 0 }
 0x221   : > { %v7245_v2 = vpop.f32.mrf.mxu0  ;;  %v973_v3 = vpop.f32.mrf.mxu1 }
 0x222   : > { %v1035_v28 = vpack.c.bf16 %v973_v3, %v970_v62  ;;  %v2042_v29 = vsel %vm7254_vm4, %v1038_v55, 0  ;;  %v2034_v34 = vsel %vm7258_vm5, %v1038_v55, 0  ;;  %v2038_v47 = vsel %vm7286_vm9, %v1038_v55, 0 }
 0x223   : > { %v871_v4 = vpop.f32.mrf.mxu0  ;;  %v6172_v5 = vpop.f32.mrf.mxu1  ;;  %v2030_v51 = vsel %vm7299_vm11, %v1038_v55, 0  ;;  %v2021_v3 = vsel %vm7286_vm9, %v1034_v52, 0 }
 0x224   : > { %v7249_v49 = vpack.c.bf16 %v871_v4, %v867_v50  ;;  %v2041_v35 = vsel %vm7254_vm4, %v1035_v28, 0  ;;  %v2033_v61 = vsel %vm7258_vm5, %v1035_v28, 0  ;;  %v2037_v30 = vsel %vm7286_vm9, %v1035_v28, 0 }
 0x225   : > { %v873_v22 = vpop.f32.mrf.mxu0  ;;  %v986_v6 = vpop.f32.mrf.mxu1  ;;  %v2029_v0 = vsel %vm7299_vm11, %v1035_v28, 0  ;;  %v2013_v4 = vsel %vm7299_vm11, %v1034_v52, 0 }
 0x226   : > { %v1037_v43 = vpack.c.bf16 %v873_v22, %v7245_v2 }
 0x227   : > { %v877_v7 = vpop.f32.mrf.mxu0  ;;  %v6173_v10 = vpop.f32.mrf.mxu1 }
 0x228   : > { %v1044_v11 = vpack.c.bf16 %v6173_v10, %v6172_v5  ;;  %v2026_v27 = vsel %vm7254_vm4, %v1037_v43, 0  ;;  %v2018_v38 = vsel %vm7258_vm5, %v1037_v43, 0  ;;  %v2022_v63 = vsel %vm7286_vm9, %v1037_v43, 0 }
 0x229   : > { %v879_v13 = vpop.f32.mrf.mxu0  ;;  %v989_v16 = vpop.f32.mrf.mxu1  ;;  %v2014_v2 = vsel %vm7299_vm11, %v1037_v43, 0 }
 0x22a   : > { %v1041_v18 = vpack.c.bf16 %v989_v16, %v986_v6  ;;  %v2044_v19 = vsel %vm7254_vm4, %v1044_v11, 0  ;;  %v2036_v20 = vsel %vm7258_vm5, %v1044_v11, 0  ;;  %v2040_v37 = vsel %vm7286_vm9, %v1044_v11, 0 }
 0x22b   : > { %v881_v54 = vpop.f32.mrf.mxu0  ;;  %5902 = vmatprep.subr.bf16.mxu1 %v2044_v19  ;;  %v2032_v41 = vsel %vm7299_vm11, %v1044_v11, 0 }
 0x22c   : > { %v7266_v21 = vpack.c.bf16 %v881_v54, %v877_v7  ;;  %5903 = vmatpush3.bf16.msra.mxu1 %v2036_v20  ;;  %v2043_v23 = vsel %vm7254_vm4, %v1041_v18, 0  ;;  %v2035_v26 = vsel %vm7258_vm5, %v1041_v18, 0  ;;  %v2039_v42 = vsel %vm7286_vm9, %v1041_v18, 0 }
 0x22d   : > { %v883_v24 = vpop.f32.mrf.mxu0  ;;  %5904 = vmatprep.subr.bf16.mxu1 %v2043_v23  ;;  %v2031_v46 = vsel %vm7299_vm11, %v1041_v18, 0 }
 0x22e   : > { %v1040_v45 = vpack.c.bf16 %v883_v24, %v879_v13 }
 0x22f   : > { %v887_v25 = vpop.f32.mrf.mxu0 }
 0x230   : > { %5905 = vmatpush3.bf16.msra.mxu1 %v2035_v26  ;;  %v2027_v15 = vsel %vm7254_vm4, %v1040_v45, 0  ;;  %v2019_v48 = vsel %vm7258_vm5, %v1040_v45, 0  ;;  %v2023_v14 = vsel %vm7286_vm9, %v1040_v45, 0  ;;  %v2015_v50 = vsel %vm7299_vm11, %v1040_v45, 0 }
 0x231   : > { %v889_v32 = vpop.f32.mrf.mxu0  ;;  %5906 = vmatprep.subr.bf16.mxu1 %v2042_v29 }
 0x233   : > { %v891_v33 = vpop.f32.mrf.mxu0 }
 0x234   : > { %v7278_v44 = vpack.c.bf16 %v891_v33, %v887_v25  ;;  %5907 = vmatpush3.bf16.msra.mxu1 %v2034_v34 }
 0x235   : > { %v893_v36 = vpop.f32.mrf.mxu0  ;;  %5908 = vmatprep.subr.bf16.mxu1 %v2041_v35 }
 0x236   : > { %v1043_v59 = vpack.c.bf16 %v893_v36, %v889_v32 }
 0x238   : > { %5909 = vmatpush3.bf16.msra.mxu1 %v2033_v61  ;;  %v2028_v60 = vsel %vm7254_vm4, %v1043_v59, 0  ;;  %v2020_v40 = vsel %vm7258_vm5, %v1043_v59, 0  ;;  %v2024_v62 = vsel %vm7286_vm9, %v1043_v59, 0  ;;  %v2016_v39 = vsel %vm7299_vm11, %v1043_v59, 0 }
 0x239   : > { %5878 = vmatprep.subr.bf16.mxu0 %v2028_v60  ;;  %5910 = vmatprep.subr.bf16.mxu1 %v2040_v37 }
 0x23a   : > { %5879 = vmatpush3.bf16.xpose.msra.mxu0 %v2020_v40 }
 0x23b   : > { %5880 = vmatprep.subr.bf16.mxu0 %v2027_v15 }
 0x23c   : > { %5911 = vmatpush3.bf16.msra.mxu1 %v2032_v41 }
 0x23d   : > { %5912 = vmatprep.subr.bf16.mxu1 %v2039_v42 }
 0x240   : > { %5913 = vmatpush3.bf16.msra.mxu1 %v2031_v46 }
 0x241   : > { %5914 = vmatprep.subr.bf16.mxu1 %v2038_v47 }
 0x242   : > { %5881 = vmatpush3.bf16.xpose.msra.mxu0 %v2019_v48 }
 0x243   : > { %5882 = vmatprep.subr.bf16.mxu0 %v2026_v27 }
 0x244   : > { %5915 = vmatpush3.bf16.msra.mxu1 %v2030_v51 }
 0x245   : > { %5916 = vmatprep.subr.bf16.mxu1 %v2037_v30 }
 0x248   : > { %5917 = vmatpush3.bf16.msra.mxu1 %v2029_v0 }
 0x24a   : > { %5883 = vmatpush3.bf16.xpose.msra.mxu0 %v2018_v38 }
 0x24b   : > { %5884 = vmatprep.subr.bf16.mxu0 %v2025_v53 }
 0x252   : > { %5885 = vmatpush3.bf16.xpose.msra.mxu0 %v2017_v57 }
 0x253   : > { %5886 = vmatprep.subr.bf16.mxu0 %v2024_v62 }
 0x25a   : > { %5887 = vmatpush3.bf16.xpose.msra.mxu0 %v2016_v39 }
 0x25b   : > { %5888 = vmatprep.subr.bf16.mxu0 %v2023_v14  ;;  %v7409_v14 = vadd.s32 128, %v7243_v1 }
 0x25d   : > { %vm1075_vm12 = vcmp.lt.s32.totalorder %v7409_v14, 192  ;;  %vm1079_vm13 = vcmp.ge.s32.totalorder %v7409_v14, 192 }
 0x262   : > { %5889 = vmatpush3.bf16.xpose.msra.mxu0 %v2015_v50 }
 0x263   : > { %5890 = vmatprep.subr.bf16.mxu0 %v2022_v63 }
 0x26a   : > { %5891 = vmatpush3.bf16.xpose.msra.mxu0 %v2014_v2 }
 0x26b   : > { %5892 = vmatprep.subr.bf16.mxu0 %v2021_v3 }
 0x272   : > { %5893 = vmatpush3.bf16.xpose.msra.mxu0 %v2013_v4 }
 0x279   : > { %5895 = vmatmul.mubr.bf16.vlgmr.msra.gmra.mxu0 %v7237_v58 }
 0x27a   : > { %5896 = vmatprep.mubr.bf16.mxu0 %v7249_v49 }
 0x281   : > { %5897 = vmatmul.mubr.bf16.gmra.mxu0 %v7249_v49 }
 0x282   : > { %5898 = vmatprep.mubr.bf16.mxu0 %v7266_v21 }
 0x289   : > { %5899 = vmatmul.mubr.bf16.gmra.mxu0 %v7266_v21 }
 0x28a   : > { %5900 = vmatprep.mubr.bf16.mxu0 %v7278_v44 }
 0x291   : > { %5901 = vmatmul.mubr.bf16.gmra.mxu0 %v7278_v44 }
 0x2b6   : > { %v897_v5 = vpop.f32.mrf.mxu0 }
 0x2b8   : > { %v7353_v22 = vpop.f32.mrf.mxu0 }
 0x2ba   : > { %v901_v6 = vpop.f32.mrf.mxu0  ;;  %v6176_v7 = vpop.f32.mrf.mxu1 }
 0x2bb   : > { %v7355_v10 = vpack.c.bf16 %v901_v6, %v897_v5 }
 0x2bc   : > { %v7357_v58 = vpop.f32.mrf.mxu0  ;;  %v1002_v11 = vpop.f32.mrf.mxu1 }
 0x2be   : > { %v907_v13 = vpop.f32.mrf.mxu0  ;;  %v6177_v49 = vpop.f32.mrf.mxu1 }
 0x2bf   : > { %v1050_v44 = vpack.c.bf16 %v6177_v49, %v6176_v7 }
 0x2c0   : > { %v7359_v16 = vpop.f32.mrf.mxu0  ;;  %v1005_v18 = vpop.f32.mrf.mxu1 }
 0x2c1   : > { %v1047_v37 = vpack.c.bf16 %v1005_v18, %v1002_v11  ;;  %v2820_v40 = vsel %vm7254_vm4, %v1050_v44, 0  ;;  %v2812_v42 = vsel %vm7258_vm5, %v1050_v44, 0  ;;  %v2816_v53 = vsel %vm7286_vm9, %v1050_v44, 0 }
 0x2c2   : > { %v911_v19 = vpop.f32.mrf.mxu0  ;;  %v6180_v20 = vpop.f32.mrf.mxu1  ;;  %v2808_v57 = vsel %vm7299_vm11, %v1050_v44, 0 }
 0x2c3   : > { %v7361_v54 = vpack.c.bf16 %v911_v19, %v907_v13  ;;  %v2819_v46 = vsel %vm7254_vm4, %v1047_v37, 0  ;;  %v2811_v27 = vsel %vm7258_vm5, %v1047_v37, 0  ;;  %v2815_v62 = vsel %vm7286_vm9, %v1047_v37, 0 }
 0x2c4   : > { %v7363_v55 = vpop.f32.mrf.mxu0  ;;  %v1018_v21 = vpop.f32.mrf.mxu1  ;;  %v2807_v39 = vsel %vm7299_vm11, %v1047_v37, 0 }
 0x2c6   : > { %v917_v23 = vpop.f32.mrf.mxu0  ;;  %v6181_v24 = vpop.f32.mrf.mxu1 }
 0x2c7   : > { %v1056_v25 = vpack.c.bf16 %v6181_v24, %v6180_v20 }
 0x2c8   : > { %v919_v26 = vpop.f32.mrf.mxu0  ;;  %v1021_v28 = vpop.f32.mrf.mxu1 }
 0x2c9   : > { %v1053_v29 = vpack.c.bf16 %v1021_v28, %v1018_v21  ;;  %v2822_v32 = vsel %vm7254_vm4, %v1056_v25, 0  ;;  %v2814_v33 = vsel %vm7258_vm5, %v1056_v25, 0  ;;  %v2818_v30 = vsel %vm7286_vm9, %v1056_v25, 0 }
 0x2ca   : > { %v921_v34 = vpop.f32.mrf.mxu0  ;;  %5966 = vmatprep.subr.bf16.mxu0 %v2822_v32  ;;  %v2810_v52 = vsel %vm7299_vm11, %v1056_v25, 0 }
 0x2cb   : > { %v7369_v35 = vpack.c.bf16 %v921_v34, %v917_v23  ;;  %5967 = vmatpush3.bf16.msra.mxu0 %v2814_v33  ;;  %v2821_v36 = vsel %vm7254_vm4, %v1053_v29, 0  ;;  %v2813_v60 = vsel %vm7258_vm5, %v1053_v29, 0  ;;  %v2817_v0 = vsel %vm7286_vm9, %v1053_v29, 0 }
 0x2cc   : > { %v923_v45 = vpop.f32.mrf.mxu0  ;;  %5968 = vmatprep.subr.bf16.mxu0 %v2821_v36  ;;  %v2809_v38 = vsel %vm7299_vm11, %v1053_v29, 0 }
 0x2cd   : > { %v7373_v59 = vpack.c.bf16 %v923_v45, %v919_v26 }
 0x2ce   : > { %v927_v61 = vpop.f32.mrf.mxu0 }
 0x2cf   : > { %5969 = vmatpush3.bf16.msra.mxu0 %v2813_v60 }
 0x2d0   : > { %v929_v15 = vpop.f32.mrf.mxu0  ;;  %5970 = vmatprep.subr.bf16.mxu0 %v2820_v40 }
 0x2d2   : > { %v931_v41 = vpop.f32.mrf.mxu0 }
 0x2d3   : > { %v7381_v43 = vpack.c.bf16 %v931_v41, %v927_v61  ;;  %5971 = vmatpush3.bf16.msra.mxu0 %v2812_v42 }
 0x2d4   : > { %v933_v47 = vpop.f32.mrf.mxu0  ;;  %5972 = vmatprep.subr.bf16.mxu0 %v2819_v46 }
 0x2d5   : > { %v7385_v48 = vpack.c.bf16 %v933_v47, %v929_v15 }
 0x2d7   : > { %5973 = vmatpush3.bf16.msra.mxu0 %v2811_v27  ;;  %v2806_v51 = vsel %vm7254_vm4, %v7385_v48, 0 }
 0x2d8   : > { %5942 = vmatprep.subr.bf16.mxu1 %v2806_v51  ;;  %5974 = vmatprep.subr.bf16.mxu0 %v2818_v30 }
 0x2db   : > { %5975 = vmatpush3.bf16.msra.mxu0 %v2810_v52 }
 0x2dc   : > { %5976 = vmatprep.subr.bf16.mxu0 %v2817_v0 }
 0x2df   : > { %5977 = vmatpush3.bf16.msra.mxu0 %v2809_v38 }
 0x2e0   : > { %5978 = vmatprep.subr.bf16.mxu0 %v2816_v53 }
 0x2e3   : > { %5979 = vmatpush3.bf16.msra.mxu0 %v2808_v57 }
 0x2e4   : > { %5980 = vmatprep.subr.bf16.mxu0 %v2815_v62 }
 0x2e7   : > { %5981 = vmatpush3.bf16.msra.mxu0 %v2807_v39 }
 0x339   : > { %v7412_v50 = vpop.f32.mrf.mxu0 }
 0x33a   : > { %v2122_v63 = vsel %vm1062_vm0, %v7412_v50, -1e+30  ;;  %v2182_v23 = vsel %vm1066_vm6, %v7412_v50, -1e+30 }
 0x33b   : > { %v7417_v2 = vpop.f32.mrf.mxu0  ;;  %v2138_v3 = vmax.f32 %v2122_v63, -1e+30  ;;  %v2198_v26 = vmax.f32 %v2182_v23, -1e+30 }
 0x33c   : > { %v2243_v4 = vsel %vm1075_vm12, %v7417_v2, -1e+30  ;;  %v2303_v49 = vsel %vm1079_vm13, %v7417_v2, -1e+30 }
 0x33d   : > { %2139 = vmax.xlane.f32.xlu0 %v2138_v3  ;;  %v7423_v5 = vpop.f32.mrf.mxu0  ;;  %v2258_v11 = vmax.f32 %v2243_v4, -1e+30  ;;  %v2318_v20 = vmax.f32 %v2303_v49, -1e+30 }
 0x33e   : > { %v2124_v6 = vsel %vm1062_vm0, %v7423_v5, -1e+30  ;;  %v2184_v29 = vsel %vm1066_vm6, %v7423_v5, -1e+30 }
 0x33f   : > { %v7428_v7 = vpop.f32.mrf.mxu0  ;;  %v2141_v13 = vmax.f32 %v2124_v6, -1e+30  ;;  %v2201_v34 = vmax.f32 %v2184_v29, -1e+30 }
 0x340   : > { %v2245_v18 = vsel %vm1075_vm12, %v7428_v7, -1e+30  ;;  %v2305_v24 = vsel %vm1079_vm13, %v7428_v7, -1e+30 }
 0x341   : > { %2259 = vmax.xlane.f32.xlu0 %v2258_v11  ;;  %2142 = vmax.xlane.f32.xlu1 %v2141_v13  ;;  %v7436_v19 = vpop.f32.mrf.mxu0  ;;  %v2261_v21 = vmax.f32 %v2245_v18, -1e+30  ;;  %v2321_v28 = vmax.f32 %v2305_v24, -1e+30 }
 0x342   : > { %v2126_v32 = vsel %vm1062_vm0, %v7436_v19, -1e+30  ;;  %v2186_v36 = vsel %vm1066_vm6, %v7436_v19, -1e+30 }
 0x343   : > { %v7444_v25 = vpop.f32.mrf.mxu0  ;;  %v2144_v44 = vmax.f32 %v2126_v32, -1e+30  ;;  %v2204_v60 = vmax.f32 %v2186_v36, -1e+30 }
 0x344   : > { %v2247_v40 = vsel %vm1075_vm12, %v7444_v25, -1e+30  ;;  %v2307_v47 = vsel %vm1079_vm13, %v7444_v25, -1e+30 }
 0x345   : > { %2319 = vmax.xlane.f32.xlu0 %v2318_v20  ;;  %2262 = vmax.xlane.f32.xlu1 %v2261_v21  ;;  %v7452_v33 = vpop.f32.mrf.mxu0  ;;  %v2264_v42 = vmax.f32 %v2247_v40, -1e+30  ;;  %v2324_v30 = vmax.f32 %v2307_v47, -1e+30 }
 0x346   : > { %v2128_v45 = vsel %vm1062_vm0, %v7452_v33, -1e+30  ;;  %v2188_v15 = vsel %vm1066_vm6, %v7452_v33, -1e+30 }
 0x347   : > { %v7460_v61 = vpop.f32.mrf.mxu0  ;;  %v2147_v37 = vmax.f32 %v2128_v45, -1e+30  ;;  %v2207_v46 = vmax.f32 %v2188_v15, -1e+30 }
 0x348   : > { %v2249_v27 = vsel %vm1075_vm12, %v7460_v61, -1e+30  ;;  %v2309_v0 = vsel %vm1079_vm13, %v7460_v61, -1e+30 }
 0x349   : > { %2199 = vmax.xlane.f32.xlu0 %v2198_v26  ;;  %2322 = vmax.xlane.f32.xlu1 %v2321_v28  ;;  %v7468_v41 = vpop.f32.mrf.mxu0  ;;  %v2267_v52 = vmax.f32 %v2249_v27, -1e+30  ;;  %v2327_v57 = vmax.f32 %v2309_v0, -1e+30 }
 0x34a   : > { %v2130_v38 = vsel %vm1062_vm0, %v7468_v41, -1e+30  ;;  %v2190_v39 = vsel %vm1066_vm6, %v7468_v41, -1e+30 }
 0x34b   : > { %v7476_v51 = vpop.f32.mrf.mxu0  ;;  %v2150_v62 = vmax.f32 %v2130_v38, -1e+30  ;;  %v2210_v4 = vmax.f32 %v2190_v39, -1e+30 }
 0x34c   : > { %v2251_v11 = vsel %vm1075_vm12, %v7476_v51, -1e+30  ;;  %v2311_v21 = vsel %vm1079_vm13, %v7476_v51, -1e+30 }
 0x34d   : > { %2202 = vmax.xlane.f32.xlu1 %v2201_v34  ;;  %2145 = vmax.xlane.f32.xlu0 %v2144_v44  ;;  %v7484_v53 = vpop.f32.mrf.mxu0  ;;  %v2270_v18 = vmax.f32 %v2251_v11, -1e+30  ;;  %v2330_v26 = vmax.f32 %v2311_v21, -1e+30 }
 0x34e   : > { %v2132_v63 = vsel %vm1062_vm0, %v7484_v53, -1e+30  ;;  %v2192_v13 = vsel %vm1066_vm6, %v7484_v53, -1e+30 }
 0x34f   : > { %v7492_v3 = vpop.f32.mrf.mxu0  ;;  %v2153_v6 = vmax.f32 %v2132_v63, -1e+30  ;;  %v2213_v20 = vmax.f32 %v2192_v13, -1e+30 }
 0x350   : > { %v2253_v23 = vsel %vm1075_vm12, %v7492_v3, -1e+30  ;;  %v2313_v29 = vsel %vm1079_vm13, %v7492_v3, -1e+30 }
 0x351   : > { %2205 = vmax.xlane.f32.xlu0 %v2204_v60  ;;  %2148 = vmax.xlane.f32.xlu1 %v2147_v37  ;;  %v7500_v49 = vpop.f32.mrf.mxu0  ;;  %v2273_v28 = vmax.f32 %v2253_v23, -1e+30  ;;  %v2333_v44 = vmax.f32 %v2313_v29, -1e+30 }
 0x352   : > { %v2134_v32 = vsel %vm1062_vm0, %v7500_v49, -1e+30 }
 0x353   : > { %v7508_v24 = vpop.f32.mrf.mxu0  ;;  %v2156_v36 = vmax.f32 %v2134_v32, -1e+30 }
 0x354   : > { %v2255_v45 = vsel %vm1075_vm12, %v7508_v24, -1e+30 }
 0x355   : > { %2265 = vmax.xlane.f32.xlu0 %v2264_v42  ;;  %2208 = vmax.xlane.f32.xlu1 %v2207_v46  ;;  %v7516_v34 = vpop.f32.mrf.mxu0  ;;  %v2276_v40 = vmax.f32 %v2255_v45, -1e+30  ;;  %v2315_v42 = vsel %vm1079_vm13, %v7508_v24, -1e+30 }
 0x356   : > { %v2136_v60 = vsel %vm1062_vm0, %v7516_v34, -1e+30  ;;  %v2336_v47 = vmax.f32 %v2315_v42, -1e+30 }
 0x357   : > { %v7524_v37 = vpop.f32.mrf.mxu0  ;;  %v2159_v15 = vmax.f32 %v2136_v60, -1e+30 }
 0x358   : > { %v2257_v46 = vsel %vm1075_vm12, %v7524_v37, -1e+30 }
 0x359   : > { %2325 = vmax.xlane.f32.xlu0 %v2324_v30  ;;  %2268 = vmax.xlane.f32.xlu1 %v2267_v52  ;;  %v2279_v27 = vmax.f32 %v2257_v46, -1e+30  ;;  %v2194_v30 = vsel %vm1066_vm6, %v7500_v49, -1e+30  ;;  %v2317_v52 = vsel %vm1079_vm13, %v7524_v37, -1e+30 }
 0x35a   : > { %v2216_v0 = vmax.f32 %v2194_v30, -1e+30  ;;  %v2339_v38 = vmax.f32 %v2317_v52, -1e+30 }
 0x35d   : > { %2328 = vmax.xlane.f32.xlu1 %v2327_v57  ;;  %2151 = vmax.xlane.f32.xlu0 %v2150_v62  ;;  %v2196_v57 = vsel %vm1066_vm6, %v7516_v34, -1e+30 }
 0x35e   : > { %v2219_v62 = vmax.f32 %v2196_v57, -1e+30 }
 0x361   : > { %2211 = vmax.xlane.f32.xlu0 %v2210_v4  ;;  %2154 = vmax.xlane.f32.xlu1 %v2153_v6 }
 0x365   : > { %2271 = vmax.xlane.f32.xlu0 %v2270_v18  ;;  %2214 = vmax.xlane.f32.xlu1 %v2213_v20 }
 0x369   : > { %2331 = vmax.xlane.f32.xlu0 %v2330_v26  ;;  %2274 = vmax.xlane.f32.xlu1 %v2273_v28 }
 0x36d   : > { %2334 = vmax.xlane.f32.xlu1 %v2333_v44  ;;  %2157 = vmax.xlane.f32.xlu0 %v2156_v36 }
 0x371   : > { %2277 = vmax.xlane.f32.xlu0 %v2276_v40  ;;  %2160 = vmax.xlane.f32.xlu1 %v2159_v15 }
 0x375   : > { %2337 = vmax.xlane.f32.xlu0 %v2336_v47  ;;  %2280 = vmax.xlane.f32.xlu1 %v2279_v27 }
 0x379   : > { %2217 = vmax.xlane.f32.xlu0 %v2216_v0  ;;  %2340 = vmax.xlane.f32.xlu1 %v2339_v38 }
 0x37d   : > { %2220 = vmax.xlane.f32.xlu1 %v2219_v62 }
 0x3c6   : > { %v2140_v39 = vpop.xlane.xlu0 %2139 }
 0x3c7   : > { %v2162_v21 = vsel %vm1062_vm0, %v2140_v39, 0.0 }
 0x3ca   : > { %v2260_v63 = vpop.xlane.xlu0 %2259  ;;  %v2143_v4 = vpop.xlane.xlu1 %2142 }
 0x3cb   : > { %v2283_v6 = vsel %vm1075_vm12, %v2260_v63, 0.0 }
 0x3ce   : > { %v2320_v11 = vpop.xlane.xlu0 %2319  ;;  %v2263_v13 = vpop.xlane.xlu1 %2262 }
 0x3cf   : > { %v2343_v18 = vsel %vm1079_vm13, %v2320_v11, %v2283_v6  ;;  %v2285_v23 = vsel %vm1075_vm12, %v2263_v13, 0.0 }
 0x3d0   : > { %v2359_v20 = vsub.f32 %v7417_v2, %v2343_v18  ;;  %v2164_v2 = vsel %vm1062_vm0, %v2143_v4, 0.0 }
 0x3d2   : > { %v2200_v26 = vpop.xlane.xlu0 %2199  ;;  %v2323_v28 = vpop.xlane.xlu1 %2322  ;;  %v2376_v36 = vmul.f32 1.442695, %v2359_v20 }
 0x3d3   : > { %v2222_v29 = vsel %vm1066_vm6, %v2200_v26, %v2162_v21  ;;  %v2345_v32 = vsel %vm1079_vm13, %v2323_v28, %v2285_v23 }
 0x3d4   : > { %v2358_v44 = vsub.f32 %v7412_v50, %v2222_v29  ;;  %v2361_v45 = vsub.f32 %v7428_v7, %v2345_v32 }
 0x3d6   : > { %v2374_v60 = vmul.f32 1.442695, %v2358_v44  ;;  %v2203_v40 = vpop.xlane.xlu1 %2202  ;;  %v2146_v15 = vpop.xlane.xlu0 %2145  ;;  %v2380_v47 = vmul.f32 1.442695, %v2361_v45 }
 0x3d7   : > { %v2224_v42 = vsel %vm1066_vm6, %v2203_v40, %v2164_v2  ;;  %v2166_v50 = vsel %vm1062_vm0, %v2146_v15, 0.0 }
 0x3d8   : > { %6432 = vpow2.f32 %v2374_v60  ;;  %v2360_v46 = vsub.f32 %v7423_v5, %v2224_v42 }
 0x3d9   : > { %6434 = vpow2.f32 %v2376_v36 }
 0x3da   : > { %v2378_v27 = vmul.f32 1.442695, %v2360_v46  ;;  %v2206_v30 = vpop.xlane.xlu0 %2205  ;;  %v2149_v7 = vpop.xlane.xlu1 %2148 }
 0x3db   : > { %v2226_v52 = vsel %vm1066_vm6, %v2206_v30, %v2166_v50  ;;  %v2168_v38 = vsel %vm1062_vm0, %v2149_v7, 0.0 }
 0x3dc   : > { %6436 = vpow2.f32 %v2378_v27  ;;  %v2362_v0 = vsub.f32 %v7436_v19, %v2226_v52 }
 0x3dd   : > { %6438 = vpow2.f32 %v2380_v47 }
 0x3de   : > { %v2266_v57 = vpop.xlane.xlu0 %2265  ;;  %v2209_v5 = vpop.xlane.xlu1 %2208  ;;  %v2382_v39 = vmul.f32 1.442695, %v2362_v0 }
 0x3df   : > { %v2228_v62 = vsel %vm1066_vm6, %v2209_v5, %v2168_v38  ;;  %v2287_v4 = vsel %vm1075_vm12, %v2266_v57, 0.0 }
 0x3e0   : > { %v2364_v63 = vsub.f32 %v7452_v33, %v2228_v62  ;;  %6440 = vpow2.f32 %v2382_v39 }
 0x3e2   : > { %v2326_v6 = vpop.xlane.xlu0 %2325  ;;  %v2269_v11 = vpop.xlane.xlu1 %2268  ;;  %v2386_v18 = vmul.f32 1.442695, %v2364_v63 }
 0x3e3   : > { %v2347_v13 = vsel %vm1079_vm13, %v2326_v6, %v2287_v4  ;;  %v2289_v23 = vsel %vm1075_vm12, %v2269_v11, 0.0 }
 0x3e4   : > { %v2363_v21 = vsub.f32 %v7444_v25, %v2347_v13  ;;  %6442 = vpow2.f32 %v2386_v18 }
 0x3e5   : > { %v7575_v19 = vpop.eup %6432 }
 0x3e6   : > { %v7577_v20 = vpop.eup %6434  ;;  %v2329_v33 = vpop.xlane.xlu1 %2328  ;;  %v2406_v28 = vsel %vm1062_vm0, %v7575_v19, 0.0  ;;  %v2384_v36 = vmul.f32 1.442695, %v2363_v21  ;;  %v2470_v0 = vsel %vm1066_vm6, %v7575_v19, 0.0 }
 0x3e7   : > { %v2152_v26 = vpop.xlane.xlu0 %2151  ;;  %v2349_v29 = vsel %vm1079_vm13, %v2329_v33, %v2289_v23  ;;  %2423 = vadd.xlane.f32.xlu0 %v2406_v28  ;;  %v2535_v25 = vsel %vm1075_vm12, %v7577_v20, 0.0  ;;  %v2599_v46 = vsel %vm1079_vm13, %v7577_v20, 0.0 }
 0x3e8   : > { %v2365_v45 = vsub.f32 %v7460_v61, %v2349_v29  ;;  %v2170_v2 = vsel %vm1062_vm0, %v2152_v26, 0.0  ;;  %6444 = vpow2.f32 %v2384_v36 }
 0x3e9   : > { %v7587_v32 = vpop.eup %6436 }
 0x3ea   : > { %v7592_v44 = vpop.eup %6438  ;;  %v2155_v40 = vpop.xlane.xlu1 %2154  ;;  %v2408_v15 = vsel %vm1062_vm0, %v7587_v32, 0.0  ;;  %v2388_v47 = vmul.f32 1.442695, %v2365_v45  ;;  %v2472_v11 = vsel %vm1066_vm6, %v7587_v32, 0.0 }
 0x3eb   : > { %v2212_v60 = vpop.xlane.xlu0 %2211  ;;  %2551 = vadd.xlane.f32.xlu0 %v2535_v25  ;;  %2426 = vadd.xlane.f32.xlu1 %v2408_v15  ;;  %v2537_v61 = vsel %vm1075_vm12, %v7592_v44, 0.0  ;;  %v2172_v50 = vsel %vm1062_vm0, %v2155_v40, 0.0  ;;  %v2601_v38 = vsel %vm1079_vm13, %v7592_v44, 0.0 }
 0x3ec   : > { %v2230_v42 = vsel %vm1066_vm6, %v2212_v60, %v2170_v2  ;;  %6446 = vpow2.f32 %v2388_v47 }
 0x3ed   : > { %v2366_v27 = vsub.f32 %v7468_v41, %v2230_v42  ;;  %v7619_v57 = vpop.eup %6440 }
 0x3ee   : > { %v2215_v7 = vpop.xlane.xlu1 %2214  ;;  %v2410_v6 = vsel %vm1062_vm0, %v7619_v57, 0.0  ;;  %v2474_v28 = vsel %vm1066_vm6, %v7619_v57, 0.0 }
 0x3ef   : > { %v2272_v30 = vpop.xlane.xlu0 %2271  ;;  %v2232_v52 = vsel %vm1066_vm6, %v2215_v7, %v2172_v50  ;;  %2615 = vadd.xlane.f32.xlu0 %v2599_v46  ;;  %2554 = vadd.xlane.f32.xlu1 %v2537_v61  ;;  %v2390_v41 = vmul.f32 1.442695, %v2366_v27 }
 0x3f0   : > { %v2291_v5 = vsel %vm1075_vm12, %v2272_v30, 0.0  ;;  %v2368_v62 = vsub.f32 %v7484_v53, %v2232_v52 }
 0x3f1   : > { %v7632_v13 = vpop.eup %6442  ;;  %6448 = vpow2.f32 %v2390_v41 }
 0x3f2   : > { %v2275_v63 = vpop.xlane.xlu1 %2274  ;;  %v2394_v18 = vmul.f32 1.442695, %v2368_v62  ;;  %v2412_v45 = vsel %vm1062_vm0, %v7632_v13, 0.0  ;;  %v2476_v60 = vsel %vm1066_vm6, %v7632_v13, 0.0 }
 0x3f3   : > { %v2332_v39 = vpop.xlane.xlu0 %2331  ;;  %2487 = vadd.xlane.f32.xlu0 %v2470_v0  ;;  %2618 = vadd.xlane.f32.xlu1 %v2601_v38  ;;  %v2293_v21 = vsel %vm1075_vm12, %v2275_v63, 0.0 }
 0x3f4   : > { %v2351_v4 = vsel %vm1079_vm13, %v2332_v39, %v2291_v5  ;;  %6450 = vpow2.f32 %v2394_v18 }
 0x3f5   : > { %v2367_v53 = vsub.f32 %v7476_v51, %v2351_v4  ;;  %v7646_v2 = vpop.eup %6444 }
 0x3f6   : > { %v2335_v23 = vpop.xlane.xlu1 %2334  ;;  %v2539_v46 = vsel %vm1075_vm12, %v7646_v2, 0.0  ;;  %v2603_v50 = vsel %vm1079_vm13, %v7646_v2, 0.0 }
 0x3f7   : > { %v2158_v33 = vpop.xlane.xlu0 %2157  ;;  %v2353_v26 = vsel %vm1079_vm13, %v2335_v23, %v2293_v21  ;;  %2429 = vadd.xlane.f32.xlu0 %v2410_v6  ;;  %2490 = vadd.xlane.f32.xlu1 %v2472_v11  ;;  %v2392_v29 = vmul.f32 1.442695, %v2367_v53 }
 0x3f8   : > { %v2369_v25 = vsub.f32 %v7492_v3, %v2353_v26  ;;  %v2174_v27 = vsel %vm1062_vm0, %v2158_v33, 0.0 }
 0x3f9   : > { %6452 = vpow2.f32 %v2392_v29  ;;  %v7656_v61 = vpop.eup %6446 }
 0x3fa   : > { %v2161_v51 = vpop.xlane.xlu1 %2160  ;;  %v2396_v40 = vmul.f32 1.442695, %v2369_v25  ;;  %v2541_v38 = vsel %vm1075_vm12, %v7656_v61, 0.0  ;;  %v2605_v63 = vsel %vm1079_vm13, %v7656_v61, 0.0 }
 0x3fb   : > { %v2278_v36 = vpop.xlane.xlu0 %2277  ;;  %2493 = vadd.xlane.f32.xlu0 %v2474_v28  ;;  %2432 = vadd.xlane.f32.xlu1 %v2412_v45  ;;  %v2176_v39 = vsel %vm1062_vm0, %v2161_v51, 0.0 }
 0x3fc   : > { %v2295_v15 = vsel %vm1075_vm12, %v2278_v36, 0.0  ;;  %6454 = vpow2.f32 %v2396_v40 }
 0x3fe   : > { %v2281_v42 = vpop.xlane.xlu1 %2280  ;;  %v7671_v41 = vpop.eup %6448 }
 0x3ff   : > { %v2338_v3 = vpop.xlane.xlu0 %2337  ;;  %2557 = vadd.xlane.f32.xlu0 %v2539_v46  ;;  %2496 = vadd.xlane.f32.xlu1 %v2476_v60  ;;  %v2297_v7 = vsel %vm1075_vm12, %v2281_v42, 0.0  ;;  %v2414_v53 = vsel %vm1062_vm0, %v7671_v41, 0.0  ;;  %v2478_v33 = vsel %vm1066_vm6, %v7671_v41, 0.0 }
 0x400   : > { %v2355_v47 = vsel %vm1079_vm13, %v2338_v3, %v2295_v15 }
 0x401   : > { %v2371_v30 = vsub.f32 %v7508_v24, %v2355_v47  ;;  %v7687_v21 = vpop.eup %6450 }
 0x402   : > { %v2341_v0 = vpop.xlane.xlu1 %2340  ;;  %v2416_v28 = vsel %vm1062_vm0, %v7687_v21, 0.0  ;;  %v2480_v25 = vsel %vm1066_vm6, %v7687_v21, 0.0 }
 0x403   : > { %v2218_v52 = vpop.xlane.xlu0 %2217  ;;  %v2357_v62 = vsel %vm1079_vm13, %v2341_v0, %v2297_v7  ;;  %2621 = vadd.xlane.f32.xlu0 %v2603_v50  ;;  %2560 = vadd.xlane.f32.xlu1 %v2541_v38  ;;  %v2400_v4 = vmul.f32 1.442695, %v2371_v30 }
 0x404   : > { %v2234_v5 = vsel %vm1066_vm6, %v2218_v52, %v2174_v27  ;;  %v2373_v11 = vsub.f32 %v7524_v37, %v2357_v62 }
 0x405   : > { %v2370_v24 = vsub.f32 %v7500_v49, %v2234_v5 }
 0x406   : > { %v2221_v18 = vpop.xlane.xlu1 %2220  ;;  %v2404_v37 = vmul.f32 1.442695, %v2373_v11  ;;  %v7698_v29 = vpop.eup %6452 }
 0x407   : > { %v2398_v6 = vmul.f32 1.442695, %v2370_v24  ;;  %v2236_v49 = vsel %vm1066_vm6, %v2221_v18, %v2176_v39  ;;  %2435 = vadd.xlane.f32.xlu0 %v2414_v53  ;;  %2624 = vadd.xlane.f32.xlu1 %v2605_v63  ;;  %v2607_v51 = vsel %vm1079_vm13, %v7698_v29, 0.0 }
 0x408   : > { %v2372_v23 = vsub.f32 %v7516_v34, %v2236_v49  ;;  %v2543_v34 = vsel %vm1075_vm12, %v7698_v29, 0.0 }
 0x409   : > { %6456 = vpow2.f32 %v2398_v6  ;;  %v7706_v36 = vpop.eup %6454 }
 0x40a   : > { %6458 = vpow2.f32 %v2400_v4  ;;  %v2402_v26 = vmul.f32 1.442695, %v2372_v23  ;;  %v2545_v45 = vsel %vm1075_vm12, %v7706_v36, 0.0  ;;  %v2609_v15 = vsel %vm1079_vm13, %v7706_v36, 0.0 }
 0x40b   : > { %2499 = vadd.xlane.f32.xlu0 %v2478_v33  ;;  %2438 = vadd.xlane.f32.xlu1 %v2416_v28 }
 0x40c   : > { %6460 = vpow2.f32 %v2402_v26 }
 0x40d   : > { %6462 = vpow2.f32 %v2404_v37 }
 0x40f   : > { %2563 = vadd.xlane.f32.xlu0 %v2543_v34  ;;  %2502 = vadd.xlane.f32.xlu1 %v2480_v25 }
 0x413   : > { %2627 = vadd.xlane.f32.xlu0 %v2607_v51  ;;  %2566 = vadd.xlane.f32.xlu1 %v2545_v45 }
 0x416   : > { %v7714_v60 = vpop.eup %6456 }
 0x417   : > { %v2418_v40 = vsel %vm1062_vm0, %v7714_v60, 0.0  ;;  %v7722_v3 = vpop.eup %6458  ;;  %2630 = vadd.xlane.f32.xlu1 %v2609_v15  ;;  %v2482_v7 = vsel %vm1066_vm6, %v7714_v60, 0.0 }
 0x418   : > { %2441 = vadd.xlane.f32.xlu0 %v2418_v40  ;;  %v2547_v46 = vsel %vm1075_vm12, %v7722_v3, 0.0  ;;  %v2611_v50 = vsel %vm1079_vm13, %v7722_v3, 0.0 }
 0x419   : > { %v7724_v42 = vpop.eup %6460 }
 0x41a   : > { %v2420_v47 = vsel %vm1062_vm0, %v7724_v42, 0.0  ;;  %v7732_v27 = vpop.eup %6462  ;;  %v2484_v0 = vsel %vm1066_vm6, %v7724_v42, 0.0 }
 0x41b   : > { %2444 = vadd.xlane.f32.xlu1 %v2420_v47  ;;  %v2549_v30 = vsel %vm1075_vm12, %v7732_v27, 0.0  ;;  %v2613_v52 = vsel %vm1079_vm13, %v7732_v27, 0.0 }
 0x41c   : > { %2569 = vadd.xlane.f32.xlu0 %v2547_v46 }
 0x41f   : > { %2572 = vadd.xlane.f32.xlu1 %v2549_v30 }
 0x420   : > { %2633 = vadd.xlane.f32.xlu0 %v2611_v50 }
 0x423   : > { %2636 = vadd.xlane.f32.xlu1 %v2613_v52 }
 0x424   : > { %2505 = vadd.xlane.f32.xlu0 %v2482_v7 }
 0x427   : > { %2508 = vadd.xlane.f32.xlu1 %v2484_v0 }
 0x470   : > { %v2424_v38 = vpop.xlane.xlu0 %2423 }
 0x474   : > { %v2552_v5 = vpop.xlane.xlu0 %2551  ;;  %v2427_v62 = vpop.xlane.xlu1 %2426 }
 0x475   : > { %6464 = vrcp.f32 %v2552_v5 }
 0x478   : > { %v2616_v24 = vpop.xlane.xlu0 %2615  ;;  %v2555_v39 = vpop.xlane.xlu1 %2554 }
 0x479   : > { %6466 = vrcp.f32 %v2616_v24 }
 0x47a   : > { %6468 = vrcp.f32 %v2555_v39 }
 0x47b   : > { %6470 = vrcp.f32 %v2424_v38 }
 0x47c   : > { %v2488_v63 = vpop.xlane.xlu0 %2487  ;;  %v2619_v4 = vpop.xlane.xlu1 %2618 }
 0x47d   : > { %6472 = vrcp.f32 %v2488_v63 }
 0x47e   : > { %6474 = vrcp.f32 %v2619_v4 }
 0x47f   : > { %6476 = vrcp.f32 %v2427_v62 }
 0x480   : > { %v2430_v6 = vpop.xlane.xlu0 %2429  ;;  %v2491_v11 = vpop.xlane.xlu1 %2490 }
 0x481   : > { %6478 = vrcp.f32 %v2491_v11 }
 0x482   : > { %v6465_v49 = vpop.eup %6464  ;;  %6480 = vrcp.f32 %v2430_v6 }
 0x483   : > { %v2583_v34 = vsel %vm1075_vm12, %v6465_v49, 0.0 }
 0x484   : > { %v2494_v18 = vpop.xlane.xlu0 %2493  ;;  %v2433_v53 = vpop.xlane.xlu1 %2432 }
 0x485   : > { %6482 = vrcp.f32 %v2433_v53  ;;  %v2798_v53 = vsel %vm7258_vm5, %v7385_v48, 0 }
 0x486   : > { %v6467_v23 = vpop.eup %6466 }
 0x487   : > { %v6469_v33 = vpop.eup %6468  ;;  %v2647_v51 = vsel %vm1079_vm13, %v6467_v23, %v2583_v34 }
 0x488   : > { %v2558_v37 = vpop.xlane.xlu0 %2557  ;;  %v2497_v26 = vpop.xlane.xlu1 %2496  ;;  %v2585_v40 = vsel %vm1075_vm12, %v6469_v33, 0.0  ;;  %v2663_v7 = vmul.f32 %v7577_v20, %v2647_v51 }
 0x489   : > { %v6471_v28 = vpop.eup %6470  ;;  %6484 = vrcp.f32 %v2558_v37 }
 0x48a   : > { %v6473_v25 = vpop.eup %6472  ;;  %v2454_v30 = vsel %vm1062_vm0, %v6471_v28, 0.0  ;;  %6486 = vrcp.f32 %v2497_v26  ;;  %v7777_v26 = vpack.c.bf16 %v7363_v55, %v7359_v16 }
 0x48b   : > { %v6475_v45 = vpop.eup %6474  ;;  %v2518_v0 = vsel %vm1066_vm6, %v6473_v25, %v2454_v30 }
 0x48c   : > { %v6477_v15 = vpop.eup %6476  ;;  %v2622_v46 = vpop.xlane.xlu0 %2621  ;;  %v2649_v50 = vsel %vm1079_vm13, %v6475_v45, %v2585_v40  ;;  %v2662_v20 = vmul.f32 %v7575_v19, %v2518_v0  ;;  %v2797_v40 = vsel %vm7258_vm5, %v7373_v59, 0  ;;  %v2804_v55 = vsel %vm7254_vm4, %v7777_v26, 0 }
 0x48d   : > { %v2561_v47 = vpop.xlane.xlu1 %2560  ;;  %v2665_v52 = vmul.f32 %v7592_v44, %v2649_v50  ;;  %6488 = vrcp.f32 %v2622_v46  ;;  %v2456_v5 = vsel %vm1062_vm0, %v6477_v15, 0.0 }
 0x48e   : > { %v6479_v38 = vpop.eup %6478  ;;  %6490 = vrcp.f32 %v2561_v47 }
 0x48f   : > { %v2679_v62 = vpack.c.bf16 %v2665_v52, %v2663_v7  ;;  %6492 = vrcp.f32 %v2494_v18  ;;  %v2520_v63 = vsel %vm1066_vm6, %v6479_v38, %v2456_v5  ;;  %v2805_v18 = vsel %vm7254_vm4, %v7373_v59, 0  ;;  %v6481_v49 = vpop.eup %6480 }
 0x490   : > { %v2436_v24 = vpop.xlane.xlu0 %2435  ;;  %v2664_v44 = vmul.f32 %v7587_v32, %v2520_v63  ;;  %v2458_v7 = vsel %vm1062_vm0, %v6481_v49, 0.0  ;;  %v7806_v63 = vpack.c.bf16 %v7357_v58, %v7353_v22 }
 0x491   : > { %v2625_v39 = vpop.xlane.xlu1 %2624  ;;  %2718 = vmatprep.mubr.bf16.mxu1 %v2679_v62 }
 0x492   : > { %6494 = vrcp.f32 %v2625_v39  ;;  %v2678_v4 = vpack.c.bf16 %v2664_v44, %v2662_v20  ;;  %v6483_v23 = vpop.eup %6482  ;;  %v2795_v12 = vsel %vm7258_vm5, %v7806_v63, 0 }
 0x493   : > { %6496 = vrcp.f32 %v2436_v24  ;;  %v2460_v16 = vsel %vm1062_vm0, %v6483_v23, 0.0 }
 0x494   : > { %v2500_v6 = vpop.xlane.xlu0 %2499  ;;  %2719 = vmatmul.mubr.bf16.vlgmr.msra.gmra.mxu1 %v2678_v4 }
 0x495   : > { %v2439_v11 = vpop.xlane.xlu1 %2438  ;;  %5943 = vmatpush3.bf16.xpose.msra.mxu1 %v2798_v53 }
 0x496   : > { %5944 = vmatprep.subr.bf16.mxu1 %v2805_v18  ;;  %v6485_v32 = vpop.eup %6484  ;;  %6498 = vrcp.f32 %v2439_v11  ;;  %v2796_v11 = vsel %vm7258_vm5, %v7777_v26, 0 }
 0x497   : > { %v6487_v37 = vpop.eup %6486  ;;  %v2587_v15 = vsel %vm1075_vm12, %v6485_v32, 0.0 }
 0x498   : > { %v2564_v19 = vpop.xlane.xlu0 %2563  ;;  %v2524_v47 = vsel %vm1066_vm6, %v6487_v37, %v2460_v16 }
 0x499   : > { %v2503_v33 = vpop.xlane.xlu1 %2502  ;;  %6500 = vrcp.f32 %v2564_v19  ;;  %v2668_v39 = vmul.f32 %v7632_v13, %v2524_v47  ;;  %v2803_v13 = vsel %vm7254_vm4, %v7806_v63, 0 }
 0x49a   : > { %v6489_v28 = vpop.eup %6488  ;;  %6502 = vrcp.f32 %v2503_v33 }
 0x49b   : > { %v6491_v34 = vpop.eup %6490  ;;  %v2651_v46 = vsel %vm1079_vm13, %v6489_v28, %v2587_v15 }
 0x49c   : > { %v2628_v25 = vpop.xlane.xlu0 %2627  ;;  %v6493_v45 = vpop.eup %6492  ;;  %v2589_v30 = vsel %vm1075_vm12, %v6491_v34, 0.0  ;;  %v2667_v62 = vmul.f32 %v7646_v2, %v2651_v46  ;;  %v2802_v34 = vsel %vm7286_vm9, %v7385_v48, 0 }
 0x49d   : > { %v2567_v51 = vpop.xlane.xlu1 %2566  ;;  %6504 = vrcp.f32 %v2628_v25  ;;  %5945 = vmatpush3.bf16.xpose.msra.mxu1 %v2797_v40  ;;  %v2522_v5 = vsel %vm1066_vm6, %v6493_v45, %v2458_v7 }
 0x49e   : > { %6506 = vrcp.f32 %v2567_v51  ;;  %5946 = vmatprep.subr.bf16.mxu1 %v2804_v55  ;;  %v2666_v44 = vmul.f32 %v7619_v57, %v2522_v5 }
 0x49f   : > { %v6495_v50 = vpop.eup %6494  ;;  %6508 = vrcp.f32 %v2500_v6 }
 0x4a0   : > { %v2653_v38 = vsel %vm1079_vm13, %v6495_v50, %v2589_v30  ;;  %v2680_v2 = vpack.c.bf16 %v2668_v39, %v2666_v44 }
 0x4a1   : > { %v2442_v52 = vpop.xlane.xlu0 %2441  ;;  %v2631_v0 = vpop.xlane.xlu1 %2630  ;;  %v2669_v24 = vmul.f32 %v7656_v61, %v2653_v38 }
 0x4a2   : > { %6510 = vrcp.f32 %v2631_v0  ;;  %v6497_v61 = vpop.eup %6496  ;;  %v2794_v0 = vsel %vm7299_vm11, %v7385_v48, 0 }
 0x4a3   : > { %v2681_v20 = vpack.c.bf16 %v2669_v24, %v2667_v62  ;;  %v6499_v22 = vpop.eup %6498  ;;  %6512 = vrcp.f32 %v2442_v52  ;;  %v2462_v40 = vsel %vm1062_vm0, %v6497_v61, 0.0 }
 0x4a4   : > { %v2464_v28 = vsel %vm1062_vm0, %v6499_v22, 0.0  ;;  %v2800_v22 = vsel %vm7286_vm9, %v7777_v26, 0 }
 0x4a5   : > { %v2570_v4 = vpop.xlane.xlu0 %2569  ;;  %v2445_v6 = vpop.xlane.xlu1 %2444  ;;  %2726 = vmatprep.mubr.bf16.mxu1 %v2681_v20  ;;  %5947 = vmatpush3.bf16.xpose.msra.mxu1 %v2796_v11 }
 0x4a6   : > { %2727 = vmatmul.mubr.bf16.gmra.mxu1 %v2680_v2  ;;  %5948 = vmatprep.subr.bf16.mxu1 %v2803_v13  ;;  %v6501_v53 = vpop.eup %6500  ;;  %6514 = vrcp.f32 %v2570_v4 }
 0x4a7   : > { %v6503_v18 = vpop.eup %6502  ;;  %v2591_v37 = vsel %vm1075_vm12, %v6501_v53, 0.0 }
 0x4a8   : > { %v2528_v51 = vsel %vm1066_vm6, %v6503_v18, %v2464_v28  ;;  %v2792_v18 = vsel %vm7299_vm11, %v7777_v26, 0 }
 0x4a9   : > { %v2634_v58 = vpop.xlane.xlu0 %2633  ;;  %v2573_v57 = vpop.xlane.xlu1 %2572  ;;  %v2672_v50 = vmul.f32 %v7687_v21, %v2528_v51 }
 0x4aa   : > { %6516 = vrcp.f32 %v2634_v58  ;;  %v6505_v49 = vpop.eup %6504 }
 0x4ab   : > { %6518 = vrcp.f32 %v2573_v57  ;;  %v6507_v23 = vpop.eup %6506  ;;  %v2655_v25 = vsel %vm1079_vm13, %v6505_v49, %v2591_v37  ;;  %v2799_v49 = vsel %vm7286_vm9, %v7806_v63, 0 }
 0x4ac   : > { %6520 = vrcp.f32 %v2445_v6  ;;  %v6509_v32 = vpop.eup %6508  ;;  %v2593_v45 = vsel %vm1075_vm12, %v6507_v23, 0.0  ;;  %v2671_v46 = vmul.f32 %v7698_v29, %v2655_v25  ;;  %v2801_v29 = vsel %vm7286_vm9, %v7373_v59, 0 }
 0x4ad   : > { %v2506_v19 = vpop.xlane.xlu0 %2505  ;;  %v2637_v33 = vpop.xlane.xlu1 %2636  ;;  %5949 = vmatpush3.bf16.xpose.msra.mxu1 %v2795_v12  ;;  %v2526_v55 = vsel %vm1066_vm6, %v6509_v32, %v2462_v40  ;;  %v2793_v6 = vsel %vm7299_vm11, %v7373_v59, 0 }
 0x4ae   : > { %6522 = vrcp.f32 %v2506_v19  ;;  %5950 = vmatprep.subr.bf16.mxu1 %v2802_v34  ;;  %v2670_v7 = vmul.f32 %v7671_v41, %v2526_v55 }
 0x4af   : > { %6524 = vrcp.f32 %v2637_v33  ;;  %v6511_v17 = vpop.eup %6510 }
 0x4b0   : > { %v2657_v16 = vsel %vm1079_vm13, %v6511_v17, %v2593_v45  ;;  %v6513_v52 = vpop.eup %6512  ;;  %v2682_v38 = vpack.c.bf16 %v2672_v50, %v2670_v7 }
 0x4b1   : > { %v2509_v15 = vpop.xlane.xlu1 %2508  ;;  %v2673_v47 = vmul.f32 %v7706_v36, %v2657_v16  ;;  %v2466_v4 = vsel %vm1062_vm0, %v6513_v52, 0.0 }
 0x4b2   : > { %6526 = vrcp.f32 %v2509_v15 }
 0x4b3   : > { %v2683_v30 = vpack.c.bf16 %v2673_v47, %v2671_v46  ;;  %v6515_v5 = vpop.eup %6514 }
 0x4b4   : > { %v2595_v41 = vsel %vm1075_vm12, %v6515_v5, 0.0 }
 0x4b5   : > { %2734 = vmatprep.mubr.bf16.mxu1 %v2683_v30  ;;  %5951 = vmatpush3.bf16.xpose.msra.mxu1 %v2794_v0 }
 0x4b6   : > { %2735 = vmatmul.mubr.bf16.gmra.mxu1 %v2682_v38  ;;  %5952 = vmatprep.subr.bf16.mxu1 %v2801_v29 }
 0x4b7   : > { %v6517_v62 = vpop.eup %6516 }
 0x4b8   : > { %v6519_v21 = vpop.eup %6518  ;;  %v2659_v39 = vsel %vm1079_vm13, %v6517_v62, %v2595_v41 }
 0x4b9   : > { %v6521_v36 = vpop.eup %6520  ;;  %v2597_v20 = vsel %vm1075_vm12, %v6519_v21, 0.0  ;;  %v2675_v11 = vmul.f32 %v7722_v3, %v2659_v39 }
 0x4ba   : > { %v2468_v58 = vsel %vm1062_vm0, %v6521_v36, 0.0 }
 0x4bb   : > { %v6523_v24 = vpop.eup %6522 }
 0x4bc   : > { %v6525_v48 = vpop.eup %6524  ;;  %v2530_v13 = vsel %vm1066_vm6, %v6523_v24, %v2466_v4 }
 0x4bd   : > { %v2661_v44 = vsel %vm1079_vm13, %v6525_v48, %v2597_v20  ;;  %5953 = vmatpush3.bf16.xpose.msra.mxu1 %v2793_v6  ;;  %v2674_v3 = vmul.f32 %v7714_v60, %v2530_v13  ;;  %v2791_v60 = vsel %vm7299_vm11, %v7806_v63, 0 }
 0x4be   : > { %v2677_v2 = vmul.f32 %v7732_v27, %v2661_v44  ;;  %5954 = vmatprep.subr.bf16.mxu1 %v2800_v22 }
 0x4bf   : > { %v6527_v61 = vpop.eup %6526 }
 0x4c0   : > { %v2685_v57 = vpack.c.bf16 %v2677_v2, %v2675_v11  ;;  %v2532_v59 = vsel %vm1066_vm6, %v6527_v61, %v2468_v58 }
 0x4c1   : > { %v2676_v27 = vmul.f32 %v7724_v42, %v2532_v59 }
 0x4c2   : > { %2742 = vmatprep.mubr.bf16.mxu1 %v2685_v57 }
 0x4c3   : > { %v2684_v53 = vpack.c.bf16 %v2676_v27, %v2674_v3 }
 0x4c5   : > { %2743 = vmatmul.mubr.bf16.gmra.mxu1 %v2684_v53 }
 0x4c6   : > { %5958 = vmatprep.mubr.bf16.mxu1 %v7355_v10  ;;  %5955 = vmatpush3.bf16.xpose.msra.mxu1 %v2792_v18 }
 0x4c7   : > { %5956 = vmatprep.subr.bf16.mxu1 %v2799_v49 }
 0x4ce   : > { %5957 = vmatpush3.bf16.xpose.msra.mxu1 %v2791_v60 }
 0x4d5   : > { %5959 = vmatmul.mubr.bf16.vlgmr.msra.gmra.mxu1 %v7355_v10 }
 0x4d6   : > { %5960 = vmatprep.mubr.bf16.mxu1 %v7361_v54 }
 0x4dd   : > { %5961 = vmatmul.mubr.bf16.gmra.mxu1 %v7361_v54 }
 0x4de   : > { %5962 = vmatprep.mubr.bf16.mxu1 %v7369_v35 }
 0x4e5   : > { %5963 = vmatmul.mubr.bf16.gmra.mxu1 %v7369_v35 }
 0x4e6   : > { %5964 = vmatprep.mubr.bf16.mxu1 %v7381_v43 }
 0x4ed   : > { %5965 = vmatmul.mubr.bf16.gmra.mxu1 %v7381_v43 }
 0x4ee   : > { %4277 = vmatprep.mubr.bf16.mxu1 %v6862_v8 }
 0x554   : > { %v5918_v31 = vpop.f32.mrf.mxu1 }
 0x556   : > { %v5919_v9 = vpop.f32.mrf.mxu1 }
 0x557   : > { %v5920_v63 = vadd.f32 %v5919_v9, %v5918_v31 }
 0x558   : > { %v5921_v42 = vpop.f32.mrf.mxu1 }
 0x55a   : > { %v5922_v26 = vpop.f32.mrf.mxu1 }
 0x55b   : > { %v5923_v10 = vadd.f32 %v5922_v26, %v5921_v42 }
 0x55d   : > { %v5818_v23 = vpack.c.bf16 %v5923_v10, %v5920_v63 }
 0x55f   : > { %5819 = vst [vmem:[#allocation2] sm:$0xff] %v5818_v23  }
 0x566   : > { %v5924_v19 = vpop.f32.mrf.mxu1 }
 0x568   : > { %v5925_v54 = vpop.f32.mrf.mxu1 }
 0x569   : > { %v5926_v12 = vadd.f32 %v5925_v54, %v5924_v19 }
 0x56a   : > { %v5927_v33 = vpop.f32.mrf.mxu1 }
 0x56c   : > { %v5928_v32 = vpop.f32.mrf.mxu1 }
 0x56d   : > { %v5929_v35 = vadd.f32 %v5928_v32, %v5927_v33 }
 0x56f   : > { %v5823_v37 = vpack.c.bf16 %v5929_v35, %v5926_v12 }
 0x571   : > { %5855 = vst [vmem:[#allocation2 + $0x8] sm:$0xff] %v5823_v37  }
 0x576   : > { %v5930_v28 = vpop.f32.mrf.mxu1 }
 0x578   : > { %v5931_v43 = vpop.f32.mrf.mxu1 }
 0x579   : > { %v5932_v51 = vadd.f32 %v5931_v43, %v5930_v28 }
 0x57a   : > { %v5933_v34 = vpop.f32.mrf.mxu1 }
 0x57c   : > { %v5934_v25 = vpop.f32.mrf.mxu1 }
 0x57d   : > { %v5935_v17 = vadd.f32 %v5934_v25, %v5933_v34 }
 0x57f   : > { %v5828_v45 = vpack.c.bf16 %v5935_v17, %v5932_v51 }
 0x581   : > { %5856 = vst [vmem:[#allocation2 + $0x10] sm:$0xff] %v5828_v45  }
 0x585   : > { %v5936_v40 = vpop.f32.mrf.mxu1 }
 0x587   : > { %v5937_v15 = vpop.f32.mrf.mxu1 }
 0x588   : > { %v5938_v46 = vadd.f32 %v5937_v15, %v5936_v40 }
 0x589   : > { %v5939_v16 = vpop.f32.mrf.mxu1 }
 0x58b   : > { %v5940_v55 = vpop.f32.mrf.mxu1 }
 0x58c   : > { %v5941_v47 = vadd.f32 %v5940_v55, %v5939_v16 }
 0x58e   : > { %v5833_v50 = vpack.c.bf16 %v5941_v47, %v5938_v46 }
 0x590   : > { %5857 = vst [vmem:[#allocation2 + $0x18] sm:$0xff] %v5833_v50  }
 0x595   : > { %v7891_v30 = vpop.f32.mrf.mxu1 }
 0x596   : > { %v2896_v7 = vsel %vm1062_vm0, %v7891_v30, -1e+30  ;;  %v2952_v38 = vsel %vm1066_vm6, %v7891_v30, -1e+30 }
 0x597   : > { %v7896_v52 = vpop.f32.mrf.mxu1  ;;  %v2912_v0 = vmax.f32 %v2896_v7, -1e+30  ;;  %v2968_v62 = vmax.f32 %v2952_v38, -1e+30 }
 0x598   : > { %v3009_v41 = vsel %vm1075_vm12, %v7896_v52, -1e+30  ;;  %v3065_v44 = vsel %vm1079_vm13, %v7896_v52, -1e+30 }
 0x599   : > { %2913 = vmax.xlane.f32.xlu0 %v2912_v0  ;;  %v7901_v5 = vpop.f32.mrf.mxu1  ;;  %v3024_v48 = vmax.f32 %v3009_v41, -1e+30  ;;  %v3080_v11 = vmax.f32 %v3065_v44, -1e+30 }
 0x59a   : > { %v2898_v29 = vsel %vm1062_vm0, %v7901_v5, -1e+30  ;;  %v2954_v24 = vsel %vm1066_vm6, %v7901_v5, -1e+30 }
 0x59b   : > { %v7906_v21 = vpop.f32.mrf.mxu1  ;;  %v2915_v36 = vmax.f32 %v2898_v29, -1e+30  ;;  %v2971_v20 = vmax.f32 %v2954_v24, -1e+30 }
 0x59c   : > { %v3011_v4 = vsel %vm1075_vm12, %v7906_v21, -1e+30  ;;  %v3067_v13 = vsel %vm1079_vm13, %v7906_v21, -1e+30 }
 0x59d   : > { %2969 = vmax.xlane.f32.xlu0 %v2968_v62  ;;  %2916 = vmax.xlane.f32.xlu1 %v2915_v36  ;;  %v7914_v39 = vpop.f32.mrf.mxu1  ;;  %v3027_v2 = vmax.f32 %v3011_v4, -1e+30  ;;  %v3083_v58 = vmax.f32 %v3067_v13, -1e+30 }
 0x59e   : > { %v2900_v61 = vsel %vm1062_vm0, %v7914_v39, -1e+30  ;;  %v2956_v59 = vsel %vm1066_vm6, %v7914_v39, -1e+30 }
 0x59f   : > { %v7922_v6 = vpop.f32.mrf.mxu1  ;;  %v2918_v57 = vmax.f32 %v2900_v61, -1e+30  ;;  %v2974_v53 = vmax.f32 %v2956_v59, -1e+30 }
 0x5a0   : > { %v3013_v49 = vsel %vm1075_vm12, %v7922_v6, -1e+30  ;;  %v3069_v26 = vsel %vm1079_vm13, %v7922_v6, -1e+30 }
 0x5a1   : > { %3025 = vmax.xlane.f32.xlu0 %v3024_v48  ;;  %2972 = vmax.xlane.f32.xlu1 %v2971_v20  ;;  %v7930_v22 = vpop.f32.mrf.mxu1  ;;  %v3030_v9 = vmax.f32 %v3013_v49, -1e+30  ;;  %v3086_v23 = vmax.f32 %v3069_v26, -1e+30 }
 0x5a2   : > { %v2902_v3 = vsel %vm1062_vm0, %v7930_v22, -1e+30  ;;  %v2958_v60 = vsel %vm1066_vm6, %v7930_v22, -1e+30 }
 0x5a3   : > { %v7938_v27 = vpop.f32.mrf.mxu1  ;;  %v2921_v18 = vmax.f32 %v2902_v3, -1e+30  ;;  %v2977_v42 = vmax.f32 %v2958_v60, -1e+30 }
 0x5a4   : > { %v3015_v63 = vsel %vm1075_vm12, %v7938_v27, -1e+30  ;;  %v3071_v54 = vsel %vm1079_vm13, %v7938_v27, -1e+30 }
 0x5a5   : > { %3081 = vmax.xlane.f32.xlu0 %v3080_v11  ;;  %3028 = vmax.xlane.f32.xlu1 %v3027_v2  ;;  %v7946_v31 = vpop.f32.mrf.mxu1  ;;  %v3033_v19 = vmax.f32 %v3015_v63, -1e+30  ;;  %v3089_v12 = vmax.f32 %v3071_v54, -1e+30 }
 0x5a6   : > { %v2904_v33 = vsel %vm1062_vm0, %v7946_v31, -1e+30  ;;  %v2960_v37 = vsel %vm1066_vm6, %v7946_v31, -1e+30 }
 0x5a7   : > { %v7954_v10 = vpop.f32.mrf.mxu1  ;;  %v2924_v35 = vmax.f32 %v2904_v33, -1e+30  ;;  %v2980_v34 = vmax.f32 %v2960_v37, -1e+30 }
 0x5a8   : > { %v3017_v51 = vsel %vm1075_vm12, %v7954_v10, -1e+30  ;;  %v3073_v16 = vsel %vm1079_vm13, %v7954_v10, -1e+30 }
 0x5a9   : > { %3084 = vmax.xlane.f32.xlu1 %v3083_v58  ;;  %2919 = vmax.xlane.f32.xlu0 %v2918_v57  ;;  %v7962_v32 = vpop.f32.mrf.mxu1  ;;  %v3036_v40 = vmax.f32 %v3017_v51, -1e+30  ;;  %v3092_v47 = vmax.f32 %v3073_v16, -1e+30 }
 0x5aa   : > { %v2906_v28 = vsel %vm1062_vm0, %v7962_v32, -1e+30  ;;  %v2962_v17 = vsel %vm1066_vm6, %v7962_v32, -1e+30 }
 0x5ab   : > { %v7970_v43 = vpop.f32.mrf.mxu1  ;;  %v2927_v25 = vmax.f32 %v2906_v28, -1e+30  ;;  %v2983_v15 = vmax.f32 %v2962_v17, -1e+30 }
 0x5ac   : > { %v3019_v55 = vsel %vm1075_vm12, %v7970_v43, -1e+30  ;;  %v3075_v7 = vsel %vm1079_vm13, %v7970_v43, -1e+30 }
 0x5ad   : > { %2975 = vmax.xlane.f32.xlu0 %v2974_v53  ;;  %2922 = vmax.xlane.f32.xlu1 %v2921_v18  ;;  %v7978_v45 = vpop.f32.mrf.mxu1  ;;  %v3039_v50 = vmax.f32 %v3019_v55, -1e+30  ;;  %v3095_v29 = vmax.f32 %v3075_v7, -1e+30 }
 0x5ae   : > { %v2908_v0 = vsel %vm1062_vm0, %v7978_v45, -1e+30  ;;  %v2964_v13 = vsel %vm1066_vm6, %v7978_v45, -1e+30 }
 0x5af   : > { %v7986_v46 = vpop.f32.mrf.mxu1  ;;  %v2930_v62 = vmax.f32 %v2908_v0, -1e+30  ;;  %v2986_v58 = vmax.f32 %v2964_v13, -1e+30 }
 0x5b0   : > { %v3021_v36 = vsel %vm1075_vm12, %v7986_v46, -1e+30  ;;  %v3077_v44 = vsel %vm1079_vm13, %v7986_v46, -1e+30 }
 0x5b1   : > { %3031 = vmax.xlane.f32.xlu0 %v3030_v9  ;;  %2978 = vmax.xlane.f32.xlu1 %v2977_v42  ;;  %v7994_v38 = vpop.f32.mrf.mxu1  ;;  %v3042_v48 = vmax.f32 %v3021_v36, -1e+30  ;;  %v3098_v11 = vmax.f32 %v3077_v44, -1e+30 }
 0x5b2   : > { %v2910_v41 = vsel %vm1062_vm0, %v7994_v38, -1e+30  ;;  %v2966_v59 = vsel %vm1066_vm6, %v7994_v38, -1e+30 }
 0x5b3   : > { %v8002_v24 = vpop.f32.mrf.mxu1  ;;  %v2933_v20 = vmax.f32 %v2910_v41, -1e+30  ;;  %v2989_v3 = vmax.f32 %v2966_v59, -1e+30 }
 0x5b4   : > { %v3023_v4 = vsel %vm1075_vm12, %v8002_v24, -1e+30  ;;  %v3079_v61 = vsel %vm1079_vm13, %v8002_v24, -1e+30 }
 0x5b5   : > { %3087 = vmax.xlane.f32.xlu0 %v3086_v23  ;;  %3034 = vmax.xlane.f32.xlu1 %v3033_v19  ;;  %v3045_v2 = vmax.f32 %v3023_v4, -1e+30  ;;  %v3101_v57 = vmax.f32 %v3079_v61, -1e+30 }
 0x5b9   : > { %3090 = vmax.xlane.f32.xlu1 %v3089_v12  ;;  %2925 = vmax.xlane.f32.xlu0 %v2924_v35 }
 0x5bd   : > { %2981 = vmax.xlane.f32.xlu0 %v2980_v34  ;;  %2928 = vmax.xlane.f32.xlu1 %v2927_v25 }
 0x5c1   : > { %3037 = vmax.xlane.f32.xlu0 %v3036_v40  ;;  %2984 = vmax.xlane.f32.xlu1 %v2983_v15 }
 0x5c5   : > { %3093 = vmax.xlane.f32.xlu0 %v3092_v47  ;;  %3040 = vmax.xlane.f32.xlu1 %v3039_v50 }
 0x5c9   : > { %3096 = vmax.xlane.f32.xlu1 %v3095_v29  ;;  %2931 = vmax.xlane.f32.xlu0 %v2930_v62 }
 0x5cd   : > { %3043 = vmax.xlane.f32.xlu0 %v3042_v48  ;;  %2934 = vmax.xlane.f32.xlu1 %v2933_v20 }
 0x5d1   : > { %3099 = vmax.xlane.f32.xlu0 %v3098_v11  ;;  %3046 = vmax.xlane.f32.xlu1 %v3045_v2 }
 0x5d5   : > { %2987 = vmax.xlane.f32.xlu0 %v2986_v58  ;;  %3102 = vmax.xlane.f32.xlu1 %v3101_v57 }
 0x5d9   : > { %2990 = vmax.xlane.f32.xlu1 %v2989_v3 }
 0x622   : > { %v2914_v53 = vpop.xlane.xlu0 %2913 }
 0x623   : > { %v2936_v18 = vsel %vm1062_vm0, %v2914_v53, 0.0 }
 0x626   : > { %v2970_v49 = vpop.xlane.xlu0 %2969  ;;  %v2917_v60 = vpop.xlane.xlu1 %2916 }
 0x627   : > { %v2992_v9 = vsel %vm1066_vm6, %v2970_v49, %v2936_v18  ;;  %v2938_v63 = vsel %vm1062_vm0, %v2917_v60, 0.0 }
 0x628   : > { %v3120_v42 = vsub.f32 %v7891_v30, %v2992_v9 }
 0x62a   : > { %v3136_v26 = vmul.f32 1.442695, %v3120_v42  ;;  %v3026_v23 = vpop.xlane.xlu0 %3025  ;;  %v2973_v19 = vpop.xlane.xlu1 %2972 }
 0x62b   : > { %v2994_v54 = vsel %vm1066_vm6, %v2973_v19, %v2938_v63  ;;  %v3049_v12 = vsel %vm1075_vm12, %v3026_v23, 0.0 }
 0x62c   : > { %6528 = vpow2.f32 %v3136_v26  ;;  %v3122_v33 = vsub.f32 %v7901_v5, %v2994_v54 }
 0x62e   : > { %v3140_v35 = vmul.f32 1.442695, %v3122_v33  ;;  %v3082_v37 = vpop.xlane.xlu0 %3081  ;;  %v3029_v28 = vpop.xlane.xlu1 %3028 }
 0x62f   : > { %v3105_v30 = vsel %vm1079_vm13, %v3082_v37, %v3049_v12  ;;  %v3051_v51 = vsel %vm1075_vm12, %v3029_v28, 0.0 }
 0x630   : > { %6530 = vpow2.f32 %v3140_v35  ;;  %v3121_v34 = vsub.f32 %v7896_v52, %v3105_v30 }
 0x632   : > { %v3138_v25 = vmul.f32 1.442695, %v3121_v34  ;;  %v3085_v17 = vpop.xlane.xlu1 %3084  ;;  %v2920_v40 = vpop.xlane.xlu0 %2919 }
 0x633   : > { %v3107_v5 = vsel %vm1079_vm13, %v3085_v17, %v3051_v51  ;;  %v2940_v55 = vsel %vm1062_vm0, %v2920_v40, 0.0 }
 0x634   : > { %6532 = vpow2.f32 %v3138_v25  ;;  %v3123_v15 = vsub.f32 %v7906_v21, %v3107_v5 }
 0x636   : > { %v3142_v16 = vmul.f32 1.442695, %v3123_v15  ;;  %v2976_v47 = vpop.xlane.xlu0 %2975  ;;  %v2923_v50 = vpop.xlane.xlu1 %2922 }
 0x637   : > { %v2996_v52 = vsel %vm1066_vm6, %v2976_v47, %v2940_v55  ;;  %v2942_v62 = vsel %vm1062_vm0, %v2923_v50, 0.0 }
 0x638   : > { %6534 = vpow2.f32 %v3142_v16  ;;  %v3124_v7 = vsub.f32 %v7914_v39, %v2996_v52 }
 0x639   : > { %v8044_v0 = vpop.eup %6528 }
 0x63a   : > { %v3144_v29 = vmul.f32 1.442695, %v3124_v7  ;;  %v3032_v36 = vpop.xlane.xlu0 %3031  ;;  %v2979_v21 = vpop.xlane.xlu1 %2978  ;;  %v3168_v41 = vsel %vm1062_vm0, %v8044_v0, 0.0  ;;  %v3232_v13 = vsel %vm1066_vm6, %v8044_v0, 0.0 }
 0x63b   : > { %v2998_v48 = vsel %vm1066_vm6, %v2979_v21, %v2942_v62  ;;  %3185 = vadd.xlane.f32.xlu0 %v3168_v41  ;;  %v3053_v44 = vsel %vm1075_vm12, %v3032_v36, 0.0 }
 0x63c   : > { %6536 = vpow2.f32 %v3144_v29  ;;  %v3126_v20 = vsub.f32 %v7930_v22, %v2998_v48 }
 0x63d   : > { %v8054_v39 = vpop.eup %6530 }
 0x63e   : > { %v3148_v4 = vmul.f32 1.442695, %v3126_v20  ;;  %v3088_v11 = vpop.xlane.xlu0 %3087  ;;  %v3035_v2 = vpop.xlane.xlu1 %3034  ;;  %v3170_v61 = vsel %vm1062_vm0, %v8054_v39, 0.0  ;;  %v3234_v60 = vsel %vm1066_vm6, %v8054_v39, 0.0 }
 0x63f   : > { %v3109_v58 = vsel %vm1079_vm13, %v3088_v11, %v3053_v44  ;;  %3249 = vadd.xlane.f32.xlu0 %v3232_v13  ;;  %3188 = vadd.xlane.f32.xlu1 %v3170_v61  ;;  %v3055_v3 = vsel %vm1075_vm12, %v3035_v2, 0.0 }
 0x640   : > { %6538 = vpow2.f32 %v3148_v4  ;;  %v3125_v22 = vsub.f32 %v7922_v6, %v3109_v58 }
 0x641   : > { %v8067_v57 = vpop.eup %6532 }
 0x642   : > { %v3146_v59 = vmul.f32 1.442695, %v3125_v22  ;;  %v3091_v53 = vpop.xlane.xlu1 %3090  ;;  %v2926_v18 = vpop.xlane.xlu0 %2925  ;;  %v3297_v49 = vsel %vm1075_vm12, %v8067_v57, 0.0  ;;  %v3361_v54 = vsel %vm1079_vm13, %v8067_v57, 0.0 }
 0x643   : > { %v3111_v9 = vsel %vm1079_vm13, %v3091_v53, %v3055_v3  ;;  %3313 = vadd.xlane.f32.xlu0 %v3297_v49  ;;  %3252 = vadd.xlane.f32.xlu1 %v3234_v60  ;;  %v2944_v63 = vsel %vm1062_vm0, %v2926_v18, 0.0 }
 0x644   : > { %6540 = vpow2.f32 %v3146_v59  ;;  %v3127_v6 = vsub.f32 %v7938_v27, %v3111_v9 }
 0x645   : > { %v8080_v42 = vpop.eup %6534 }
 0x646   : > { %v3150_v26 = vmul.f32 1.442695, %v3127_v6  ;;  %v2982_v23 = vpop.xlane.xlu0 %2981  ;;  %v2929_v19 = vpop.xlane.xlu1 %2928  ;;  %v3299_v33 = vsel %vm1075_vm12, %v8080_v42, 0.0  ;;  %v3363_v51 = vsel %vm1079_vm13, %v8080_v42, 0.0 }
 0x647   : > { %v3000_v12 = vsel %vm1066_vm6, %v2982_v23, %v2944_v63  ;;  %3377 = vadd.xlane.f32.xlu0 %v3361_v54  ;;  %3316 = vadd.xlane.f32.xlu1 %v3299_v33  ;;  %v2946_v28 = vsel %vm1062_vm0, %v2929_v19, 0.0 }
 0x648   : > { %6542 = vpow2.f32 %v3150_v26  ;;  %v3128_v27 = vsub.f32 %v7946_v31, %v3000_v12 }
 0x649   : > { %v8093_v35 = vpop.eup %6536 }
 0x64a   : > { %v3152_v37 = vmul.f32 1.442695, %v3128_v27  ;;  %v3038_v30 = vpop.xlane.xlu0 %3037  ;;  %v2985_v34 = vpop.xlane.xlu1 %2984  ;;  %v3172_v25 = vsel %vm1062_vm0, %v8093_v35, 0.0  ;;  %v3236_v47 = vsel %vm1066_vm6, %v8093_v35, 0.0 }
 0x64b   : > { %v3002_v17 = vsel %vm1066_vm6, %v2985_v34, %v2946_v28  ;;  %3191 = vadd.xlane.f32.xlu0 %v3172_v25  ;;  %3380 = vadd.xlane.f32.xlu1 %v3363_v51  ;;  %v3057_v5 = vsel %vm1075_vm12, %v3038_v30, 0.0 }
 0x64c   : > { %6544 = vpow2.f32 %v3152_v37  ;;  %v3130_v31 = vsub.f32 %v7962_v32, %v3002_v17 }
 0x64d   : > { %v8106_v40 = vpop.eup %6538 }
 0x64e   : > { %v3156_v15 = vmul.f32 1.442695, %v3130_v31  ;;  %v3094_v16 = vpop.xlane.xlu0 %3093  ;;  %v3041_v55 = vpop.xlane.xlu1 %3040  ;;  %v3174_v50 = vsel %vm1062_vm0, %v8106_v40, 0.0  ;;  %v3238_v48 = vsel %vm1066_vm6, %v8106_v40, 0.0 }
 0x64f   : > { %v3113_v52 = vsel %vm1079_vm13, %v3094_v16, %v3057_v5  ;;  %3255 = vadd.xlane.f32.xlu0 %v3236_v47  ;;  %3194 = vadd.xlane.f32.xlu1 %v3174_v50  ;;  %v3059_v62 = vsel %vm1075_vm12, %v3041_v55, 0.0 }
 0x650   : > { %6546 = vpow2.f32 %v3156_v15  ;;  %v3129_v32 = vsub.f32 %v7954_v10, %v3113_v52 }
 0x651   : > { %v8119_v7 = vpop.eup %6540 }
 0x652   : > { %v3154_v29 = vmul.f32 1.442695, %v3129_v32  ;;  %v3097_v36 = vpop.xlane.xlu1 %3096  ;;  %v2932_v21 = vpop.xlane.xlu0 %2931  ;;  %v3301_v41 = vsel %vm1075_vm12, %v8119_v7, 0.0  ;;  %v3365_v13 = vsel %vm1079_vm13, %v8119_v7, 0.0 }
 0x653   : > { %v3115_v20 = vsel %vm1079_vm13, %v3097_v36, %v3059_v62  ;;  %3319 = vadd.xlane.f32.xlu0 %v3301_v41  ;;  %3258 = vadd.xlane.f32.xlu1 %v3238_v48  ;;  %v2948_v9 = vsel %vm1062_vm0, %v2932_v21, 0.0 }
 0x654   : > { %6548 = vpow2.f32 %v3154_v29  ;;  %v3131_v10 = vsub.f32 %v7970_v43, %v3115_v20 }
 0x655   : > { %v8132_v44 = vpop.eup %6542 }
 0x656   : > { %v3158_v4 = vmul.f32 1.442695, %v3131_v10  ;;  %v3044_v11 = vpop.xlane.xlu0 %3043  ;;  %v2935_v2 = vpop.xlane.xlu1 %2934  ;;  %v3303_v61 = vsel %vm1075_vm12, %v8132_v44, 0.0  ;;  %v3367_v53 = vsel %vm1079_vm13, %v8132_v44, 0.0  ;;  %v8230_v10 = vld [vmem:[%s9523_s4 + $0x38] sm:$0xff]  }
 0x657   : > { %3383 = vadd.xlane.f32.xlu0 %v3365_v13  ;;  %3322 = vadd.xlane.f32.xlu1 %v3303_v61  ;;  %v3061_v43 = vsel %vm1075_vm12, %v3044_v11, 0.0  ;;  %v2950_v27 = vsel %vm1062_vm0, %v2935_v2, 0.0 }
 0x658   : > { %6550 = vpow2.f32 %v3158_v4  ;;  %6182 = vmatprep.subr.bf16.mxu0 %v8230_v10 }
 0x659   : > { %v8140_v58 = vpop.eup %6544 }
 0x65a   : > { %v3100_v22 = vpop.xlane.xlu0 %3099  ;;  %v3047_v59 = vpop.xlane.xlu1 %3046  ;;  %v3176_v3 = vsel %vm1062_vm0, %v8140_v58, 0.0  ;;  %v3240_v23 = vsel %vm1066_vm6, %v8140_v58, 0.0 }
 0x65b   : > { %v3117_v18 = vsel %vm1079_vm13, %v3100_v22, %v3061_v43  ;;  %3197 = vadd.xlane.f32.xlu0 %v3176_v3  ;;  %3386 = vadd.xlane.f32.xlu1 %v3367_v53  ;;  %v3063_v6 = vsel %vm1075_vm12, %v3047_v59, 0.0 }
 0x65c   : > { %v3133_v60 = vsub.f32 %v7986_v46, %v3117_v18 }
 0x65d   : > { %v8152_v49 = vpop.eup %6546 }
 0x65e   : > { %v2988_v26 = vpop.xlane.xlu0 %2987  ;;  %v3103_v63 = vpop.xlane.xlu1 %3102  ;;  %v3178_v19 = vsel %vm1062_vm0, %v8152_v49, 0.0  ;;  %v3162_v37 = vmul.f32 1.442695, %v3133_v60  ;;  %v3242_v51 = vsel %vm1066_vm6, %v8152_v49, 0.0 }
 0x65f   : > { %v3004_v54 = vsel %vm1066_vm6, %v2988_v26, %v2948_v9  ;;  %v3119_v46 = vsel %vm1079_vm13, %v3103_v63, %v3063_v6  ;;  %3261 = vadd.xlane.f32.xlu0 %v3240_v23  ;;  %3200 = vadd.xlane.f32.xlu1 %v3178_v19 }
 0x660   : > { %v3132_v33 = vsub.f32 %v7978_v45, %v3004_v54  ;;  %v3135_v30 = vsub.f32 %v8002_v24, %v3119_v46 }
 0x661   : > { %v8170_v12 = vpop.eup %6548 }
 0x662   : > { %v3160_v28 = vmul.f32 1.442695, %v3132_v33  ;;  %v2991_v34 = vpop.xlane.xlu1 %2990  ;;  %v3305_v25 = vsel %vm1075_vm12, %v8170_v12, 0.0  ;;  %v3166_v24 = vmul.f32 1.442695, %v3135_v30  ;;  %v3369_v15 = vsel %vm1079_vm13, %v8170_v12, 0.0 }
 0x663   : > { %v3006_v45 = vsel %vm1066_vm6, %v2991_v34, %v2950_v27  ;;  %3325 = vadd.xlane.f32.xlu0 %v3305_v25  ;;  %3264 = vadd.xlane.f32.xlu1 %v3242_v51 }
 0x664   : > { %6552 = vpow2.f32 %v3160_v28  ;;  %v3134_v17 = vsub.f32 %v7994_v38, %v3006_v45 }
 0x665   : > { %v8184_v31 = vpop.eup %6550  ;;  %6554 = vpow2.f32 %v3162_v37 }
 0x666   : > { %v3164_v5 = vmul.f32 1.442695, %v3134_v17  ;;  %v3307_v16 = vsel %vm1075_vm12, %v8184_v31, 0.0  ;;  %v3371_v38 = vsel %vm1079_vm13, %v8184_v31, 0.0 }
 0x667   : > { %3389 = vadd.xlane.f32.xlu0 %v3369_v15  ;;  %3328 = vadd.xlane.f32.xlu1 %v3307_v16 }
 0x668   : > { %6556 = vpow2.f32 %v3164_v5 }
 0x669   : > { %6558 = vpow2.f32 %v3166_v24 }
 0x66b   : > { %3392 = vadd.xlane.f32.xlu1 %v3371_v38 }
 0x671   : > { %v8195_v55 = vpop.eup %6552 }
 0x672   : > { %v8197_v47 = vpop.eup %6554  ;;  %v3180_v50 = vsel %vm1062_vm0, %v8195_v55, 0.0  ;;  %v3244_v41 = vsel %vm1066_vm6, %v8195_v55, 0.0 }
 0x673   : > { %3203 = vadd.xlane.f32.xlu0 %v3180_v50  ;;  %v3309_v32 = vsel %vm1075_vm12, %v8197_v47, 0.0  ;;  %v3373_v36 = vsel %vm1079_vm13, %v8197_v47, 0.0 }
 0x675   : > { %v8202_v52 = vpop.eup %6556 }
 0x676   : > { %v3182_v29 = vsel %vm1062_vm0, %v8202_v52, 0.0  ;;  %v8210_v62 = vpop.eup %6558  ;;  %v3246_v20 = vsel %vm1066_vm6, %v8202_v52, 0.0 }
 0x677   : > { %3331 = vadd.xlane.f32.xlu0 %v3309_v32  ;;  %3206 = vadd.xlane.f32.xlu1 %v3182_v29  ;;  %v3311_v21 = vsel %vm1075_vm12, %v8210_v62, 0.0  ;;  %v3375_v48 = vsel %vm1079_vm13, %v8210_v62, 0.0 }
 0x67b   : > { %3395 = vadd.xlane.f32.xlu0 %v3373_v36  ;;  %3334 = vadd.xlane.f32.xlu1 %v3311_v21 }
 0x67f   : > { %3267 = vadd.xlane.f32.xlu0 %v3244_v41  ;;  %3398 = vadd.xlane.f32.xlu1 %v3375_v48  ;;  %v6305_v48 = vld [vmem:[%s9523_s4 + $0x30] sm:$0xff]  }
 0x683   : > { %3270 = vadd.xlane.f32.xlu1 %v3246_v20 }
 0x6c4   : > { %v3186_v4 = vpop.xlane.xlu0 %3185 }
 0x6c5   : > { %6560 = vrcp.f32 %v3186_v4 }
 0x6c8   : > { %v3250_v11 = vpop.xlane.xlu0 %3249  ;;  %v3189_v2 = vpop.xlane.xlu1 %3188 }
 0x6c9   : > { %6562 = vrcp.f32 %v3250_v11 }
 0x6ca   : > { %6564 = vrcp.f32 %v3189_v2 }
 0x6cc   : > { %v3314_v13 = vpop.xlane.xlu0 %3313  ;;  %v3253_v61 = vpop.xlane.xlu1 %3252 }
 0x6cd   : > { %6566 = vrcp.f32 %v3314_v13 }
 0x6ce   : > { %6568 = vrcp.f32 %v3253_v61 }
 0x6d0   : > { %v3378_v43 = vpop.xlane.xlu0 %3377  ;;  %v3317_v22 = vpop.xlane.xlu1 %3316 }
 0x6d1   : > { %6570 = vrcp.f32 %v3378_v43 }
 0x6d2   : > { %6572 = vrcp.f32 %v3317_v22  ;;  %v6561_v60 = vpop.eup %6560 }
 0x6d3   : > { %v3216_v34 = vsel %vm1062_vm0, %v6561_v60, 0.0 }
 0x6d4   : > { %v3192_v59 = vpop.xlane.xlu0 %3191  ;;  %v3381_v3 = vpop.xlane.xlu1 %3380 }
 0x6d5   : > { %6574 = vrcp.f32 %v3381_v3 }
 0x6d6   : > { %v6563_v9 = vpop.eup %6562  ;;  %6576 = vrcp.f32 %v3192_v59  ;;  %v6307_v59 = vld [vmem:[%s9523_s4 + $0x20] sm:$0xff]  }
 0x6d7   : > { %v6565_v6 = vpop.eup %6564  ;;  %v3280_v17 = vsel %vm1066_vm6, %v6563_v9, %v3216_v34 }
 0x6d8   : > { %v3256_v53 = vpop.xlane.xlu0 %3255  ;;  %v3195_v18 = vpop.xlane.xlu1 %3194  ;;  %v3218_v33 = vsel %vm1062_vm0, %v6565_v6, 0.0  ;;  %v3424_v32 = vmul.f32 %v8044_v0, %v3280_v17  ;;  %v6306_v0 = vld [vmem:[%s9523_s4 + $0x28] sm:$0xff]  }
 0x6d9   : > { %6578 = vrcp.f32 %v3256_v53 }
 0x6da   : > { %v6567_v23 = vpop.eup %6566  ;;  %6580 = vrcp.f32 %v3195_v18 }
 0x6db   : > { %v6569_v19 = vpop.eup %6568  ;;  %v3345_v28 = vsel %vm1075_vm12, %v6567_v23, 0.0 }
 0x6dc   : > { %v3320_v26 = vpop.xlane.xlu0 %3319  ;;  %v3259_v63 = vpop.xlane.xlu1 %3258  ;;  %v3282_v30 = vsel %vm1066_vm6, %v6569_v19, %v3218_v33 }
 0x6dd   : > { %6582 = vrcp.f32 %v3320_v26  ;;  %v3426_v16 = vmul.f32 %v8054_v39, %v3282_v30 }
 0x6de   : > { %v6571_v54 = vpop.eup %6570  ;;  %6584 = vrcp.f32 %v3259_v63 }
 0x6df   : > { %v6573_v46 = vpop.eup %6572  ;;  %v3409_v25 = vsel %vm1079_vm13, %v6571_v54, %v3345_v28  ;;  %v3440_v41 = vpack.c.bf16 %v3426_v16, %v3424_v32  ;;  %v6308_v54 = vld [vmem:[%s9523_s4 + $0x18] sm:$0xff]  }
 0x6e0   : > { %v3384_v27 = vpop.xlane.xlu0 %3383  ;;  %v3323_v37 = vpop.xlane.xlu1 %3322  ;;  %v3347_v45 = vsel %vm1075_vm12, %v6573_v46, 0.0  ;;  %v3425_v38 = vmul.f32 %v8067_v57, %v3409_v25 }
 0x6e1   : > { %6586 = vrcp.f32 %v3384_v27 }
 0x6e2   : > { %v6575_v51 = vpop.eup %6574  ;;  %6588 = vrcp.f32 %v3323_v37 }
 0x6e3   : > { %v3411_v15 = vsel %vm1079_vm13, %v6575_v51, %v3347_v45  ;;  %v6577_v20 = vpop.eup %6576 }
 0x6e4   : > { %v3198_v24 = vpop.xlane.xlu0 %3197  ;;  %v3387_v5 = vpop.xlane.xlu1 %3386  ;;  %v3427_v50 = vmul.f32 %v8080_v42, %v3411_v15  ;;  %v3220_v60 = vsel %vm1062_vm0, %v6577_v20, 0.0 }
 0x6e5   : > { %6590 = vrcp.f32 %v3387_v5 }
 0x6e6   : > { %v3441_v29 = vpack.c.bf16 %v3427_v50, %v3425_v38  ;;  %v6579_v4 = vpop.eup %6578  ;;  %6592 = vrcp.f32 %v3198_v24  ;;  %v6312_v50 = vld [vmem:[%s9523_s4] sm:$0xff]  }
 0x6e7   : > { %v6581_v39 = vpop.eup %6580  ;;  %v3284_v26 = vsel %vm1066_vm6, %v6579_v4, %v3220_v60 }
 0x6e8   : > { %v3262_v36 = vpop.xlane.xlu0 %3261  ;;  %v3201_v21 = vpop.xlane.xlu1 %3200  ;;  %3480 = vmatprep.mubr.bf16.mxu0 %v3441_v29  ;;  %v3222_v22 = vsel %vm1062_vm0, %v6581_v39, 0.0  ;;  %v3428_v27 = vmul.f32 %v8093_v35, %v3284_v26  ;;  %v6310_v35 = vld [vmem:[%s9523_s4 + $0x8] sm:$0xff]  }
 0x6e9   : > { %3481 = vmatmul.mubr.bf16.vlgmr.msra.gmra.mxu0 %v3440_v41  ;;  %6594 = vrcp.f32 %v3262_v36 }
 0x6ea   : > { %6183 = vmatpush3.bf16.msra.mxu0 %v8230_v10  ;;  %v6583_v11 = vpop.eup %6582  ;;  %6596 = vrcp.f32 %v3201_v21 }
 0x6eb   : > { %6184 = vmatprep.subr.bf16.mxu0 %v6305_v48  ;;  %v6585_v2 = vpop.eup %6584  ;;  %v3349_v3 = vsel %vm1075_vm12, %v6583_v11, 0.0 }
 0x6ec   : > { %v3326_v57 = vpop.xlane.xlu0 %3325  ;;  %v3265_v42 = vpop.xlane.xlu1 %3264  ;;  %v3286_v53 = vsel %vm1066_vm6, %v6585_v2, %v3222_v22 }
 0x6ed   : > { %6598 = vrcp.f32 %v3326_v57  ;;  %v3430_v19 = vmul.f32 %v8106_v40, %v3286_v53  ;;  %v6309_v40 = vld [vmem:[%s9523_s4 + $0x10] sm:$0xff]  }
 0x6ee   : > { %v6587_v13 = vpop.eup %6586  ;;  %6185 = vmatpush3.bf16.msra.mxu0 %v6305_v48  ;;  %6600 = vrcp.f32 %v3265_v42 }
 0x6ef   : > { %v6589_v61 = vpop.eup %6588  ;;  %6186 = vmatprep.subr.bf16.mxu0 %v6306_v0  ;;  %v3413_v18 = vsel %vm1079_vm13, %v6587_v13, %v3349_v3  ;;  %v3442_v28 = vpack.c.bf16 %v3430_v19, %v3428_v27 }
 0x6f0   : > { %v3390_v43 = vpop.xlane.xlu0 %3389  ;;  %v3329_v10 = vpop.xlane.xlu1 %3328  ;;  %v3351_v6 = vsel %vm1075_vm12, %v6589_v61, 0.0  ;;  %v3429_v46 = vmul.f32 %v8119_v7, %v3413_v18 }
 0x6f1   : > { %6602 = vrcp.f32 %v3390_v43 }
 0x6f2   : > { %6604 = vrcp.f32 %v3329_v10  ;;  %v6591_v9 = vpop.eup %6590  ;;  %6187 = vmatpush3.bf16.msra.mxu0 %v6306_v0 }
 0x6f3   : > { %v3415_v23 = vsel %vm1079_vm13, %v6591_v9, %v3351_v6  ;;  %6188 = vmatprep.subr.bf16.mxu0 %v6307_v59  ;;  %v6593_v30 = vpop.eup %6592 }
 0x6f4   : > { %v3393_v63 = vpop.xlane.xlu1 %3392  ;;  %v3431_v33 = vmul.f32 %v8132_v44, %v3415_v23  ;;  %v3224_v29 = vsel %vm1062_vm0, %v6593_v30, 0.0 }
 0x6f5   : > { %6606 = vrcp.f32 %v3393_v63 }
 0x6f6   : > { %v3443_v37 = vpack.c.bf16 %v3431_v33, %v3429_v46  ;;  %6189 = vmatpush3.bf16.msra.mxu0 %v6307_v59  ;;  %v6595_v34 = vpop.eup %6594 }
 0x6f7   : > { %6190 = vmatprep.subr.bf16.mxu0 %v6308_v54  ;;  %v6597_v25 = vpop.eup %6596  ;;  %v3288_v41 = vsel %vm1066_vm6, %v6595_v34, %v3224_v29 }
 0x6f8   : > { %3488 = vmatprep.mubr.bf16.mxu0 %v3443_v37  ;;  %v3226_v24 = vsel %vm1062_vm0, %v6597_v25, 0.0  ;;  %v3432_v0 = vmul.f32 %v8140_v58, %v3288_v41  ;;  %v6314_v37 = vld [vmem:[#allocation2 + $0x10] sm:$0xff]  }
 0x6f9   : > { %3489 = vmatmul.mubr.bf16.gmra.mxu0 %v3442_v28  ;;  %v6315_v28 = vld [vmem:[#allocation2 + $0x18] sm:$0xff]  }
 0x6fa   : > { %6191 = vmatpush3.bf16.msra.mxu0 %v6308_v54  ;;  %v6599_v51 = vpop.eup %6598 }
 0x6fb   : > { %6192 = vmatprep.subr.bf16.mxu0 %v6309_v40  ;;  %v6601_v44 = vpop.eup %6600  ;;  %v3353_v16 = vsel %vm1075_vm12, %v6599_v51, 0.0 }
 0x6fc   : > { %v3204_v7 = vpop.xlane.xlu0 %3203  ;;  %v3290_v38 = vsel %vm1066_vm6, %v6601_v44, %v3226_v24 }
 0x6fd   : > { %v3434_v20 = vmul.f32 %v8152_v49, %v3290_v38  ;;  %6608 = vrcp.f32 %v3204_v7 }
 0x6fe   : > { %v6603_v45 = vpop.eup %6602  ;;  %6193 = vmatpush3.bf16.msra.mxu0 %v6309_v40 }
 0x6ff   : > { %v6605_v17 = vpop.eup %6604  ;;  %6194 = vmatprep.subr.bf16.mxu0 %v6310_v35  ;;  %v3417_v32 = vsel %vm1079_vm13, %v6603_v45, %v3353_v16  ;;  %v3444_v2 = vpack.c.bf16 %v3434_v20, %v3432_v0 }
 0x700   : > { %v3332_v5 = vpop.xlane.xlu0 %3331  ;;  %v3207_v15 = vpop.xlane.xlu1 %3206  ;;  %v3355_v21 = vsel %vm1075_vm12, %v6605_v17, 0.0  ;;  %v3433_v57 = vmul.f32 %v8170_v12, %v3417_v32 }
 0x701   : > { %6610 = vrcp.f32 %v3332_v5 }
 0x702   : > { %v6607_v36 = vpop.eup %6606  ;;  %6195 = vmatpush3.bf16.msra.mxu0 %v6310_v35 }
 0x703   : > { %v3419_v48 = vsel %vm1079_vm13, %v6607_v36, %v3355_v21  ;;  %6196 = vmatprep.subr.bf16.mxu0 %v6312_v50 }
 0x704   : > { %v3396_v4 = vpop.xlane.xlu0 %3395  ;;  %v3335_v39 = vpop.xlane.xlu1 %3334  ;;  %v3435_v42 = vmul.f32 %v8184_v31, %v3419_v48 }
 0x705   : > { %6612 = vrcp.f32 %v3396_v4 }
 0x706   : > { %v3445_v11 = vpack.c.bf16 %v3435_v42, %v3433_v57  ;;  %6614 = vrcp.f32 %v3335_v39  ;;  %6197 = vmatpush3.bf16.msra.mxu0 %v6312_v50 }
 0x707   : > { %6616 = vrcp.f32 %v3207_v15 }
 0x708   : > { %v3268_v13 = vpop.xlane.xlu0 %3267  ;;  %3496 = vmatprep.mubr.bf16.mxu0 %v3445_v11  ;;  %v3399_v49 = vpop.xlane.xlu1 %3398 }
 0x709   : > { %6618 = vrcp.f32 %v3268_v13  ;;  %3497 = vmatmul.mubr.bf16.gmra.mxu0 %v3444_v2  ;;  %v8338_v2 = vld [vmem:[%s9524_s5] ss:$0 sm:$0xff] }
 0x70a   : > { %6620 = vrcp.f32 %v3399_v49  ;;  %v6609_v12 = vpop.eup %6608 }
 0x70b   : > { %v3228_v9 = vsel %vm1062_vm0, %v6609_v12, 0.0 }
 0x70c   : > { %v3271_v61 = vpop.xlane.xlu1 %3270 }
 0x70d   : > { %6622 = vrcp.f32 %v3271_v61 }
 0x70e   : > { %v6611_v31 = vpop.eup %6610 }
 0x70f   : > { %v3357_v58 = vsel %vm1075_vm12, %v6611_v31, 0.0  ;;  %v6784_v31 = vld [vmem:[%s6983_s19] sm:$0xff] }
 0x712   : > { %v6613_v43 = vpop.eup %6612 }
 0x713   : > { %v6615_v10 = vpop.eup %6614  ;;  %v3421_v3 = vsel %vm1079_vm13, %v6613_v43, %v3357_v58 }
 0x714   : > { %v6617_v22 = vpop.eup %6616  ;;  %v3359_v18 = vsel %vm1075_vm12, %v6615_v10, 0.0  ;;  %v3437_v6 = vmul.f32 %v8197_v47, %v3421_v3  ;;  %v6311_v47 = vld [vmem:[#allocation2] sm:$0xff]  }
 0x715   : > { %v3230_v19 = vsel %vm1062_vm0, %v6617_v22, 0.0 }
 0x716   : > { %v6619_v59 = vpop.eup %6618 }
 0x717   : > { %v6621_v53 = vpop.eup %6620  ;;  %v3292_v63 = vsel %vm1066_vm6, %v6619_v59, %v3228_v9  ;;  %v6785_v59 = vld [vmem:[%s6983_s19 + $0x10] sm:$0xff] }
 0x718   : > { %v3423_v60 = vsel %vm1079_vm13, %v6621_v53, %v3359_v18  ;;  %v3436_v14 = vmul.f32 %v8195_v55, %v3292_v63  ;;  %v6786_v18 = vld [vmem:[%s6983_s19 + $0x8] sm:$0xff] }
 0x719   : > { %v3439_v26 = vmul.f32 %v8210_v62, %v3423_v60  ;;  %v6313_v62 = vld [vmem:[#allocation2 + $0x8] sm:$0xff]  }
 0x71a   : > { %v6623_v23 = vpop.eup %6622 }
 0x71b   : > { %v3447_v54 = vpack.c.bf16 %v3439_v26, %v3437_v6  ;;  %v3294_v46 = vsel %vm1066_vm6, %v6623_v23, %v3230_v19  ;;  %v6787_v23 = vld [vmem:[%s6983_s19 + $0x18] sm:$0xff] }
 0x71c   : > { %v3438_v33 = vmul.f32 %v8202_v52, %v3294_v46  ;;  %v6788_v46 = vld [vmem:[%s6983_s19 + $0x20] sm:$0xff] }
 0x71d   : > { %3504 = vmatprep.mubr.bf16.mxu0 %v3447_v54 }
 0x71e   : > { %v3446_v27 = vpack.c.bf16 %v3438_v33, %v3436_v14 }
 0x720   : > { %3505 = vmatmul.mubr.bf16.gmra.mxu0 %v3446_v27 }
 0x721   : > { %6198 = vmatprep.mubr.bf16.mxu0 %v6311_v47  ;;  %v6789_v47 = vld [vmem:[%s6983_s19 + $0x30] sm:$0xff] }
 0x728   : > { %6199 = vmatmul.mubr.bf16.vlgmr.msra.gmra.mxu0 %v6313_v62 }
 0x729   : > { %6202 = vmatprep.mubr.bf16.mxu0 %v6314_v37 }
 0x730   : > { %6203 = vmatmul.mubr.bf16.gmra.mxu0 %v6315_v28  ;;  %v6790_v28 = vld [vmem:[%s6983_s19 + $0x28] sm:$0xff] }
 0x7a9   : > { %v5982_v40 = vpop.f32.mrf.mxu0 }
 0x7ab   : > { %v5983_v30 = vpop.f32.mrf.mxu0 }
 0x7ac   : > { %v5984_v25 = vadd.f32 %v5983_v30, %v5982_v40  ;;  %v6791_v30 = vld [vmem:[%s6983_s19 + $0x38] sm:$0xff] }
 0x7ad   : > { %v5985_v34 = vpop.f32.mrf.mxu0 }
 0x7af   : > { %v5986_v1 = vpop.f32.mrf.mxu0 }
 0x7b0   : > { %v5987_v51 = vadd.f32 %v5986_v1, %v5985_v34 }
 0x7b2   : > { %v5838_v55 = vpack.c.bf16 %v5987_v51, %v5984_v25 }
 0x7b4   : > { %5858 = vst [vmem:[#allocation2 + $0x20] sm:$0xff] %v5838_v55  }
 0x7b9   : > { %v5988_v52 = vpop.f32.mrf.mxu0 }
 0x7bb   : > { %v5989_v7 = vpop.f32.mrf.mxu0  ;;  %v6316_v35 = vld [vmem:[#allocation2 + $0x20] sm:$0xff]  }
 0x7bc   : > { %6206 = vmatprep.mubr.bf16.mxu0 %v6316_v35  ;;  %v5990_v17 = vadd.f32 %v5989_v7, %v5988_v52  ;;  %v6792_v7 = vld [vmem:[%s6983_s19 + $0x40] sm:$0xff] }
 0x7bd   : > { %v5991_v44 = vpop.f32.mrf.mxu0 }
 0x7bf   : > { %v5992_v45 = vpop.f32.mrf.mxu0 }
 0x7c0   : > { %v5993_v24 = vadd.f32 %v5992_v45, %v5991_v44 }
 0x7c2   : > { %v5843_v5 = vpack.c.bf16 %v5993_v24, %v5990_v17  ;;  %v6793_v17 = vld [vmem:[%s6983_s19 + $0x50] sm:$0xff] }
 0x7c4   : > { %5859 = vst [vmem:[#allocation2 + $0x28] sm:$0xff] %v5843_v5  }
 0x7c9   : > { %v5994_v15 = vpop.f32.mrf.mxu0 }
 0x7cb   : > { %v5995_v16 = vpop.f32.mrf.mxu0  ;;  %v6317_v38 = vld [vmem:[#allocation2 + $0x28] sm:$0xff]  }
 0x7cc   : > { %6207 = vmatmul.mubr.bf16.gmra.mxu0 %v6317_v38  ;;  %v5996_v29 = vadd.f32 %v5995_v16, %v5994_v15  ;;  %v6794_v15 = vld [vmem:[%s6983_s19 + $0x48] sm:$0xff]  ;;  %v6795_v38 = vld [vmem:[%s6983_s19 + $0x58] sm:$0xff] }
 0x7cd   : > { %v5997_v50 = vpop.f32.mrf.mxu0 }
 0x7cf   : > { %v5998_v32 = vpop.f32.mrf.mxu0 }
 0x7d0   : > { %v5999_v36 = vadd.f32 %v5998_v32, %v5997_v50 }
 0x7d2   : > { %v5848_v21 = vpack.c.bf16 %v5999_v36, %v5996_v29 }
 0x7d4   : > { %5860 = vst [vmem:[#allocation2 + $0x30] sm:$0xff] %v5848_v21  }
 0x7db   : > { %v6318_v41 = vld [vmem:[#allocation2 + $0x30] sm:$0xff]  }
 0x7dc   : > { %6210 = vmatprep.mubr.bf16.mxu0 %v6318_v41 }
 0x7e0   : > { %v6000_v48 = vpop.f32.mrf.mxu0 }
 0x7e2   : > { %v6001_v20 = vpop.f32.mrf.mxu0 }
 0x7e3   : > { %v6002_v57 = vadd.f32 %v6001_v20, %v6000_v48 }
 0x7e4   : > { %v6003_v4 = vpop.f32.mrf.mxu0 }
 0x7e6   : > { %v6004_v39 = vpop.f32.mrf.mxu0 }
 0x7e7   : > { %v6005_v42 = vadd.f32 %v6004_v39, %v6003_v4 }
 0x7e8   : > { %v6200_v0 = vpop.f32.mrf.mxu0 }
 0x7e9   : > { %v5853_v11 = vpack.c.bf16 %v6005_v42, %v6002_v57  ;;  %v3731_v12 = vadd.f32 %v6200_v0, %v8338_v2  ;;  %v6796_v57 = vld [vmem:[%s6983_s19 + $0x60] sm:$0xff] }
 0x7ea   : > { %v3722_v13 = vpop.f32.mrf.mxu0 }
 0x7eb   : > { %5861 = vst [vmem:[#allocation2 + $0x38] sm:$0xff] %v5853_v11   ;;  %v3723_v49 = vadd.f32 %v8338_v2, %v3722_v13  ;;  %v8348_v3 = vadd.f32 %v6785_v59, %v3731_v12  ;;  %v6798_v59 = vld [vmem:[%s6983_s19 + $0x68] sm:$0xff] }
 0x7ec   : > { %v6201_v61 = vpop.f32.mrf.mxu0 }
 0x7ed   : > { %v8343_v43 = vadd.f32 %v6784_v31, %v3723_v49  ;;  %9588 = vst [vmem:[#allocation7_spill] sm:$0xff] %v8348_v3  ;;  %v3734_v53 = vadd.f32 %v6201_v61, %v8338_v2 }
 0x7ee   : > { %v3725_v10 = vpop.f32.mrf.mxu0 }
 0x7ef   : > { %9587 = vst [vmem:[#allocation6_spill] sm:$0xff] %v8343_v43  ;;  %v3726_v22 = vadd.f32 %v8338_v2, %v3725_v10  ;;  %3803 = vadd.xlane.f32.xlu0 %v8343_v43  ;;  %v8358_v19 = vadd.f32 %v6787_v23, %v3734_v53  ;;  %v6797_v10 = vld [vmem:[%s6983_s19 + $0x70] sm:$0xff]  ;;  %v6799_v23 = vld [vmem:[%s6983_s19 + $0x78] sm:$0xff]  ;;  %s6804_s19 = sshll.u32 %s6863_s16, 4  ;;  %s6805_s19 = int_to_ptr.vmem [resolvable:$false] %s6804_s19 }
 0x7f0   : > { %v6204_v58 = vpop.f32.mrf.mxu0  ;;  %s6806_s17 = scalar_lea.vmem %s6805_s19, 4096  ;;  %p6807_p0 = scmp.lt.s32.totalorder %s9473_s18, %s6805_s19 }
 0x7f1   : > { %v8352_v60 = vadd.f32 %v6786_v18, %v3726_v22  ;;  %9590 = vst [vmem:[#allocation9_spill] sm:$0xff] %v8358_v19  ;;  %v3747_v54 = vadd.f32 %v6204_v58, %v8338_v2  ;;  %p6808_p1 = scmp.lt.s32.totalorder %s6806_s17, %s6800_s25 }
 0x7f2   : > { %v3738_v9 = vpop.f32.mrf.mxu0  ;;  %v6319_v6 = vld [vmem:[#allocation2 + $0x38] sm:$0xff]  }
 0x7f3   : > { %9589 = vst [vmem:[#allocation8_spill] sm:$0xff] %v8352_v60  ;;  %v3739_v26 = vadd.f32 %v8338_v2, %v3738_v9  ;;  %3805 = vadd.xlane.f32.xlu1 %v8352_v60  ;;  %3807 = vadd.xlane.f32.xlu0 %v8348_v3  ;;  %v8369_v62 = vadd.f32 %v6789_v47, %v3747_v54  ;;  %p6809_p2 = por %p6808_p1, %p6807_p0 }
 0x7f4   : > { %v6205_v63 = vpop.f32.mrf.mxu0  ;;  %6211 = vmatmul.mubr.bf16.gmra.mxu0 %v6319_v6 }
 0x7f5   : > { %v8362_v14 = vadd.f32 %v6788_v46, %v3739_v26  ;;  %4390 = vmatprep.mubr.bf16.mxu0 %v6862_v8  ;;  %9592 = vst [vmem:[#allocation11_spill] sm:$0xff] %v8369_v62  ;;  %v3750_v37 = vadd.f32 %v6205_v63, %v8338_v2  ;;  %p6810_p3 = pnand %p6809_p2, %p6803_p13 }
 0x7f6   : > { %v3741_v33 = vpop.f32.mrf.mxu0 }
 0x7f7   : > { %9591 = vst [vmem:[#allocation10_spill] sm:$0xff] %v8362_v14  ;;  %v3742_v27 = vadd.f32 %v8338_v2, %v3741_v33  ;;  %3809 = vadd.xlane.f32.xlu1 %v8358_v19  ;;  %3811 = vadd.xlane.f32.xlu0 %v8362_v14  ;;  %v8378_v34 = vadd.f32 %v6791_v30, %v3750_v37 }
 0x7f9   : > { %v8373_v40 = vadd.f32 %v6790_v28, %v3742_v27  ;;  %9594 = vst [vmem:[#allocation13_spill] sm:$0xff] %v8378_v34 }
 0x7fb   : > { %9593 = vst [vmem:[#allocation12_spill] sm:$0xff] %v8373_v40  ;;  %3813 = vadd.xlane.f32.xlu1 %v8373_v40  ;;  %3815 = vadd.xlane.f32.xlu0 %v8369_v62 }
 0x7ff   : > { %3817 = vadd.xlane.f32.xlu1 %v8378_v34 }
 0x878   : > { %v3804_v32 = vpop.xlane.xlu0 %3803 }
 0x879   : > { %v3835_v20 = vmul.f32 0.0078125, %v3804_v32 }
 0x87b   : > { %v8409_v49 = vsub.f32 %v8343_v43, %v3835_v20  ;;  %v6334_v20 = vld [vmem:[%s9527_s8 + $0xa4] ss:$16 sps:$4 sm:$0xff]  }
 0x87c   : > { %v3806_v29 = vpop.xlane.xlu1 %3805  ;;  %v3808_v21 = vpop.xlane.xlu0 %3807 }
 0x87d   : > { %v3836_v61 = vmul.f32 0.0078125, %v3806_v29  ;;  %v3837_v31 = vmul.f32 0.0078125, %v3808_v21  ;;  %v6328_v29 = vld [vmem:[%s9527_s8 + $0xc4] ss:$16 sps:$4 sm:$0xff]   ;;  %v6326_v21 = vld [vmem:[%s9527_s8 + $0xc0] ss:$16 sps:$4 sm:$0xff]  }
 0x87f   : > { %v8421_v18 = vsub.f32 %v8352_v60, %v3836_v61  ;;  %v8424_v26 = vsub.f32 %v8348_v3, %v3837_v31  ;;  %v6341_v61 = vld [vmem:[%s9527_s8 + $0x88] ss:$16 sps:$4 sm:$0xff]   ;;  %v6349_v31 = vld [vmem:[%s9527_s8 + $0x6c] ss:$16 sps:$4 sm:$0xff]  }
 0x880   : > { %v3810_v0 = vpop.xlane.xlu1 %3809  ;;  %v3812_v12 = vpop.xlane.xlu0 %3811 }
 0x881   : > { %v3838_v9 = vmul.f32 0.0078125, %v3810_v0  ;;  %v3839_v63 = vmul.f32 0.0078125, %v3812_v12  ;;  %v3868_v27 = vmul.f32 %v8421_v18, %v8421_v18  ;;  %v3869_v30 = vmul.f32 %v8424_v26, %v8424_v26  ;;  %v6340_v0 = vld [vmem:[%s9527_s8 + $0x84] ss:$16 sps:$4 sm:$0xff]  }
 0x882   : > { %v6346_v12 = vld [vmem:[%s9527_s8 + $0x64] ss:$16 sps:$4 sm:$0xff]  }
 0x883   : > { %v8433_v33 = vsub.f32 %v8358_v19, %v3838_v9  ;;  %v8438_v47 = vsub.f32 %v8362_v14, %v3839_v63  ;;  %v6355_v9 = vld [vmem:[%s9527_s8 + $0x4c] ss:$16 sps:$4 sm:$0xff]   ;;  %v6353_v63 = vld [vmem:[%s9527_s8 + $0x48] ss:$16 sps:$4 sm:$0xff]  }
 0x884   : > { %v3814_v6 = vpop.xlane.xlu1 %3813  ;;  %v3816_v46 = vpop.xlane.xlu0 %3815 }
 0x885   : > { %v3840_v37 = vmul.f32 0.0078125, %v3814_v6  ;;  %v3841_v28 = vmul.f32 0.0078125, %v3816_v46  ;;  %v6350_v6 = vld [vmem:[%s9527_s8 + $0x40] ss:$16 sps:$4 sm:$0xff]  }
 0x886   : > { %v6356_v46 = vld [vmem:[%s9527_s8 + $0x20] ss:$16 sps:$4 sm:$0xff]  }
 0x88c   : > { %v6208_v1 = vpop.f32.mrf.mxu0 }
 0x88d   : > { %v3763_v52 = vadd.f32 %v6208_v1, %v8338_v2  ;;  %v3818_v1 = vpop.xlane.xlu1 %3817 }
 0x88e   : > { %v3754_v25 = vpop.f32.mrf.mxu0 }
 0x88f   : > { %v3755_v51 = vadd.f32 %v8338_v2, %v3754_v25  ;;  %v8389_v24 = vadd.f32 %v6793_v17, %v3763_v52  ;;  %v3870_v25 = vmul.f32 %v8433_v33, %v8433_v33  ;;  %v3842_v52 = vmul.f32 0.0078125, %v3818_v1  ;;  %v6320_v17 = vld [vmem:[%s9527_s8 + $0xe0] ss:$16 sps:$4 sm:$0xff]   ;;  %v6365_v1 = vld [vmem:[%s9527_s8 + $0x8] ss:$16 sps:$4 sm:$0xff]  }
 0x890   : > { %v6209_v55 = vpop.f32.mrf.mxu0 }
 0x891   : > { %v8384_v35 = vadd.f32 %v6792_v7, %v3755_v51  ;;  %9596 = vst [vmem:[#allocation15_spill] sm:$0xff] %v8389_v24  ;;  %v3766_v5 = vadd.f32 %v6209_v55, %v8338_v2  ;;  %v8445_v51 = vsub.f32 %v8373_v40, %v3840_v37  ;;  %v8448_v55 = vsub.f32 %v8369_v62, %v3841_v28  ;;  %v6364_v37 = vld [vmem:[%s9527_s8 + $0x4] ss:$16 sps:$4 sm:$0xff]   ;;  %v6367_v28 = vld [vmem:[%s9527_s8 + $0xc] ss:$16 sps:$4 sm:$0xff]  }
 0x892   : > { %v3757_v44 = vpop.f32.mrf.mxu0  ;;  %v3871_v7 = vmul.f32 %v8438_v47, %v8438_v47 }
 0x893   : > { %9595 = vst [vmem:[#allocation14_spill] sm:$0xff] %v8384_v35  ;;  %v3758_v45 = vadd.f32 %v8338_v2, %v3757_v44  ;;  %3819 = vadd.xlane.f32.xlu0 %v8384_v35  ;;  %v8398_v50 = vadd.f32 %v6795_v38, %v3766_v5  ;;  %v6322_v44 = vld [vmem:[%s9527_s8 + $0xe4] ss:$16 sps:$4 sm:$0xff]   ;;  %v6323_v5 = vld [vmem:[%s9527_s8 + $0xe8] ss:$16 sps:$4 sm:$0xff]   ;;  %v3872_v38 = vmul.f32 %v8445_v51, %v8445_v51 }
 0x894   : > { %4245 = vmatprep.subr.bf16.mxu1 %v6322_v44  ;;  %v3873_v32 = vmul.f32 %v8448_v55, %v8448_v55 }
 0x895   : > { %v8393_v16 = vadd.f32 %v6794_v15, %v3758_v45  ;;  %9598 = vst [vmem:[#allocation17_spill] sm:$0xff] %v8398_v50  ;;  %v6325_v45 = vld [vmem:[%s9527_s8 + $0xec] ss:$16 sps:$4 sm:$0xff]   ;;  %v8465_v15 = vsub.f32 %v8378_v34, %v3842_v52  ;;  %4246 = vmatpush1.bf16.msra.mxu1 %v6320_v17 }
 0x896   : > { %4358 = vmatprep.subr.bf16.mxu0 %v6325_v45  ;;  %4247 = vmatprep.subr.bf16.mxu1 %v6328_v29 }
 0x897   : > { %9597 = vst [vmem:[#allocation16_spill] sm:$0xff] %v8393_v16  ;;  %3821 = vadd.xlane.f32.xlu1 %v8393_v16  ;;  %3823 = vadd.xlane.f32.xlu0 %v8389_v24 }
 0x898   : > { %4359 = vmatpush1.bf16.msra.mxu0 %v6323_v5 }
 0x899   : > { %4248 = vmatpush1.bf16.msra.mxu1 %v6326_v21 }
 0x89a   : > { %4249 = vmatprep.subr.bf16.mxu1 %v6334_v20 }
 0x89b   : > { %3825 = vadd.xlane.f32.xlu1 %v8398_v50 }
 0x8b4   : > { %v6212_v36 = vpop.f32.mrf.mxu0 }
 0x8b5   : > { %v3779_v39 = vadd.f32 %v6212_v36, %v8338_v2  ;;  %v6331_v36 = vld [vmem:[%s9527_s8 + $0xcc] ss:$16 sps:$4 sm:$0xff]  }
 0x8b6   : > { %v3770_v41 = vpop.f32.mrf.mxu0  ;;  %4360 = vmatprep.subr.bf16.mxu0 %v6331_v36 }
 0x8b7   : > { %v3771_v48 = vadd.f32 %v8338_v2, %v3770_v41  ;;  %v8412_v22 = vadd.f32 %v6797_v10, %v3779_v39  ;;  %v6329_v41 = vld [vmem:[%s9527_s8 + $0xc8] ss:$16 sps:$4 sm:$0xff]   ;;  %v6332_v39 = vld [vmem:[%s9527_s8 + $0xa0] ss:$16 sps:$4 sm:$0xff]  }
 0x8b8   : > { %v6213_v4 = vpop.f32.mrf.mxu0  ;;  %4361 = vmatpush1.bf16.msra.mxu0 %v6329_v41  ;;  %4250 = vmatpush1.bf16.msra.mxu1 %v6332_v39  ;;  %v6344_v10 = vld [vmem:[%s9527_s8 + $0x60] ss:$16 sps:$4 sm:$0xff]  }
 0x8b9   : > { %v8404_v42 = vadd.f32 %v6796_v57, %v3771_v48  ;;  %9600 = vst [vmem:[#allocation19_spill] sm:$0xff] %v8412_v22  ;;  %v3782_v58 = vadd.f32 %v6213_v4, %v8338_v2  ;;  %v3874_v48 = vmul.f32 %v8465_v15, %v8465_v15  ;;  %v6337_v4 = vld [vmem:[%s9527_s8 + $0xac] ss:$16 sps:$4 sm:$0xff]   ;;  %v6335_v57 = vld [vmem:[%s9527_s8 + $0xa8] ss:$16 sps:$4 sm:$0xff]   ;;  %4251 = vmatprep.subr.bf16.mxu1 %v6340_v0 }
 0x8ba   : > { %v3773_v11 = vpop.f32.mrf.mxu0  ;;  %4362 = vmatprep.subr.bf16.mxu0 %v6337_v4 }
 0x8bb   : > { %9599 = vst [vmem:[#allocation18_spill] sm:$0xff] %v8404_v42  ;;  %v3774_v13 = vadd.f32 %v8338_v2, %v3773_v11  ;;  %3827 = vadd.xlane.f32.xlu0 %v8404_v42  ;;  %v8427_v54 = vadd.f32 %v6799_v23, %v3782_v58  ;;  %v3867_v2 = vmul.f32 %v8409_v49, %v8409_v49  ;;  %v6343_v11 = vld [vmem:[%s9527_s8 + $0x8c] ss:$16 sps:$4 sm:$0xff]   ;;  %v6347_v58 = vld [vmem:[%s9527_s8 + $0x68] ss:$16 sps:$4 sm:$0xff]  }
 0x8bc   : > { %4363 = vmatpush1.bf16.msra.mxu0 %v6335_v57  ;;  %v6358_v23 = vld [vmem:[%s9527_s8 + $0x24] ss:$16 sps:$4 sm:$0xff]  }
 0x8bd   : > { %v8416_v53 = vadd.f32 %v6798_v59, %v3774_v13  ;;  %9602 = vst [vmem:[#allocation21_spill] sm:$0xff] %v8427_v54  ;;  %v6338_v13 = vld [vmem:[%s9527_s8 + $0x80] ss:$16 sps:$4 sm:$0xff]   ;;  %4364 = vmatprep.subr.bf16.mxu0 %v6343_v11  ;;  %v6352_v59 = vld [vmem:[%s9527_s8 + $0x44] ss:$16 sps:$4 sm:$0xff]  }
 0x8be   : > { %4252 = vmatpush1.bf16.msra.mxu1 %v6338_v13 }
 0x8bf   : > { %9601 = vst [vmem:[#allocation20_spill] sm:$0xff] %v8416_v53  ;;  %3829 = vadd.xlane.f32.xlu1 %v8416_v53  ;;  %3831 = vadd.xlane.f32.xlu0 %v8412_v22 }
 0x8c0   : > { %4365 = vmatpush1.bf16.msra.mxu0 %v6341_v61  ;;  %4253 = vmatprep.subr.bf16.mxu1 %v6346_v12 }
 0x8c1   : > { %4366 = vmatprep.subr.bf16.mxu0 %v6349_v31 }
 0x8c2   : > { %4254 = vmatpush1.bf16.msra.mxu1 %v6344_v10 }
 0x8c3   : > { %3833 = vadd.xlane.f32.xlu1 %v8427_v54  ;;  %3883 = vadd.xlane.f32.xlu0 %v3867_v2  ;;  %v6361_v2 = vld [vmem:[%s9527_s8 + $0x2c] ss:$16 sps:$4 sm:$0xff]  }
 0x8c4   : > { %4367 = vmatpush1.bf16.msra.mxu0 %v6347_v58  ;;  %4255 = vmatprep.subr.bf16.mxu1 %v6352_v59 }
 0x8c5   : > { %4368 = vmatprep.subr.bf16.mxu0 %v6355_v9 }
 0x8c6   : > { %4256 = vmatpush1.bf16.msra.mxu1 %v6350_v6 }
 0x8c7   : > { %3885 = vadd.xlane.f32.xlu1 %v3868_v27  ;;  %3887 = vadd.xlane.f32.xlu0 %v3869_v30  ;;  %v6359_v27 = vld [vmem:[%s9527_s8 + $0x28] ss:$16 sps:$4 sm:$0xff]   ;;  %v6362_v30 = vld [vmem:[%s9527_s8] ss:$16 sps:$4 sm:$0xff]  }
 0x8c8   : > { %4369 = vmatpush1.bf16.msra.mxu0 %v6353_v63  ;;  %4257 = vmatprep.subr.bf16.mxu1 %v6358_v23 }
 0x8c9   : > { %4370 = vmatprep.subr.bf16.mxu0 %v6361_v2 }
 0x8ca   : > { %4258 = vmatpush1.bf16.msra.mxu1 %v6356_v46 }
 0x8cb   : > { %3889 = vadd.xlane.f32.xlu1 %v3870_v25  ;;  %3891 = vadd.xlane.f32.xlu0 %v3871_v7 }
 0x8cc   : > { %4371 = vmatpush1.bf16.msra.mxu0 %v6359_v27  ;;  %4259 = vmatprep.subr.bf16.mxu1 %v6364_v37 }
 0x8cd   : > { %4372 = vmatprep.subr.bf16.mxu0 %v6367_v28 }
 0x8ce   : > { %4260 = vmatpush1.bf16.msra.mxu1 %v6362_v30 }
 0x8cf   : > { %3893 = vadd.xlane.f32.xlu1 %v3872_v38  ;;  %3895 = vadd.xlane.f32.xlu0 %v3873_v32 }
 0x8d0   : > { %4373 = vmatpush1.bf16.msra.mxu0 %v6365_v1 }
 0x8d3   : > { %3897 = vadd.xlane.f32.xlu1 %v3874_v48 }
 0x91c   : > { %v3820_v25 = vpop.xlane.xlu0 %3819 }
 0x91d   : > { %v3843_v52 = vmul.f32 0.0078125, %v3820_v25 }
 0x91f   : > { %v8558_v7 = vsub.f32 %v8384_v35, %v3843_v52 }
 0x920   : > { %v3822_v44 = vpop.xlane.xlu1 %3821  ;;  %v3824_v45 = vpop.xlane.xlu0 %3823 }
 0x921   : > { %v3844_v17 = vmul.f32 0.0078125, %v3822_v44  ;;  %v3845_v5 = vmul.f32 0.0078125, %v3824_v45  ;;  %v3875_v38 = vmul.f32 %v8558_v7, %v8558_v7 }
 0x923   : > { %v8563_v32 = vsub.f32 %v8393_v16, %v3844_v17  ;;  %v8566_v29 = vsub.f32 %v8389_v24, %v3845_v5  ;;  %3899 = vadd.xlane.f32.xlu0 %v3875_v38 }
 0x924   : > { %v3826_v36 = vpop.xlane.xlu1 %3825 }
 0x925   : > { %v3846_v21 = vmul.f32 0.0078125, %v3826_v36  ;;  %v3876_v41 = vmul.f32 %v8563_v32, %v8563_v32  ;;  %v3877_v48 = vmul.f32 %v8566_v29, %v8566_v29 }
 0x927   : > { %v8573_v20 = vsub.f32 %v8398_v50, %v3846_v21  ;;  %3901 = vadd.xlane.f32.xlu1 %v3876_v41  ;;  %3903 = vadd.xlane.f32.xlu0 %v3877_v48 }
 0x929   : > { %v3878_v4 = vmul.f32 %v8573_v20, %v8573_v20 }
 0x92b   : > { %3905 = vadd.xlane.f32.xlu1 %v3878_v4 }
 0x944   : > { %v3828_v39 = vpop.xlane.xlu0 %3827 }
 0x945   : > { %v3847_v57 = vmul.f32 0.0078125, %v3828_v39 }
 0x947   : > { %v8578_v0 = vsub.f32 %v8404_v42, %v3847_v57 }
 0x948   : > { %v3830_v11 = vpop.xlane.xlu1 %3829  ;;  %v3832_v13 = vpop.xlane.xlu0 %3831 }
 0x949   : > { %v3848_v61 = vmul.f32 0.0078125, %v3830_v11  ;;  %v3849_v12 = vmul.f32 0.0078125, %v3832_v13  ;;  %v3879_v31 = vmul.f32 %v8578_v0, %v8578_v0 }
 0x94b   : > { %v8583_v10 = vsub.f32 %v8416_v53, %v3848_v61  ;;  %v8586_v58 = vsub.f32 %v8412_v22, %v3849_v12  ;;  %3907 = vadd.xlane.f32.xlu0 %v3879_v31  ;;  %v8601_v31 = vld [vmem:[%s9525_s6] ss:$0 sm:$0xff] }
 0x94c   : > { %v3834_v59 = vpop.xlane.xlu1 %3833  ;;  %v3884_v9 = vpop.xlane.xlu0 %3883 }
 0x94d   : > { %v3850_v6 = vmul.f32 0.0078125, %v3834_v59  ;;  %v3915_v63 = vmul.f32 0.0078125, %v3884_v9  ;;  %v3880_v23 = vmul.f32 %v8583_v10, %v8583_v10  ;;  %v3881_v2 = vmul.f32 %v8586_v58, %v8586_v58 }
 0x94f   : > { %v8593_v46 = vsub.f32 %v8427_v54, %v3850_v6  ;;  %v3931_v27 = vadd.f32 1e-05, %v3915_v63  ;;  %3909 = vadd.xlane.f32.xlu1 %v3880_v23  ;;  %3911 = vadd.xlane.f32.xlu0 %v3881_v2 }
 0x950   : > { %v3886_v37 = vpop.xlane.xlu1 %3885  ;;  %v3888_v28 = vpop.xlane.xlu0 %3887 }
 0x951   : > { %6624 = vrsqrt.f32 %v3931_v27  ;;  %v3916_v30 = vmul.f32 0.0078125, %v3886_v37  ;;  %v3917_v1 = vmul.f32 0.0078125, %v3888_v28  ;;  %v3882_v25 = vmul.f32 %v8593_v46, %v8593_v46  ;;  %v8608_v27 = vld [vmem:[%s9526_s7] ss:$0 sm:$0xff] }
 0x953   : > { %v3932_v52 = vadd.f32 1e-05, %v3916_v30  ;;  %v3933_v44 = vadd.f32 1e-05, %v3917_v1  ;;  %3913 = vadd.xlane.f32.xlu1 %v3882_v25 }
 0x954   : > { %v3890_v45 = vpop.xlane.xlu1 %3889  ;;  %v3892_v17 = vpop.xlane.xlu0 %3891 }
 0x955   : > { %6626 = vrsqrt.f32 %v3932_v52  ;;  %v3918_v5 = vmul.f32 0.0078125, %v3890_v45  ;;  %v3919_v36 = vmul.f32 0.0078125, %v3892_v17 }
 0x956   : > { %6628 = vrsqrt.f32 %v3933_v44 }
 0x957   : > { %v3934_v38 = vadd.f32 1e-05, %v3918_v5  ;;  %v3935_v48 = vadd.f32 1e-05, %v3919_v36 }
 0x958   : > { %v3894_v21 = vpop.xlane.xlu1 %3893  ;;  %v3896_v39 = vpop.xlane.xlu0 %3895 }
 0x959   : > { %6630 = vrsqrt.f32 %v3934_v38  ;;  %v3920_v41 = vmul.f32 0.0078125, %v3894_v21  ;;  %v3921_v61 = vmul.f32 0.0078125, %v3896_v39 }
 0x95b   : > { %v3936_v4 = vadd.f32 1e-05, %v3920_v41  ;;  %v3937_v6 = vadd.f32 1e-05, %v3921_v61 }
 0x95c   : > { %v3898_v57 = vpop.xlane.xlu1 %3897 }
 0x95d   : > { %6632 = vrsqrt.f32 %v3936_v4  ;;  %v3922_v11 = vmul.f32 0.0078125, %v3898_v57 }
 0x95e   : > { %v6625_v13 = vpop.eup %6624  ;;  %6634 = vrsqrt.f32 %v3935_v48 }
 0x95f   : > { %v3963_v12 = vmul.f32 %v6625_v13, %v8409_v49  ;;  %v3938_v59 = vadd.f32 1e-05, %v3922_v11 }
 0x961   : > { %v3985_v23 = vmul.f32 %v8601_v31, %v3963_v12  ;;  %6636 = vrsqrt.f32 %v3938_v59 }
 0x962   : > { %v6627_v9 = vpop.eup %6626  ;;  %6638 = vrsqrt.f32 %v3937_v6 }
 0x963   : > { %v3964_v63 = vmul.f32 %v6627_v9, %v8421_v18  ;;  %v6629_v2 = vpop.eup %6628  ;;  %v4007_v28 = vadd.f32 %v8608_v27, %v3985_v23 }
 0x964   : > { %v3965_v1 = vmul.f32 %v6629_v2, %v8424_v26 }
 0x965   : > { %v3986_v49 = vmul.f32 %v8601_v31, %v3964_v63 }
 0x966   : > { %v6631_v37 = vpop.eup %6630  ;;  %v3987_v45 = vmul.f32 %v8601_v31, %v3965_v1 }
 0x967   : > { %v4008_v30 = vadd.f32 %v8608_v27, %v3986_v49  ;;  %v3966_v18 = vmul.f32 %v6631_v37, %v8433_v33 }
 0x968   : > { %v4009_v26 = vadd.f32 %v8608_v27, %v3987_v45  ;;  %v8653_v45 = vld [vmem:[%s9529_s10 + $0xb8] sm:$0xff]  }
 0x969   : > { %v4023_v25 = vpack.c.bf16 %v4008_v30, %v4007_v28  ;;  %v3988_v52 = vmul.f32 %v8601_v31, %v3966_v18  ;;  %v6368_v18 = vld [vmem:[%s9529_s10 + $0x78] sm:$0xff]  }
 0x96a   : > { %v6633_v44 = vpop.eup %6632  ;;  %6022 = vmatprep.subr.bf16.mxu1 %v6368_v18  ;;  %v6384_v18 = vld [vmem:[%s9529_s10 + $0x58] sm:$0xff]  }
 0x96b   : > { %4278 = vmatmul.mubr.bf16.vlgmr.msra.gmra.mxu1 %v4023_v25  ;;  %4391 = vmatmul.mubr.bf16.vlgmr.msra.gmra.mxu0 %v4023_v25  ;;  %v6635_v17 = vpop.eup %6634  ;;  %v4010_v5 = vadd.f32 %v8608_v27, %v3988_v52  ;;  %v3968_v38 = vmul.f32 %v6633_v44, %v8445_v51  ;;  %v8645_v25 = vld [vmem:[%s9529_s10 + $0xf8] sm:$0xff]  }
 0x96c   : > { %4287 = vmatprep.mubr.bf16.mxu1 %v6862_v8  ;;  %4400 = vmatprep.mubr.bf16.mxu0 %v6862_v8  ;;  %v3967_v33 = vmul.f32 %v6635_v17, %v8438_v47  ;;  %v6370_v44 = vld [vmem:[%s9529_s10 + $0x38] sm:$0xff]   ;;  %v6372_v17 = vld [vmem:[%s9529_s10 + $0x70] sm:$0xff]  }
 0x96d   : > { %v4024_v36 = vpack.c.bf16 %v4010_v5, %v4009_v26  ;;  %v3990_v21 = vmul.f32 %v8601_v31, %v3968_v38  ;;  %6086 = vmatprep.subr.bf16.mxu0 %v8645_v25  ;;  %6023 = vmatpush3.bf16.msra.mxu1 %v6370_v44  ;;  %v8663_v5 = vld [vmem:[%s9529_s10 + $0xf0] sm:$0xff]  }
 0x96e   : > { %v6637_v41 = vpop.eup %6636  ;;  %v3989_v4 = vmul.f32 %v8601_v31, %v3967_v33  ;;  %6087 = vmatpush3.bf16.msra.mxu0 %v8653_v45  ;;  %v6374_v38 = vld [vmem:[%s9529_s10 + $0x30] sm:$0xff]   ;;  %6024 = vmatprep.subr.bf16.mxu1 %v6372_v17 }
 0x96f   : > { %v6639_v48 = vpop.eup %6638  ;;  %v4012_v39 = vadd.f32 %v8608_v27, %v3990_v21  ;;  %v3970_v51 = vmul.f32 %v6637_v41, %v8465_v15  ;;  %v8671_v26 = vld [vmem:[%s9529_s10 + $0xb0] sm:$0xff]   ;;  %6088 = vmatprep.subr.bf16.mxu0 %v8663_v5 }
 0x970   : > { %v4011_v57 = vadd.f32 %v8608_v27, %v3989_v4  ;;  %v3969_v47 = vmul.f32 %v6639_v48, %v8448_v55 }
 0x971   : > { %v3992_v13 = vmul.f32 %v8601_v31, %v3970_v51  ;;  %6025 = vmatpush3.bf16.msra.mxu1 %v6374_v38  ;;  %v6386_v38 = vld [vmem:[%s9529_s10 + $0x18] sm:$0xff]  }
 0x972   : > { %v4025_v11 = vpack.c.bf16 %v4012_v39, %v4011_v57  ;;  %v3991_v61 = vmul.f32 %v8601_v31, %v3969_v47  ;;  %6089 = vmatpush3.bf16.msra.mxu0 %v8671_v26 }
 0x973   : > { %4288 = vmatmul.mubr.bf16.gmra.mxu1 %v4024_v36  ;;  %4401 = vmatmul.mubr.bf16.gmra.mxu0 %v4024_v36  ;;  %v4014_v12 = vadd.f32 %v8608_v27, %v3992_v13  ;;  %v6376_v13 = vld [vmem:[%s9529_s10 + $0x68] sm:$0xff]  }
 0x974   : > { %4297 = vmatprep.mubr.bf16.mxu1 %v6862_v8  ;;  %4410 = vmatprep.mubr.bf16.mxu0 %v6862_v8  ;;  %v4013_v59 = vadd.f32 %v8608_v27, %v3991_v61  ;;  %v6378_v61 = vld [vmem:[%s9529_s10 + $0x28] sm:$0xff]  }
 0x975   : > { %6026 = vmatprep.subr.bf16.mxu1 %v6376_v13  ;;  %v6394_v13 = vld [vmem:[%s9529_s10 + $0x8] sm:$0xff]  }
 0x976   : > { %v4026_v15 = vpack.c.bf16 %v4014_v12, %v4013_v59  ;;  %v8697_v12 = vld [vmem:[%s9529_s10 + $0xa8] sm:$0xff]   ;;  %6027 = vmatpush3.bf16.msra.mxu1 %v6378_v61 }
 0x977   : > { %v8777_v61 = vld [vmem:[%s9529_s10 + $0x88] sm:$0xff]  }
 0x978   : > { %9609 = vst [vmem:[#allocation28_spill] sm:$0xff] %v8777_v61 }
 0x97b   : > { %4298 = vmatmul.mubr.bf16.gmra.mxu1 %v4025_v11  ;;  %4411 = vmatmul.mubr.bf16.gmra.mxu0 %v4025_v11 }
 0x97c   : > { %4307 = vmatprep.mubr.bf16.mxu1 %v6862_v8  ;;  %4420 = vmatprep.mubr.bf16.mxu0 %v6862_v8 }
 0x983   : > { %4308 = vmatmul.mubr.bf16.gmra.mxu1 %v4026_v15  ;;  %4421 = vmatmul.mubr.bf16.gmra.mxu0 %v4026_v15  ;;  %v6380_v15 = vld [vmem:[%s9529_s10 + $0x60] sm:$0xff]  }
 0x984   : > { %4317 = vmatprep.mubr.bf16.mxu1 %v6862_v8  ;;  %4430 = vmatprep.mubr.bf16.mxu0 %v6862_v8 }
 0x985   : > { %6028 = vmatprep.subr.bf16.mxu1 %v6380_v15  ;;  %v8788_v15 = vld [vmem:[%s9529_s10 + $0xc0] sm:$0xff]  }
 0x986   : > { %9610 = vst [vmem:[#allocation29_spill] sm:$0xff] %v8788_v15 }
 0x9ac   : > { %v3900_v55 = vpop.xlane.xlu0 %3899 }
 0x9ad   : > { %v3923_v9 = vmul.f32 0.0078125, %v3900_v55  ;;  %v8711_v55 = vld [vmem:[%s9529_s10 + $0xe0] sm:$0xff]  }
 0x9af   : > { %v3939_v6 = vadd.f32 1e-05, %v3923_v9 }
 0x9b0   : > { %v3902_v63 = vpop.xlane.xlu1 %3901  ;;  %v3904_v23 = vpop.xlane.xlu0 %3903 }
 0x9b1   : > { %6640 = vrsqrt.f32 %v3939_v6  ;;  %v3924_v2 = vmul.f32 0.0078125, %v3902_v63  ;;  %v3925_v49 = vmul.f32 0.0078125, %v3904_v23  ;;  %v6382_v6 = vld [vmem:[%s9529_s10 + $0x20] sm:$0xff]  }
 0x9b2   : > { %v8720_v63 = vld [vmem:[%s9529_s10 + $0xa0] sm:$0xff]   ;;  %6029 = vmatpush3.bf16.msra.mxu1 %v6382_v6 }
 0x9b3   : > { %v3940_v37 = vadd.f32 1e-05, %v3924_v2  ;;  %v3941_v28 = vadd.f32 1e-05, %v3925_v49  ;;  %9603 = vst [vmem:[#allocation22_spill] sm:$0xff] %v8720_v63  ;;  %6030 = vmatprep.subr.bf16.mxu1 %v6384_v18  ;;  %v8796_v6 = vld [vmem:[%s9529_s10 + $0x80] sm:$0xff]  }
 0x9b4   : > { %v3906_v30 = vpop.xlane.xlu1 %3905  ;;  %9611 = vst [vmem:[#allocation30_spill] sm:$0xff] %v8796_v6 }
 0x9b5   : > { %6642 = vrsqrt.f32 %v3940_v37  ;;  %v3926_v1 = vmul.f32 0.0078125, %v3906_v30 }
 0x9b6   : > { %6644 = vrsqrt.f32 %v3941_v28  ;;  %6031 = vmatpush3.bf16.msra.mxu1 %v6386_v38 }
 0x9b7   : > { %v3942_v52 = vadd.f32 1e-05, %v3926_v1 }
 0x9b9   : > { %6646 = vrsqrt.f32 %v3942_v52  ;;  %v8733_v52 = vld [vmem:[%s9529_s10 + $0xd8] sm:$0xff]  }
 0x9ba   : > { %9604 = vst [vmem:[#allocation23_spill] sm:$0xff] %v8733_v52 }
 0x9be   : > { %v6641_v33 = vpop.eup %6640 }
 0x9bf   : > { %v3971_v36 = vmul.f32 %v6641_v33, %v8558_v7  ;;  %v8741_v33 = vld [vmem:[%s9529_s10 + $0x98] sm:$0xff]  }
 0x9c0   : > { %9605 = vst [vmem:[#allocation24_spill] sm:$0xff] %v8741_v33 }
 0x9c1   : > { %v3993_v48 = vmul.f32 %v8601_v31, %v3971_v36 }
 0x9c2   : > { %v6643_v21 = vpop.eup %6642 }
 0x9c3   : > { %v3972_v41 = vmul.f32 %v6643_v21, %v8563_v32  ;;  %v6645_v4 = vpop.eup %6644  ;;  %v4015_v57 = vadd.f32 %v8608_v27, %v3993_v48  ;;  %v8689_v32 = vld [vmem:[%s9529_s10 + $0xe8] sm:$0xff]  }
 0x9c4   : > { %v3973_v11 = vmul.f32 %v6645_v4, %v8566_v29  ;;  %6090 = vmatprep.subr.bf16.mxu0 %v8689_v32  ;;  %v6388_v4 = vld [vmem:[%s9529_s10 + $0x50] sm:$0xff]  }
 0x9c5   : > { %v3994_v39 = vmul.f32 %v8601_v31, %v3972_v41  ;;  %6091 = vmatpush3.bf16.msra.mxu0 %v8697_v12  ;;  %6032 = vmatprep.subr.bf16.mxu1 %v6388_v4 }
 0x9c6   : > { %v6647_v51 = vpop.eup %6646  ;;  %v3995_v59 = vmul.f32 %v8601_v31, %v3973_v11  ;;  %6092 = vmatprep.subr.bf16.mxu0 %v8711_v55  ;;  %v6392_v11 = vld [vmem:[%s9529_s10 + $0x48] sm:$0xff]  }
 0x9c7   : > { %v4016_v47 = vadd.f32 %v8608_v27, %v3994_v39  ;;  %v3974_v7 = vmul.f32 %v6647_v51, %v8573_v20  ;;  %v8751_v39 = vld [vmem:[%s9529_s10 + $0xd0] sm:$0xff]  }
 0x9c8   : > { %v4017_v23 = vadd.f32 %v8608_v27, %v3995_v59  ;;  %9606 = vst [vmem:[#allocation25_spill] sm:$0xff] %v8751_v39  ;;  %v6390_v51 = vld [vmem:[%s9529_s10 + $0x10] sm:$0xff]   ;;  %v6396_v59 = vld [vmem:[%s9529_s10 + $0x40] sm:$0xff]  }
 0x9c9   : > { %v4027_v29 = vpack.c.bf16 %v4016_v47, %v4015_v57  ;;  %v3996_v20 = vmul.f32 %v8601_v31, %v3974_v7  ;;  %6093 = vmatpush3.bf16.msra.mxu0 %v8720_v63  ;;  %v8759_v57 = vld [vmem:[%s9529_s10 + $0x90] sm:$0xff]   ;;  %6033 = vmatpush3.bf16.msra.mxu1 %v6390_v51  ;;  %v8769_v7 = vld [vmem:[%s9529_s10 + $0xc8] sm:$0xff]  }
 0x9ca   : > { %6094 = vmatprep.subr.bf16.mxu0 %v8733_v52  ;;  %9607 = vst [vmem:[#allocation26_spill] sm:$0xff] %v8759_v57  ;;  %9608 = vst [vmem:[#allocation27_spill] sm:$0xff] %v8769_v7  ;;  %6034 = vmatprep.subr.bf16.mxu1 %v6392_v11 }
 0x9cb   : > { %4318 = vmatmul.mubr.bf16.gmra.mxu1 %v4027_v29  ;;  %4431 = vmatmul.mubr.bf16.gmra.mxu0 %v4027_v29  ;;  %v4018_v9 = vadd.f32 %v8608_v27, %v3996_v20 }
 0x9cc   : > { %4327 = vmatprep.mubr.bf16.mxu1 %v6862_v8  ;;  %4440 = vmatprep.mubr.bf16.mxu0 %v6862_v8 }
 0x9cd   : > { %v4028_v2 = vpack.c.bf16 %v4018_v9, %v4017_v23  ;;  %6095 = vmatpush3.bf16.msra.mxu0 %v8741_v33  ;;  %6035 = vmatpush3.bf16.msra.mxu1 %v6394_v13  ;;  %v6398_v9 = vld [vmem:[%s9529_s10] sm:$0xff]  }
 0x9ce   : > { %6096 = vmatprep.subr.bf16.mxu0 %v8751_v39  ;;  %6036 = vmatprep.subr.bf16.mxu1 %v6396_v59 }
 0x9d1   : > { %6097 = vmatpush3.bf16.msra.mxu0 %v8759_v57  ;;  %6037 = vmatpush3.bf16.msra.mxu1 %v6398_v9 }
 0x9d2   : > { %6098 = vmatprep.subr.bf16.mxu0 %v8769_v7  ;;  %6214 = vmatprep.subr.bf16.mxu1 %v8645_v25 }
 0x9d3   : > { %4328 = vmatmul.mubr.bf16.gmra.mxu1 %v4028_v2  ;;  %4441 = vmatmul.mubr.bf16.gmra.mxu0 %v4028_v2 }
 0x9d4   : > { %v3908_v49 = vpop.xlane.xlu0 %3907  ;;  %4337 = vmatprep.mubr.bf16.mxu1 %v6862_v8  ;;  %4450 = vmatprep.mubr.bf16.mxu0 %v6862_v8 }
 0x9d5   : > { %v3927_v37 = vmul.f32 0.0078125, %v3908_v49  ;;  %6099 = vmatpush3.bf16.msra.mxu0 %v8777_v61 }
 0x9d6   : > { %6100 = vmatprep.subr.bf16.mxu0 %v8788_v15 }
 0x9d7   : > { %v3943_v28 = vadd.f32 1e-05, %v3927_v37 }
 0x9d8   : > { %v3910_v30 = vpop.xlane.xlu1 %3909  ;;  %v3912_v1 = vpop.xlane.xlu0 %3911 }
 0x9d9   : > { %6648 = vrsqrt.f32 %v3943_v28  ;;  %v3928_v44 = vmul.f32 0.0078125, %v3910_v30  ;;  %v3929_v17 = vmul.f32 0.0078125, %v3912_v1  ;;  %6101 = vmatpush3.bf16.msra.mxu0 %v8796_v6 }
 0x9db   : > { %v3944_v36 = vadd.f32 1e-05, %v3928_v44  ;;  %v3945_v21 = vadd.f32 1e-05, %v3929_v17 }
 0x9dc   : > { %v3914_v41 = vpop.xlane.xlu1 %3913 }
 0x9dd   : > { %6650 = vrsqrt.f32 %v3944_v36  ;;  %v3930_v48 = vmul.f32 0.0078125, %v3914_v41 }
 0x9de   : > { %6652 = vrsqrt.f32 %v3945_v21 }
 0x9df   : > { %v3946_v47 = vadd.f32 1e-05, %v3930_v48  ;;  %v4063_v48 = vld [vmem:[%s9528_s9] sm:$0xf] }
 0x9e1   : > { %6654 = vrsqrt.f32 %v3946_v47 }
 0x9e6   : > { %v6649_v29 = vpop.eup %6648 }
 0x9e7   : > { %v3975_v20 = vmul.f32 %v6649_v29, %v8578_v0 }
 0x9e9   : > { %v3997_v2 = vmul.f32 %v8601_v31, %v3975_v20 }
 0x9ea   : > { %v6651_v0 = vpop.eup %6650 }
 0x9eb   : > { %v3976_v23 = vmul.f32 %v6651_v0, %v8583_v10  ;;  %v6653_v49 = vpop.eup %6652  ;;  %v4019_v30 = vadd.f32 %v8608_v27, %v3997_v2 }
 0x9ec   : > { %v3977_v18 = vmul.f32 %v6653_v49, %v8586_v58  ;;  %v4066_v58 = vshrl.u32 %v1057_v56, 7 }
 0x9ed   : > { %v3998_v37 = vmul.f32 %v8601_v31, %v3976_v23 }
 0x9ee   : > { %v6655_v28 = vpop.eup %6654  ;;  %v3999_v10 = vmul.f32 %v8601_v31, %v3977_v18  ;;  %v4075_v41 = vsub.s32 2, %v4066_v58  ;;  %v4079_v4 = vsub.s32 3, %v4066_v58 }
 0x9ef   : > { %v4020_v1 = vadd.f32 %v8608_v27, %v3998_v37  ;;  %v3978_v44 = vmul.f32 %v6655_v28, %v8593_v46  ;;  %v4067_v46 = vsub.s32 0, %v4066_v58 }
 0x9f0   : > { %v4021_v36 = vadd.f32 %v8608_v27, %v3999_v10  ;;  %v8824_v13 = vrot.slane %v4063_v48, %v4079_v4 }
 0x9f1   : > { %v4029_v17 = vpack.c.bf16 %v4020_v1, %v4019_v30  ;;  %v4000_v38 = vmul.f32 %v8601_v31, %v3978_v44  ;;  %v4071_v31 = vsub.s32 1, %v4066_v58  ;;  %v8818_v51 = vrot.slane %v4063_v48, %v4067_v46 }
 0x9f2   : > { %9615 = vst [vmem:[#allocation34_spill] sm:$0xff] %v8824_v13 }
 0x9f3   : > { %4338 = vmatmul.mubr.bf16.gmra.mxu1 %v4029_v17  ;;  %4451 = vmatmul.mubr.bf16.gmra.mxu0 %v4029_v17  ;;  %v4022_v25 = vadd.f32 %v8608_v27, %v4000_v38  ;;  %9612 = vst [vmem:[#allocation31_spill] sm:$0xff] %v8818_v51  ;;  %v8822_v27 = vrot.slane %v4063_v48, %v4071_v31 }
 0x9f4   : > { %4347 = vmatprep.mubr.bf16.mxu1 %v6862_v8  ;;  %4460 = vmatprep.mubr.bf16.mxu0 %v6862_v8  ;;  %v8820_v8 = vrot.slane %v4063_v48, %v4075_v41 }
 0x9f5   : > { %v4030_v21 = vpack.c.bf16 %v4022_v25, %v4021_v36  ;;  %9614 = vst [vmem:[#allocation33_spill] sm:$0xff] %v8822_v27 }
 0x9f6   : > { %9613 = vst [vmem:[#allocation32_spill] sm:$0xff] %v8820_v8 }
 0x9fb   : > { %4348 = vmatmul.mubr.bf16.gmra.mxu1 %v4030_v21  ;;  %4461 = vmatmul.mubr.bf16.gmra.mxu0 %v4030_v21 }
 0xa2b   : > { %v4279_v47 = vpop.f32.mrf.mxu1  ;;  %v4392_v11 = vpop.f32.mrf.mxu0 }
 0xa2c   : > { %v4280_v56 = vadd.f32 %v4279_v47, %v8818_v51  ;;  %v4393_v29 = vadd.f32 %v4392_v11, %v8820_v8 }
 0xa2d   : > { %v4281_v20 = vpop.f32.mrf.mxu1  ;;  %v4394_v59 = vpop.f32.mrf.mxu0 }
 0xa2e   : > { %v4535_v9 = vmul.f32 %v4280_v56, %v4280_v56  ;;  %v4537_v0 = vmul.f32 %v4393_v29, %v4393_v29  ;;  %v4282_v23 = vadd.f32 %v4281_v20, %v8822_v27  ;;  %v4395_v2 = vadd.f32 %v4394_v59, %v8824_v13 }
 0xa2f   : > { %v4283_v49 = vpop.f32.mrf.mxu1  ;;  %v4396_v37 = vpop.f32.mrf.mxu0 }
 0xa30   : > { %v4599_v28 = vmul.f32 %v4535_v9, %v4280_v56  ;;  %v4601_v30 = vmul.f32 %v4537_v0, %v4393_v29  ;;  %v8831_v1 = vadd.f32 %v4283_v49, %v8818_v51  ;;  %v8834_v18 = vadd.f32 %v4396_v37, %v8820_v8 }
 0xa31   : > { %v4536_v44 = vmul.f32 %v4282_v23, %v4282_v23  ;;  %v4538_v17 = vmul.f32 %v4395_v2, %v4395_v2  ;;  %v4285_v38 = vpop.f32.mrf.mxu1  ;;  %v4398_v10 = vpop.f32.mrf.mxu0  ;;  %v8875_v22 = vmul.f32 0.5, %v4395_v2 }
 0xa32   : > { %v4663_v25 = vmul.f32 0.044715, %v4599_v28  ;;  %v4665_v36 = vmul.f32 0.044715, %v4601_v30  ;;  %v4539_v21 = vmul.f32 %v8831_v1, %v8831_v1  ;;  %v4541_v41 = vmul.f32 %v8834_v18, %v8834_v18 }
 0xa33   : > { %v4600_v58 = vmul.f32 %v4536_v44, %v4282_v23  ;;  %v4602_v46 = vmul.f32 %v4538_v17, %v4395_v2  ;;  %v4289_v48 = vpop.f32.mrf.mxu1  ;;  %v8842_v11 = vadd.f32 %v4285_v38, %v8822_v27  ;;  %v4402_v20 = vpop.f32.mrf.mxu0  ;;  %v8846_v49 = vadd.f32 %v4398_v10, %v8824_v13 }
 0xa34   : > { %v4727_v31 = vadd.f32 %v4663_v25, %v4280_v56  ;;  %v4729_v4 = vadd.f32 %v4665_v36, %v4393_v29  ;;  %v4603_v47 = vmul.f32 %v4539_v21, %v8831_v1  ;;  %v4605_v0 = vmul.f32 %v4541_v41, %v8834_v18 }
 0xa35   : > { %v4664_v59 = vmul.f32 0.044715, %v4600_v58  ;;  %v4666_v9 = vmul.f32 0.044715, %v4602_v46  ;;  %v4540_v44 = vmul.f32 %v8842_v11, %v8842_v11  ;;  %v8850_v17 = vmul.f32 0.5, %v4280_v56  ;;  %v4291_v21 = vpop.f32.mrf.mxu1  ;;  %v4404_v41 = vpop.f32.mrf.mxu0 }
 0xa36   : > { %v4791_v37 = vmul.f32 0.7978846, %v4727_v31  ;;  %v4793_v28 = vmul.f32 0.7978846, %v4729_v4  ;;  %v4667_v30 = vmul.f32 0.044715, %v4603_v47  ;;  %v4542_v38 = vmul.f32 %v8846_v49, %v8846_v49 }
 0xa37   : > { %v4728_v25 = vadd.f32 %v4664_v59, %v4282_v23  ;;  %v4669_v36 = vmul.f32 0.044715, %v4605_v0  ;;  %v4604_v10 = vmul.f32 %v4540_v44, %v8842_v11  ;;  %v8857_v46 = vadd.f32 %v4289_v48, %v8818_v51  ;;  %v4293_v54 = vpop.f32.mrf.mxu1 }
 0xa38   : > { %6656 = vtanh.f32 %v4791_v37  ;;  %v4731_v58 = vadd.f32 %v4667_v30, %v8831_v1  ;;  %v8859_v31 = vmul.f32 0.5, %v4393_v29  ;;  %v4730_v56 = vadd.f32 %v4666_v9, %v4395_v2 }
 0xa39   : > { %6658 = vtanh.f32 %v4793_v28  ;;  %v4733_v4 = vadd.f32 %v4669_v36, %v8834_v18  ;;  %v4668_v59 = vmul.f32 0.044715, %v4604_v10  ;;  %v4606_v0 = vmul.f32 %v4542_v38, %v8846_v49  ;;  %v4406_v10 = vpop.f32.mrf.mxu0 }
 0xa3a   : > { %v4795_v47 = vmul.f32 0.7978846, %v4731_v58  ;;  %v4543_v37 = vmul.f32 %v8857_v46, %v8857_v46  ;;  %v4403_v44 = vadd.f32 %v4402_v20, %v8820_v8  ;;  %v8867_v48 = vadd.f32 %v4291_v21, %v8822_v27 }
 0xa3b   : > { %v4797_v30 = vmul.f32 0.7978846, %v4733_v4  ;;  %v8869_v29 = vmul.f32 0.5, %v4282_v23  ;;  %v4792_v28 = vmul.f32 0.7978846, %v4728_v25  ;;  %v4732_v9 = vadd.f32 %v4668_v59, %v8842_v11 }
 0xa3c   : > { %v4670_v36 = vmul.f32 0.044715, %v4606_v0  ;;  %v4607_v58 = vmul.f32 %v4543_v37, %v8857_v46  ;;  %6660 = vtanh.f32 %v4795_v47  ;;  %v4545_v38 = vmul.f32 %v4403_v44, %v4403_v44  ;;  %v4295_v47 = vpop.f32.mrf.mxu1 }
 0xa3d   : > { %v4544_v4 = vmul.f32 %v8867_v48, %v8867_v48  ;;  %v4794_v20 = vmul.f32 0.7978846, %v4730_v56  ;;  %6662 = vtanh.f32 %v4797_v30  ;;  %v8880_v59 = vadd.f32 %v4404_v41, %v8824_v13  ;;  %v4408_v30 = vpop.f32.mrf.mxu0 }
 0xa3e   : > { %v4734_v21 = vadd.f32 %v4670_v36, %v8846_v49  ;;  %v4671_v23 = vmul.f32 0.044715, %v4607_v58  ;;  %v4609_v53 = vmul.f32 %v4545_v38, %v4403_v44  ;;  %v8883_v0 = vadd.f32 %v4293_v54, %v8818_v51 }
 0xa3f   : > { %v4608_v25 = vmul.f32 %v4544_v4, %v8867_v48  ;;  %6664 = vtanh.f32 %v4792_v28  ;;  %v4796_v37 = vmul.f32 0.7978846, %v4732_v9  ;;  %v4407_v56 = vadd.f32 %v4406_v10, %v8820_v8 }
 0xa40   : > { %v4735_v2 = vadd.f32 %v4671_v23, %v8857_v46  ;;  %v4673_v42 = vmul.f32 0.044715, %v4609_v53  ;;  %v4546_v58 = vmul.f32 %v8880_v59, %v8880_v59  ;;  %v4547_v41 = vmul.f32 %v8883_v0, %v8883_v0  ;;  %v4299_v23 = vpop.f32.mrf.mxu1 }
 0xa41   : > { %v4672_v36 = vmul.f32 0.044715, %v4608_v25  ;;  %6666 = vtanh.f32 %v4794_v20  ;;  %v8892_v54 = vmul.f32 0.5, %v8831_v1  ;;  %v8895_v28 = vmul.f32 0.5, %v8834_v18  ;;  %v4412_v20 = vpop.f32.mrf.mxu0 }
 0xa42   : > { %v4549_v9 = vmul.f32 %v4407_v56, %v4407_v56  ;;  %v4798_v38 = vmul.f32 0.7978846, %v4734_v21  ;;  %v4737_v4 = vadd.f32 %v4673_v42, %v4403_v44  ;;  %v4610_v10 = vmul.f32 %v4546_v58, %v8880_v59 }
 0xa43   : > { %v4611_v53 = vmul.f32 %v4547_v41, %v8883_v0  ;;  %v4736_v25 = vadd.f32 %v4672_v36, %v8867_v48  ;;  %v8901_v24 = vadd.f32 %v4295_v47, %v8822_v27  ;;  %v8904_v1 = vadd.f32 %v4408_v30, %v8824_v13 }
 0xa44   : > { %v4613_v50 = vmul.f32 %v4549_v9, %v4407_v56  ;;  %6668 = vtanh.f32 %v4796_v37  ;;  %v4799_v16 = vmul.f32 0.7978846, %v4735_v2  ;;  %v8906_v21 = vmul.f32 0.5, %v4403_v44  ;;  %v4301_v2 = vpop.f32.mrf.mxu1 }
 0xa45   : > { %v6657_v18 = vpop.eup %6656  ;;  %v4674_v42 = vmul.f32 0.044715, %v4610_v10  ;;  %v4675_v35 = vmul.f32 0.044715, %v4611_v53  ;;  %v4548_v36 = vmul.f32 %v8901_v24, %v8901_v24  ;;  %v8911_v9 = vadd.f32 %v4299_v23, %v8818_v51 }
 0xa46   : > { %v6659_v58 = vpop.eup %6658  ;;  %v4677_v41 = vmul.f32 0.044715, %v4613_v50  ;;  %v4919_v47 = vadd.f32 1.0, %v6657_v18  ;;  %v4801_v34 = vmul.f32 0.7978846, %v4737_v4  ;;  %v4550_v37 = vmul.f32 %v8904_v1, %v8904_v1  ;;  %v4414_v50 = vpop.f32.mrf.mxu0 }
 0xa47   : > { %9616 = vst [vmem:[#allocation35_spill] sm:$0xff] %v8911_v9  ;;  %v4738_v30 = vadd.f32 %v4674_v42, %v8880_v59  ;;  %v4921_v44 = vadd.f32 1.0, %v6659_v58  ;;  %6670 = vtanh.f32 %v4798_v38  ;;  %v4800_v10 = vmul.f32 0.7978846, %v4736_v25 }
 0xa48   : > { %v4739_v53 = vadd.f32 %v4675_v35, %v8883_v0  ;;  %v4741_v40 = vadd.f32 %v4677_v41, %v4407_v56  ;;  %v4612_v14 = vmul.f32 %v4548_v36, %v8901_v24  ;;  %v4614_v23 = vmul.f32 %v4550_v37, %v8904_v1  ;;  %v4303_v36 = vpop.f32.mrf.mxu1  ;;  %v4416_v37 = vpop.f32.mrf.mxu0 }
 0xa49   : > { %v4802_v62 = vmul.f32 0.7978846, %v4738_v30  ;;  %v6661_v18 = vpop.eup %6660  ;;  %6672 = vtanh.f32 %v4799_v16  ;;  %v8919_v4 = vmul.f32 0.5, %v4407_v56  ;;  %v4551_v42 = vmul.f32 %v8911_v9, %v8911_v9 }
 0xa4a   : > { %v8924_v58 = vadd.f32 %v4412_v20, %v8820_v8  ;;  %v6663_v38 = vpop.eup %6662  ;;  %v8927_v35 = vmul.f32 %v4919_v47, %v8850_v17  ;;  %6674 = vtanh.f32 %v4801_v34  ;;  %v4676_v25 = vmul.f32 0.044715, %v4612_v14 }
 0xa4b   : > { %v4678_v41 = vmul.f32 0.044715, %v4614_v23  ;;  %v8930_v30 = vmul.f32 %v4921_v44, %v8859_v31  ;;  %6676 = vtanh.f32 %v4800_v10  ;;  %v4803_v16 = vmul.f32 0.7978846, %v4739_v53 }
 0xa4c   : > { %9617 = vst [vmem:[#allocation36_spill] sm:$0xff] %v8924_v58  ;;  %v4615_v56 = vmul.f32 %v4551_v42, %v8911_v9  ;;  %v8933_v19 = vpop.eup %6664  ;;  %v4923_v20 = vadd.f32 1.0, %v6661_v18  ;;  %6678 = vtanh.f32 %v4802_v62  ;;  %v4805_v3 = vmul.f32 0.7978846, %v4741_v40  ;;  %v4305_v40 = vpop.f32.mrf.mxu1 }
 0xa4d   : > { %v4740_v17 = vadd.f32 %v4676_v25, %v8901_v24  ;;  %v4742_v34 = vadd.f32 %v4678_v41, %v8904_v1  ;;  %v4553_v47 = vmul.f32 %v8924_v58, %v8924_v58  ;;  %v8940_v31 = vadd.f32 %v4301_v2, %v8822_v27  ;;  %v4418_v25 = vpop.f32.mrf.mxu0 }
 0xa4e   : > { %v4679_v14 = vmul.f32 0.044715, %v4615_v56  ;;  %v8942_v44 = vpop.eup %6666  ;;  %v4925_v10 = vadd.f32 1.0, %v6663_v38  ;;  %v8945_v23 = vadd.f32 %v4414_v50, %v8824_v13  ;;  %v8948_v62 = vadd.f32 %v4303_v36, %v8818_v51  ;;  %v4309_v60 = vpop.f32.mrf.mxu1 }
 0xa4f   : > { %v4804_v53 = vmul.f32 0.7978846, %v4740_v17  ;;  %6680 = vtanh.f32 %v4803_v16  ;;  %v4617_v42 = vmul.f32 %v4553_v47, %v8924_v58  ;;  %v4552_v2 = vmul.f32 %v8940_v31, %v8940_v31 }
 0xa50   : > { %v4743_v18 = vadd.f32 %v4679_v14, %v8911_v9  ;;  %v8955_v41 = vmul.f32 %v4923_v20, %v8892_v54  ;;  %v4554_v50 = vmul.f32 %v8945_v23, %v8945_v23  ;;  %v4555_v38 = vmul.f32 %v8948_v62, %v8948_v62 }
 0xa51   : > { %v8962_v36 = vadd.f32 %v4416_v37, %v8820_v8  ;;  %v8964_v16 = vpop.eup %6668  ;;  %6682 = vtanh.f32 %v4805_v3  ;;  %v4806_v56 = vmul.f32 0.7978846, %v4742_v34  ;;  %v4681_v17 = vmul.f32 0.044715, %v4617_v42  ;;  %v4422_v3 = vpop.f32.mrf.mxu0 }
 0xa52   : > { %v4616_v14 = vmul.f32 %v4552_v2, %v8940_v31  ;;  %6684 = vtanh.f32 %v4804_v53  ;;  %v4618_v54 = vmul.f32 %v4554_v50, %v8945_v23  ;;  %v4619_v20 = vmul.f32 %v4555_v38, %v8948_v62 }
 0xa53   : > { %9618 = vst [vmem:[#allocation37_spill] sm:$0xff] %v8962_v36  ;;  %v4557_v47 = vmul.f32 %v8962_v36, %v8962_v36  ;;  %v4807_v43 = vmul.f32 0.7978846, %v4743_v18  ;;  %v4745_v37 = vadd.f32 %v4681_v17, %v8924_v58  ;;  %v8973_v15 = vadd.f32 %v4305_v40, %v8822_v27  ;;  %v4424_v57 = vpop.f32.mrf.mxu0 }
 0xa54   : > { %v4680_v6 = vmul.f32 0.044715, %v4616_v14  ;;  %v8975_v34 = vpop.eup %6670  ;;  %v4682_v42 = vmul.f32 0.044715, %v4618_v54  ;;  %v4683_v53 = vmul.f32 0.044715, %v4619_v20  ;;  %v8979_v50 = vadd.f32 %v4418_v25, %v8824_v13  ;;  %v4311_v25 = vpop.f32.mrf.mxu1 }
 0xa55   : > { %v4621_v2 = vmul.f32 %v4557_v47, %v8962_v36  ;;  %v4809_v38 = vmul.f32 0.7978846, %v4745_v37  ;;  %v4556_v18 = vmul.f32 %v8973_v15, %v8973_v15  ;;  %v8985_v17 = vadd.f32 %v4309_v60, %v8818_v51 }
 0xa56   : > { %v4744_v61 = vadd.f32 %v4680_v6, %v8940_v31  ;;  %v8987_v40 = vpop.eup %6672  ;;  %6686 = vtanh.f32 %v4806_v56  ;;  %v4746_v14 = vadd.f32 %v4682_v42, %v8945_v23  ;;  %v4558_v20 = vmul.f32 %v8979_v50, %v8979_v50 }
 0xa57   : > { %9619 = vst [vmem:[#allocation38_spill] sm:$0xff] %v8985_v17  ;;  %v4685_v54 = vmul.f32 0.044715, %v4621_v2  ;;  %v8992_v47 = vpop.eup %6674  ;;  %v4747_v6 = vadd.f32 %v4683_v53, %v8948_v62  ;;  %v4620_v7 = vmul.f32 %v4556_v18, %v8973_v15  ;;  %v4559_v60 = vmul.f32 %v8985_v17, %v8985_v17 }
 0xa58   : > { %v4808_v37 = vmul.f32 0.7978846, %v4744_v61  ;;  %v8998_v39 = vpop.eup %6676  ;;  %6688 = vtanh.f32 %v4807_v43  ;;  %v4810_v56 = vmul.f32 0.7978846, %v4746_v14  ;;  %v4622_v2 = vmul.f32 %v4558_v20, %v8979_v50  ;;  %v4313_v14 = vpop.f32.mrf.mxu1 }
 0xa59   : > { %v4749_v42 = vadd.f32 %v4685_v54, %v8962_v36  ;;  %v9002_v33 = vpop.eup %6678  ;;  %6690 = vtanh.f32 %v4809_v38  ;;  %v4684_v61 = vmul.f32 0.044715, %v4620_v7  ;;  %v4623_v53 = vmul.f32 %v4559_v60, %v8985_v17  ;;  %v4426_v7 = vpop.f32.mrf.mxu0 }
 0xa5a   : > { %v9006_v18 = vadd.f32 %v4422_v3, %v8820_v8  ;;  %v9009_v52 = vmul.f32 %v4925_v10, %v8895_v28  ;;  %6692 = vtanh.f32 %v4808_v37  ;;  %v4686_v63 = vmul.f32 0.044715, %v4622_v2 }
 0xa5b   : > { %v9012_v43 = vadd.f32 %v4311_v25, %v8822_v27  ;;  %6694 = vtanh.f32 %v4810_v56  ;;  %v4811_v54 = vmul.f32 0.7978846, %v4747_v6  ;;  %v4748_v20 = vadd.f32 %v4684_v61, %v8973_v15 }
 0xa5c   : > { %9620 = vst [vmem:[#allocation39_spill] sm:$0xff] %v9006_v18  ;;  %v4687_v38 = vmul.f32 0.044715, %v4623_v53  ;;  %v9015_v58 = vpop.eup %6680  ;;  %v4813_v60 = vmul.f32 0.7978846, %v4749_v42  ;;  %v4750_v3 = vadd.f32 %v4686_v63, %v8979_v50  ;;  %v4561_v28 = vmul.f32 %v9006_v18, %v9006_v18 }
 0xa5d   : > { %9621 = vst [vmem:[#allocation40_spill] sm:$0xff] %v9012_v43  ;;  %v4560_v10 = vmul.f32 %v9012_v43, %v9012_v43  ;;  %v4812_v25 = vmul.f32 0.7978846, %v4748_v20  ;;  %v9024_v6 = vadd.f32 %v4424_v57, %v8824_v13  ;;  %v9027_v56 = vadd.f32 %v4313_v14, %v8818_v51  ;;  %v4428_v51 = vpop.f32.mrf.mxu0 }
 0xa5e   : > { %v4751_v37 = vadd.f32 %v4687_v38, %v8985_v17  ;;  %v9029_v2 = vpop.eup %6682  ;;  %v4814_v42 = vmul.f32 0.7978846, %v4750_v3  ;;  %v4625_v63 = vmul.f32 %v4561_v28, %v9006_v18  ;;  %v9034_v53 = vadd.f32 %v4426_v7, %v8820_v8  ;;  %v4315_v38 = vpop.f32.mrf.mxu1 }
 0xa5f   : > { %9622 = vst [vmem:[#allocation41_spill] sm:$0xff] %v9024_v6  ;;  %9623 = vst [vmem:[#allocation42_spill] sm:$0xff] %v9027_v56  ;;  %v4624_v61 = vmul.f32 %v4560_v10, %v9012_v43  ;;  %v9036_v36 = vpop.eup %6684  ;;  %6696 = vtanh.f32 %v4811_v54  ;;  %v4562_v57 = vmul.f32 %v9024_v6, %v9024_v6  ;;  %v4563_v14 = vmul.f32 %v9027_v56, %v9027_v56 }
 0xa60   : > { %v4815_v20 = vmul.f32 0.7978846, %v4751_v37  ;;  %6698 = vtanh.f32 %v4813_v60  ;;  %v4689_v28 = vmul.f32 0.044715, %v4625_v63  ;;  %v4565_v37 = vmul.f32 %v9034_v53, %v9034_v53 }
 0xa61   : > { %v4688_v10 = vmul.f32 0.044715, %v4624_v61  ;;  %6700 = vtanh.f32 %v4812_v25  ;;  %v4626_v7 = vmul.f32 %v4562_v57, %v9024_v6  ;;  %v4627_v54 = vmul.f32 %v4563_v14, %v9027_v56 }
 0xa62   : > { %6702 = vtanh.f32 %v4814_v42  ;;  %v9050_v17 = vadd.f32 %v4315_v38, %v8822_v27  ;;  %v9053_v9 = vadd.f32 %v4428_v51, %v8824_v13  ;;  %v4629_v61 = vmul.f32 %v4565_v37, %v9034_v53 }
 0xa63   : > { %v4752_v8 = vadd.f32 %v4688_v10, %v9012_v43  ;;  %v6687_v60 = vpop.eup %6686  ;;  %6704 = vtanh.f32 %v4815_v20  ;;  %v4690_v63 = vmul.f32 0.044715, %v4626_v7  ;;  %v4691_v25 = vmul.f32 0.044715, %v4627_v54 }
 0xa64   : > { %v4753_v57 = vadd.f32 %v4689_v28, %v9006_v18  ;;  %v4564_v42 = vmul.f32 %v9050_v17, %v9050_v17  ;;  %v4566_v10 = vmul.f32 %v9053_v9, %v9053_v9  ;;  %v4693_v20 = vmul.f32 0.044715, %v4629_v61 }
 0xa65   : > { %v4816_v14 = vmul.f32 0.7978846, %v4752_v8  ;;  %v9061_v38 = vpop.eup %6688  ;;  %v4754_v51 = vadd.f32 %v4690_v63, %v9024_v6  ;;  %v4755_v3 = vadd.f32 %v4691_v25, %v9027_v56  ;;  %v4920_v7 = vadd.f32 1.0, %v8933_v19 }
 0xa66   : > { %v9066_v54 = vpop.eup %6690  ;;  %v4628_v28 = vmul.f32 %v4564_v42, %v9050_v17  ;;  %v4630_v8 = vmul.f32 %v4566_v10, %v9053_v9  ;;  %v4476_v37 = vmul.f32 0.5, %v8842_v11  ;;  %v4924_v13 = vadd.f32 1.0, %v8964_v16 }
 0xa67   : > { %v9072_v27 = vpop.eup %6692  ;;  %6706 = vtanh.f32 %v4816_v14  ;;  %v4818_v18 = vmul.f32 0.7978846, %v4754_v51  ;;  %v4819_v63 = vmul.f32 0.7978846, %v4755_v3  ;;  %v4757_v25 = vadd.f32 %v4693_v20, %v9034_v53 }
 0xa68   : > { %v9075_v61 = vpop.eup %6694  ;;  %v4692_v19 = vmul.f32 0.044715, %v4628_v28  ;;  %v4694_v56 = vmul.f32 0.044715, %v4630_v8  ;;  %v4984_v6 = vmul.f32 %v4920_v7, %v8869_v29  ;;  %v4988_v42 = vmul.f32 %v4924_v13, %v4476_v37 }
 0xa69   : > { %v4817_v43 = vmul.f32 0.7978846, %v4753_v57  ;;  %6708 = vtanh.f32 %v4818_v18  ;;  %v4821_v10 = vmul.f32 0.7978846, %v4757_v25  ;;  %v4922_v11 = vadd.f32 1.0, %v8942_v44 }
 0xa6a   : > { %v4756_v16 = vadd.f32 %v4692_v19, %v9050_v17  ;;  %v4758_v14 = vadd.f32 %v4694_v56, %v9053_v9  ;;  %v5048_v51 = vpack.c.bf16 %v4988_v42, %v4984_v6  ;;  %v4478_v3 = vmul.f32 0.5, %v8846_v49 }
 0xa6b   : > { %6710 = vtanh.f32 %v4819_v63  ;;  %v4926_v20 = vadd.f32 1.0, %v8975_v34  ;;  %v4986_v28 = vmul.f32 %v4922_v11, %v8875_v22  ;;  %v5047_v13 = vpack.c.bf16 %v8955_v41, %v8927_v35 }
 0xa6c   : > { %v9086_v29 = vpop.eup %6696  ;;  %v4820_v18 = vmul.f32 0.7978846, %v4756_v16  ;;  %v4822_v57 = vmul.f32 0.7978846, %v4758_v14  ;;  %5367 = vmatprep.mubr.bf16.mxu1 %v5048_v51  ;;  %v4480_v44 = vmul.f32 0.5, %v8867_v48  ;;  %v4484_v56 = vmul.f32 0.5, %v8901_v24 }
 0xa6d   : > { %v9090_v6 = vpop.eup %6698  ;;  %v4990_v49 = vmul.f32 %v4926_v20, %v4478_v3  ;;  %5368 = vmatmul.mubr.bf16.vlgmr.msra.gmra.mxu1 %v5047_v13  ;;  %v4928_v34 = vadd.f32 1.0, %v8998_v39  ;;  %v4932_v22 = vadd.f32 1.0, %v9036_v36  ;;  %v4482_v7 = vmul.f32 0.5, %v8880_v59 }
 0xa6e   : > { %v6701_v35 = vpop.eup %6700  ;;  %6712 = vtanh.f32 %v4820_v18  ;;  %v4486_v41 = vmul.f32 0.5, %v8904_v1  ;;  %v4930_v8 = vadd.f32 1.0, %v9002_v33  ;;  %v4934_v37 = vadd.f32 1.0, %v6687_v60  ;;  %6222 = vmatpush3.bf16.msra.mxu1 %v8653_v45 }
 0xa6f   : > { %v6703_v24 = vpop.eup %6702  ;;  %6714 = vtanh.f32 %v4822_v57  ;;  %v5050_v48 = vpack.c.bf16 %v4990_v49, %v4986_v28  ;;  %v4992_v63 = vmul.f32 %v4928_v34, %v4480_v44  ;;  %v4996_v25 = vmul.f32 %v4932_v22, %v4484_v56  ;;  %6215 = vmatprep.subr.bf16.mxu1 %v8663_v5  ;;  %v9625_v57 = vld [vmem:[#allocation35_spill] sm:$0xff]  ;;  %v9626_v56 = vld [vmem:[#allocation37_spill] sm:$0xff] }
 0xa70   : > { %v9099_v39 = vpop.eup %6704  ;;  %6716 = vtanh.f32 %v4821_v10  ;;  %v4994_v59 = vmul.f32 %v4930_v8, %v4482_v7  ;;  %v4998_v36 = vmul.f32 %v4934_v37, %v4486_v41  ;;  %v4479_v19 = vmul.f32 0.5, %v8857_v46  ;;  %v9628_v7 = vld [vmem:[#allocation40_spill] sm:$0xff] }
 0xa71   : > { %5464 = vmatprep.mubr.bf16.mxu0 %v5050_v48  ;;  %v5052_v1 = vpack.c.bf16 %v4996_v25, %v4992_v63  ;;  %v4483_v33 = vmul.f32 0.5, %v8883_v0  ;;  %v4927_v45 = vadd.f32 1.0, %v8987_v40  ;;  %v4931_v60 = vadd.f32 1.0, %v9015_v58  ;;  %v9630_v63 = vld [vmem:[#allocation41_spill] sm:$0xff] }
 0xa72   : > { %6718 = vtanh.f32 %v4817_v43  ;;  %v9624_v42 = vpack.c.bf16 %v9009_v52, %v8930_v30  ;;  %v5054_v5 = vpack.c.bf16 %v4998_v36, %v4994_v59  ;;  %v4929_v10 = vadd.f32 1.0, %v8992_v47  ;;  %6223 = vmatpush3.bf16.msra.mxu1 %v8671_v26  ;;  %v9631_v59 = vld [vmem:[#allocation23_spill] sm:$0xff] }
 0xa73   : > { %v4933_v11 = vadd.f32 1.0, %v9029_v2  ;;  %5375 = vmatprep.mubr.bf16.mxu1 %v5052_v1  ;;  %v4991_v46 = vmul.f32 %v4927_v45, %v4479_v19  ;;  %v4995_v16 = vmul.f32 %v4931_v60, %v4483_v33  ;;  %v4488_v0 = vmul.f32 0.5, %v8940_v31  ;;  %6216 = vmatprep.subr.bf16.mxu1 %v8689_v32 }
 0xa74   : > { %5465 = vmatmul.mubr.bf16.vlgmr.msra.gmra.mxu0 %v9624_v42  ;;  %v4936_v40 = vadd.f32 1.0, %v9072_v27  ;;  %v6707_v58 = vpop.eup %6706  ;;  %v4492_v30 = vmul.f32 0.5, %v8973_v15  ;;  %v4940_v47 = vadd.f32 1.0, %v6701_v35  ;;  %v4490_v43 = vmul.f32 0.5, %v8945_v23 }
 0xa75   : > { %5472 = vmatprep.mubr.bf16.mxu0 %v5054_v5  ;;  %v4997_v52 = vmul.f32 %v4933_v11, %v8919_v4  ;;  %v5051_v2 = vpack.c.bf16 %v4995_v16, %v4991_v46  ;;  %v4494_v26 = vmul.f32 0.5, %v8979_v50  ;;  %v4938_v14 = vadd.f32 1.0, %v9075_v61  ;;  %v9632_v46 = vld [vmem:[#allocation42_spill] sm:$0xff] }
 0xa76   : > { %v4942_v51 = vadd.f32 1.0, %v6703_v24  ;;  %v6709_v31 = vpop.eup %6708  ;;  %v4993_v27 = vmul.f32 %v4929_v10, %v8906_v21  ;;  %v5000_v3 = vmul.f32 %v4936_v40, %v4488_v0  ;;  %v5004_v32 = vmul.f32 %v4940_v47, %v4492_v30  ;;  %6224 = vmatpush3.bf16.msra.mxu1 %v8697_v12 }
 0xa77   : > { %v4491_v20 = vmul.f32 0.5, %v8948_v62  ;;  %5376 = vmatmul.mubr.bf16.gmra.mxu1 %v5051_v2  ;;  %v5002_v15 = vmul.f32 %v4938_v14, %v4490_v43  ;;  %v4935_v23 = vadd.f32 1.0, %v9061_v38  ;;  %v4939_v28 = vadd.f32 1.0, %v9086_v29  ;;  %6217 = vmatprep.subr.bf16.mxu1 %v8711_v55  ;;  %v9627_v29 = vld [vmem:[#allocation36_spill] sm:$0xff]  ;;  %v9635_v2 = vld [vmem:[#allocation25_spill] sm:$0xff] }
 0xa78   : > { %v5006_v4 = vmul.f32 %v4942_v51, %v4494_v26  ;;  %v6711_v50 = vpop.eup %6710  ;;  %v5053_v61 = vpack.c.bf16 %v4997_v52, %v4993_v27  ;;  %v5056_v13 = vpack.c.bf16 %v5004_v32, %v5000_v3  ;;  %v4941_v21 = vadd.f32 1.0, %v9090_v6  ;;  %v9629_v6 = vld [vmem:[#allocation22_spill] sm:$0xff]  ;;  %v9633_v52 = vld [vmem:[#allocation24_spill] sm:$0xff] }
 0xa79   : > { %v4487_v44 = vmul.f32 0.5, %v9625_v57  ;;  %v5003_v62 = vmul.f32 %v4939_v28, %v4491_v20  ;;  %v4493_v12 = vmul.f32 0.5, %v9626_v56  ;;  %v4937_v49 = vadd.f32 1.0, %v9066_v54  ;;  %v9637_v3 = vld [vmem:[#allocation26_spill] sm:$0xff]  ;;  %v9638_v20 = vld [vmem:[#allocation27_spill] sm:$0xff]  ;;  %v9640_v28 = vld [vmem:[#allocation29_spill] sm:$0xff] }
 0xa7a   : > { %v5058_v18 = vpack.c.bf16 %v5006_v4, %v5002_v15  ;;  %5383 = vmatprep.mubr.bf16.mxu1 %v5056_v13  ;;  %v4944_v38 = vadd.f32 1.0, %v6707_v58  ;;  %v4489_v22 = vmul.f32 0.5, %v9627_v29  ;;  %v4496_v35 = vmul.f32 0.5, %v9628_v7  ;;  %6225 = vmatpush3.bf16.msra.mxu1 %v9629_v6  ;;  %v9642_v13 = vld [vmem:[#allocation31_spill] sm:$0xff] }
 0xa7b   : > { %v6713_v34 = vpop.eup %6712  ;;  %v4999_v55 = vmul.f32 %v4935_v23, %v4487_v44  ;;  %v4946_v41 = vadd.f32 1.0, %v6709_v31  ;;  %v5005_v37 = vmul.f32 %v4941_v21, %v4493_v12  ;;  %v4500_v24 = vmul.f32 0.5, %v9050_v17  ;;  %6218 = vmatprep.subr.bf16.mxu1 %v9631_v59  ;;  %v9636_v31 = vld [vmem:[#allocation39_spill] sm:$0xff]  ;;  %v9639_v23 = vld [vmem:[#allocation28_spill] sm:$0xff] }
 0xa7c   : > { %5473 = vmatmul.mubr.bf16.gmra.mxu0 %v5053_v61  ;;  %v6715_v8 = vpop.eup %6714  ;;  %v4948_v48 = vadd.f32 1.0, %v6713_v34  ;;  %v4498_v25 = vmul.f32 0.5, %v9630_v63  ;;  %v4502_v19 = vmul.f32 0.5, %v9053_v9  ;;  %v4947_v33 = vadd.f32 1.0, %v6711_v50  ;;  %v9634_v9 = vld [vmem:[#allocation38_spill] sm:$0xff] }
 0xa7d   : > { %5480 = vmatprep.mubr.bf16.mxu0 %v5058_v18  ;;  %v6717_v54 = vpop.eup %6716  ;;  %v5055_v36 = vpack.c.bf16 %v5003_v62, %v4999_v55  ;;  %v4950_v1 = vadd.f32 1.0, %v6715_v8  ;;  %v5001_v45 = vmul.f32 %v4937_v49, %v4489_v22  ;;  %v5008_v60 = vmul.f32 %v4944_v38, %v4496_v35  ;;  %v9641_v61 = vld [vmem:[#allocation30_spill] sm:$0xff]  ;;  %v9643_v18 = vld [vmem:[#allocation32_spill] sm:$0xff]  ;;  %v9644_v49 = vld [vmem:[#allocation33_spill] sm:$0xff] }
 0xa7e   : > { %v5012_v42 = vmul.f32 %v4948_v48, %v4500_v24  ;;  %v5010_v10 = vmul.f32 %v4946_v41, %v4498_v25  ;;  %v4499_v17 = vmul.f32 0.5, %v9632_v46  ;;  %v4943_v16 = vadd.f32 1.0, %v9099_v39  ;;  %6226 = vmatpush3.bf16.msra.mxu1 %v9633_v52  ;;  %v9645_v34 = vld [vmem:[#allocation34_spill] sm:$0xff] }
 0xa7f   : > { %v6719_v5 = vpop.eup %6718  ;;  %5384 = vmatmul.mubr.bf16.gmra.mxu1 %v5055_v36  ;;  %v5014_v11 = vmul.f32 %v4950_v1, %v4502_v19  ;;  %v5057_v0 = vpack.c.bf16 %v5005_v37, %v5001_v45  ;;  %v4949_v58 = vadd.f32 1.0, %v6717_v54  ;;  %v4495_v47 = vmul.f32 0.5, %v9634_v9  ;;  %6219 = vmatprep.subr.bf16.mxu1 %v9635_v2 }
 0xa80   : > { %v5060_v40 = vpack.c.bf16 %v5012_v42, %v5008_v60  ;;  %v5011_v43 = vmul.f32 %v4947_v33, %v4499_v17  ;;  %v4501_v26 = vmul.f32 0.5, %v9034_v53  ;;  %v4945_v14 = vadd.f32 1.0, %v6719_v5 }
 0xa81   : > { %v5062_v30 = vpack.c.bf16 %v5014_v11, %v5010_v10  ;;  %v5007_v51 = vmul.f32 %v4943_v16, %v4495_v47  ;;  %v4497_v39 = vmul.f32 0.5, %v9636_v31 }
 0xa82   : > { %5391 = vmatprep.mubr.bf16.mxu1 %v5060_v40  ;;  %v5013_v27 = vmul.f32 %v4949_v58, %v4501_v26  ;;  %6227 = vmatpush3.bf16.msra.mxu1 %v9637_v3 }
 0xa83   : > { %v5059_v32 = vpack.c.bf16 %v5011_v43, %v5007_v51  ;;  %6220 = vmatprep.subr.bf16.mxu1 %v9638_v20  ;;  %v5009_v15 = vmul.f32 %v4945_v14, %v4497_v39 }
 0xa84   : > { %5481 = vmatmul.mubr.bf16.gmra.mxu0 %v5057_v0 }
 0xa85   : > { %5488 = vmatprep.mubr.bf16.mxu0 %v5062_v30  ;;  %v5061_v4 = vpack.c.bf16 %v5013_v27, %v5009_v15 }
 0xa86   : > { %6228 = vmatpush3.bf16.msra.mxu1 %v9639_v23 }
 0xa87   : > { %5392 = vmatmul.mubr.bf16.gmra.mxu1 %v5059_v32  ;;  %6221 = vmatprep.subr.bf16.mxu1 %v9640_v28 }
 0xa8a   : > { %6229 = vmatpush3.bf16.msra.mxu1 %v9641_v61 }
 0xa8b   : > { %v4319_v53 = vpop.f32.mrf.mxu1  ;;  %v4432_v50 = vpop.f32.mrf.mxu0 }
 0xa8c   : > { %5489 = vmatmul.mubr.bf16.gmra.mxu0 %v5061_v4  ;;  %v9149_v21 = vadd.f32 %v4319_v53, %v9642_v13  ;;  %v9152_v57 = vadd.f32 %v4432_v50, %v9643_v18 }
 0xa8d   : > { %v4321_v44 = vpop.f32.mrf.mxu1  ;;  %v4434_v62 = vpop.f32.mrf.mxu0 }
 0xa8e   : > { %v4567_v56 = vmul.f32 %v9149_v21, %v9149_v21  ;;  %v4569_v12 = vmul.f32 %v9152_v57, %v9152_v57  ;;  %v9159_v38 = vadd.f32 %v4321_v44, %v9644_v49  ;;  %v9162_v29 = vadd.f32 %v4434_v62, %v9645_v34 }
 0xa8f   : > { %v4323_v22 = vpop.f32.mrf.mxu1  ;;  %v4436_v55 = vpop.f32.mrf.mxu0 }
 0xa90   : > { %v4631_v7 = vmul.f32 %v4567_v56, %v9149_v21  ;;  %v4633_v35 = vmul.f32 %v4569_v12, %v9152_v57  ;;  %v4568_v41 = vmul.f32 %v9159_v38, %v9159_v38  ;;  %v9169_v6 = vadd.f32 %v4323_v22, %v9642_v13 }
 0xa91   : > { %v4570_v8 = vmul.f32 %v9162_v29, %v9162_v29  ;;  %v9174_v37 = vadd.f32 %v4436_v55, %v9643_v18  ;;  %v4325_v24 = vpop.f32.mrf.mxu1  ;;  %v4438_v48 = vpop.f32.mrf.mxu0 }
 0xa92   : > { %v4695_v63 = vmul.f32 0.044715, %v4631_v7  ;;  %v4697_v25 = vmul.f32 0.044715, %v4633_v35  ;;  %v4632_v59 = vmul.f32 %v4568_v41, %v9159_v38  ;;  %v4571_v54 = vmul.f32 %v9169_v6, %v9169_v6 }
 0xa93   : > { %v4634_v36 = vmul.f32 %v4570_v8, %v9162_v29  ;;  %v4573_v19 = vmul.f32 %v9174_v37, %v9174_v37  ;;  %v9183_v1 = vadd.f32 %v4325_v24, %v9644_v49  ;;  %v4329_v5 = vpop.f32.mrf.mxu1  ;;  %v4442_v10 = vpop.f32.mrf.mxu0  ;;  %v9192_v16 = vadd.f32 %v4438_v48, %v9645_v34 }
 0xa94   : > { %v4759_v33 = vadd.f32 %v4695_v63, %v9149_v21  ;;  %v4761_v45 = vadd.f32 %v4697_v25, %v9152_v57  ;;  %v4696_v60 = vmul.f32 0.044715, %v4632_v59  ;;  %v4635_v42 = vmul.f32 %v4571_v54, %v9169_v6 }
 0xa95   : > { %v4698_v11 = vmul.f32 0.044715, %v4634_v36  ;;  %v4637_v46 = vmul.f32 %v4573_v19, %v9174_v37  ;;  %v4572_v17 = vmul.f32 %v9183_v1, %v9183_v1  ;;  %v4574_v43 = vmul.f32 %v9192_v16, %v9192_v16  ;;  %v4331_v51 = vpop.f32.mrf.mxu1  ;;  %v4444_v31 = vpop.f32.mrf.mxu0 }
 0xa96   : > { %v4823_v0 = vmul.f32 0.7978846, %v4759_v33  ;;  %v4825_v40 = vmul.f32 0.7978846, %v4761_v45  ;;  %v4760_v58 = vadd.f32 %v4696_v60, %v9159_v38  ;;  %v4699_v52 = vmul.f32 0.044715, %v4635_v42 }
 0xa97   : > { %v4762_v30 = vadd.f32 %v4698_v11, %v9162_v29  ;;  %v4701_v9 = vmul.f32 0.044715, %v4637_v46  ;;  %v4636_v47 = vmul.f32 %v4572_v17, %v9183_v1  ;;  %v9201_v14 = vadd.f32 %v4329_v5, %v9642_v13  ;;  %v4333_v44 = vpop.f32.mrf.mxu1  ;;  %v4446_v62 = vpop.f32.mrf.mxu0 }
 0xa98   : > { %6720 = vtanh.f32 %v4823_v0  ;;  %v4824_v2 = vmul.f32 0.7978846, %v4760_v58  ;;  %v4763_v26 = vadd.f32 %v4699_v52, %v9169_v6  ;;  %v4638_v20 = vmul.f32 %v4574_v43, %v9192_v16 }
 0xa99   : > { %6722 = vtanh.f32 %v4825_v40  ;;  %v4826_v39 = vmul.f32 0.7978846, %v4762_v30  ;;  %v4765_v27 = vadd.f32 %v4701_v9, %v9174_v37  ;;  %v4700_v3 = vmul.f32 0.044715, %v4636_v47  ;;  %v4335_v59 = vpop.f32.mrf.mxu1  ;;  %v4448_v33 = vpop.f32.mrf.mxu0 }
 0xa9a   : > { %6724 = vtanh.f32 %v4824_v2  ;;  %v4827_v32 = vmul.f32 0.7978846, %v4763_v26  ;;  %v4575_v15 = vmul.f32 %v9201_v14, %v9201_v14  ;;  %v9209_v28 = vadd.f32 %v4442_v10, %v9643_v18 }
 0xa9b   : > { %6726 = vtanh.f32 %v4826_v39  ;;  %v4829_v4 = vmul.f32 0.7978846, %v4765_v27  ;;  %v4764_v23 = vadd.f32 %v4700_v3, %v9183_v1  ;;  %v4702_v53 = vmul.f32 0.044715, %v4638_v20 }
 0xa9c   : > { %6728 = vtanh.f32 %v4827_v32  ;;  %v4639_v50 = vmul.f32 %v4575_v15, %v9201_v14  ;;  %v9213_v61 = vadd.f32 %v4331_v51, %v9644_v49  ;;  %v4577_v12 = vmul.f32 %v9209_v28, %v9209_v28 }
 0xa9d   : > { %6730 = vtanh.f32 %v4829_v4  ;;  %v4828_v56 = vmul.f32 0.7978846, %v4764_v23  ;;  %v4766_v22 = vadd.f32 %v4702_v53, %v9192_v16  ;;  %v9221_v35 = vadd.f32 %v4444_v31, %v9645_v34 }
 0xa9e   : > { %v4703_v55 = vmul.f32 0.044715, %v4639_v50  ;;  %v4576_v7 = vmul.f32 %v9213_v61, %v9213_v61  ;;  %v4641_v41 = vmul.f32 %v4577_v12, %v9209_v28  ;;  %v9225_v8 = vadd.f32 %v4333_v44, %v9642_v13 }
 0xa9f   : > { %6732 = vtanh.f32 %v4828_v56  ;;  %v9228_v24 = vadd.f32 %v4446_v62, %v9643_v18  ;;  %v4830_v48 = vmul.f32 0.7978846, %v4766_v22  ;;  %v4578_v25 = vmul.f32 %v9221_v35, %v9221_v35 }
 0xaa0   : > { %v4640_v63 = vmul.f32 %v4576_v7, %v9213_v61  ;;  %v4705_v54 = vmul.f32 0.044715, %v4641_v41  ;;  %v4579_v36 = vmul.f32 %v9225_v8, %v9225_v8  ;;  %v4767_v45 = vadd.f32 %v4703_v55, %v9201_v14 }
 0xaa1   : > { %v4581_v19 = vmul.f32 %v9228_v24, %v9228_v24  ;;  %6734 = vtanh.f32 %v4830_v48  ;;  %v4642_v42 = vmul.f32 %v4578_v25, %v9221_v35  ;;  %v9242_v11 = vadd.f32 %v4335_v59, %v9644_v49 }
 0xaa2   : > { %v4704_v60 = vmul.f32 0.044715, %v4640_v63  ;;  %v4769_v5 = vadd.f32 %v4705_v54, %v9209_v28  ;;  %v4643_v10 = vmul.f32 %v4579_v36, %v9225_v8  ;;  %v9246_v17 = vadd.f32 %v4448_v33, %v9645_v34 }
 0xaa3   : > { %v4645_v46 = vmul.f32 %v4581_v19, %v9228_v24  ;;  %v4580_v58 = vmul.f32 %v9242_v11, %v9242_v11  ;;  %v4831_v30 = vmul.f32 0.7978846, %v4767_v45  ;;  %v4706_v9 = vmul.f32 0.044715, %v4642_v42 }
 0xaa4   : > { %v4768_v40 = vadd.f32 %v4704_v60, %v9213_v61  ;;  %v4582_v47 = vmul.f32 %v9246_v17, %v9246_v17  ;;  %v4505_v2 = vmul.f32 0.5, %v9152_v57  ;;  %v4833_v26 = vmul.f32 0.7978846, %v4769_v5 }
 0xaa5   : > { %v6721_v0 = vpop.eup %6720  ;;  %v4707_v51 = vmul.f32 0.044715, %v4643_v10  ;;  %v4644_v31 = vmul.f32 %v4580_v58, %v9242_v11  ;;  %v4709_v27 = vmul.f32 0.044715, %v4645_v46  ;;  %v4504_v32 = vmul.f32 0.5, %v9159_v38 }
 0xaa6   : > { %v6723_v52 = vpop.eup %6722  ;;  %v4646_v3 = vmul.f32 %v4582_v47, %v9246_v17  ;;  %v4503_v20 = vmul.f32 0.5, %v9149_v21  ;;  %v4509_v4 = vmul.f32 0.5, %v9174_v37  ;;  %v4832_v23 = vmul.f32 0.7978846, %v4768_v40 }
 0xaa7   : > { %v6725_v43 = vpop.eup %6724  ;;  %v4708_v53 = vmul.f32 0.044715, %v4644_v31  ;;  %v4506_v50 = vmul.f32 0.5, %v9162_v29  ;;  %6736 = vtanh.f32 %v4831_v30  ;;  %v4770_v44 = vadd.f32 %v4706_v9, %v9221_v35 }
 0xaa8   : > { %v6727_v39 = vpop.eup %6726  ;;  %v4710_v62 = vmul.f32 0.044715, %v4646_v3  ;;  %v4508_v56 = vmul.f32 0.5, %v9183_v1  ;;  %6738 = vtanh.f32 %v4833_v26  ;;  %v4771_v12 = vadd.f32 %v4707_v51, %v9225_v8 }
 0xaa9   : > { %v6729_v15 = vpop.eup %6728  ;;  %v4772_v38 = vadd.f32 %v4708_v53, %v9242_v11  ;;  %v4952_v21 = vadd.f32 1.0, %v6725_v43  ;;  %v4773_v37 = vadd.f32 %v4709_v27, %v9228_v24  ;;  %v4507_v55 = vmul.f32 0.5, %v9169_v6 }
 0xaaa   : > { %v6731_v57 = vpop.eup %6730  ;;  %v4951_v7 = vadd.f32 1.0, %v6721_v0  ;;  %v4955_v29 = vadd.f32 1.0, %v6729_v15  ;;  %6740 = vtanh.f32 %v4832_v23  ;;  %v4774_v48 = vadd.f32 %v4710_v62, %v9246_v17 }
 0xaab   : > { %v4836_v41 = vmul.f32 0.7978846, %v4772_v38  ;;  %v4834_v25 = vmul.f32 0.7978846, %v4770_v44  ;;  %v4954_v1 = vadd.f32 1.0, %v6727_v39  ;;  %v4957_v54 = vadd.f32 1.0, %v6731_v57 }
 0xaac   : > { %v6733_v22 = vpop.eup %6732  ;;  %v5019_v59 = vmul.f32 %v4955_v29, %v4507_v55  ;;  %v4835_v19 = vmul.f32 0.7978846, %v4771_v12  ;;  %v5016_v33 = vmul.f32 %v4952_v21, %v4504_v32  ;;  %v4953_v60 = vadd.f32 1.0, %v6723_v52 }
 0xaad   : > { %v4956_v63 = vadd.f32 1.0, %v6733_v22  ;;  %v4837_v42 = vmul.f32 0.7978846, %v4773_v37  ;;  %v4510_v5 = vmul.f32 0.5, %v9192_v16  ;;  %v5015_v10 = vmul.f32 %v4951_v7, %v4503_v20 }
 0xaae   : > { %v6735_v36 = vpop.eup %6734  ;;  %6742 = vtanh.f32 %v4836_v41  ;;  %v4838_v46 = vmul.f32 0.7978846, %v4774_v48  ;;  %v5021_v30 = vmul.f32 %v4957_v54, %v4509_v4  ;;  %v5018_v47 = vmul.f32 %v4954_v1, %v4506_v50 }
 0xaaf   : > { %v5020_v45 = vmul.f32 %v4956_v63, %v4508_v56  ;;  %v4958_v6 = vadd.f32 1.0, %v6735_v36  ;;  %v5063_v26 = vpack.c.bf16 %v5019_v59, %v5015_v10  ;;  %6744 = vtanh.f32 %v4834_v25 }
 0xab0   : > { %v5017_v52 = vmul.f32 %v4953_v60, %v4505_v2  ;;  %6746 = vtanh.f32 %v4835_v19  ;;  %v4513_v38 = vmul.f32 0.5, %v9209_v28  ;;  %v9296_v55 = vmul.f32 0.5, %v9228_v24 }
 0xab1   : > { %v5064_v58 = vpack.c.bf16 %v5020_v45, %v5016_v33  ;;  %v5022_v43 = vmul.f32 %v4958_v6, %v4510_v5  ;;  %6748 = vtanh.f32 %v4838_v46  ;;  %v4512_v1 = vmul.f32 0.5, %v9213_v61 }
 0xab2   : > { %v5065_v27 = vpack.c.bf16 %v5021_v30, %v5017_v52  ;;  %6750 = vtanh.f32 %v4837_v42  ;;  %v4516_v60 = vmul.f32 0.5, %v9242_v11  ;;  %v4514_v42 = vmul.f32 0.5, %v9221_v35 }
 0xab3   : > { %v4339_v0 = vpop.f32.mrf.mxu1  ;;  %v4452_v40 = vpop.f32.mrf.mxu0  ;;  %5399 = vmatprep.mubr.bf16.mxu1 %v5064_v58  ;;  %v5066_v39 = vpack.c.bf16 %v5022_v43, %v5018_v47  ;;  %v4511_v10 = vmul.f32 0.5, %v9201_v14  ;;  %v4515_v14 = vmul.f32 0.5, %v9225_v8 }
 0xab4   : > { %v9269_v9 = vadd.f32 %v4339_v0, %v9642_v13  ;;  %5400 = vmatmul.mubr.bf16.gmra.mxu1 %v5063_v26  ;;  %v6737_v4 = vpop.eup %6736  ;;  %v9299_v7 = vadd.f32 %v4452_v40, %v9643_v18 }
 0xab5   : > { %v4341_v51 = vpop.f32.mrf.mxu1  ;;  %v4454_v31 = vpop.f32.mrf.mxu0  ;;  %5496 = vmatprep.mubr.bf16.mxu0 %v5066_v39  ;;  %v4959_v46 = vadd.f32 1.0, %v6737_v4 }
 0xab6   : > { %v4583_v16 = vmul.f32 %v9269_v9, %v9269_v9  ;;  %v9274_v3 = vadd.f32 %v4341_v51, %v9644_v49  ;;  %5497 = vmatmul.mubr.bf16.gmra.mxu0 %v5065_v27  ;;  %v9283_v53 = vadd.f32 %v4454_v31, %v9645_v34  ;;  %v6739_v44 = vpop.eup %6738  ;;  %v4585_v5 = vmul.f32 %v9299_v7, %v9299_v7 }
 0xab7   : > { %v4343_v32 = vpop.f32.mrf.mxu1  ;;  %v4456_v20 = vpop.f32.mrf.mxu0  ;;  %v4961_v30 = vadd.f32 1.0, %v6739_v44 }
 0xab8   : > { %v4647_v15 = vmul.f32 %v4583_v16, %v9269_v9  ;;  %v9278_v2 = vadd.f32 %v4343_v32, %v9642_v13  ;;  %v4584_v23 = vmul.f32 %v9274_v3, %v9274_v3  ;;  %v9288_v12 = vadd.f32 %v4456_v20, %v9643_v18  ;;  %v6741_v37 = vpop.eup %6740 }
 0xab9   : > { %v4345_v50 = vpop.f32.mrf.mxu1  ;;  %v4458_v57 = vpop.f32.mrf.mxu0  ;;  %v4586_v28 = vmul.f32 %v9283_v53, %v9283_v53  ;;  %v4960_v51 = vadd.f32 1.0, %v6741_v37  ;;  %v4518_v16 = vmul.f32 0.5, %v9246_v17  ;;  %v4649_v20 = vmul.f32 %v4585_v5, %v9299_v7 }
 0xaba   : > { %v4711_v62 = vmul.f32 0.044715, %v4647_v15  ;;  %v4587_v56 = vmul.f32 %v9278_v2, %v9278_v2  ;;  %v4648_v21 = vmul.f32 %v4584_v23, %v9274_v3  ;;  %v9293_v22 = vadd.f32 %v4345_v50, %v9644_v49 }
 0xabb   : > { %v9303_v41 = vadd.f32 %v4458_v57, %v9645_v34  ;;  %v4349_v25 = vpop.f32.mrf.mxu1  ;;  %v4589_v54 = vmul.f32 %v9288_v12, %v9288_v12  ;;  %v9317_v45 = vpop.f32.mrf.mxu0  ;;  %v4650_v40 = vmul.f32 %v4586_v28, %v9283_v53  ;;  %v5023_v23 = vmul.f32 %v4959_v46, %v4511_v10 }
 0xabc   : > { %v4651_v29 = vmul.f32 %v4587_v56, %v9278_v2  ;;  %v4712_v48 = vmul.f32 0.044715, %v4648_v21  ;;  %v4588_v63 = vmul.f32 %v9293_v22, %v9293_v22  ;;  %v4775_v24 = vadd.f32 %v4711_v62, %v9269_v9  ;;  %v6743_v61 = vpop.eup %6742 }
 0xabd   : > { %v4590_v36 = vmul.f32 %v9303_v41, %v9303_v41  ;;  %v9324_v6 = vadd.f32 %v4349_v25, %v9642_v13  ;;  %v6745_v47 = vpop.eup %6744  ;;  %v4653_v35 = vmul.f32 %v4589_v54, %v9288_v12  ;;  %v4964_v31 = vadd.f32 1.0, %v6743_v61  ;;  %v4351_v39 = vpop.f32.mrf.mxu1 }
 0xabe   : > { %v4715_v59 = vmul.f32 0.044715, %v4651_v29  ;;  %v4776_v19 = vadd.f32 %v4712_v48, %v9274_v3  ;;  %v4652_v33 = vmul.f32 %v4588_v63, %v9293_v22  ;;  %v4839_v11 = vmul.f32 0.7978846, %v4775_v24  ;;  %v6747_v52 = vpop.eup %6746  ;;  %v4464_v27 = vpop.f32.mrf.mxu0 }
 0xabf   : > { %v4654_v26 = vmul.f32 %v4590_v36, %v9303_v41  ;;  %v6749_v32 = vpop.eup %6748  ;;  %v4591_v4 = vmul.f32 %v9324_v6, %v9324_v6  ;;  %v4714_v57 = vmul.f32 0.044715, %v4650_v40  ;;  %v5025_v62 = vmul.f32 %v4961_v30, %v4513_v38  ;;  %v4353_v28 = vpop.f32.mrf.mxu1 }
 0xac0   : > { %v4840_v0 = vmul.f32 0.7978846, %v4776_v19  ;;  %v4779_v58 = vadd.f32 %v4715_v59, %v9278_v2  ;;  %v4716_v43 = vmul.f32 0.044715, %v4652_v33  ;;  %v6751_v50 = vpop.eup %6750  ;;  %v4717_v17 = vmul.f32 0.044715, %v4653_v35  ;;  %v4466_v63 = vpop.f32.mrf.mxu0 }
 0xac1   : > { %v4718_v8 = vmul.f32 0.044715, %v4654_v26  ;;  %v5024_v21 = vmul.f32 %v4960_v51, %v4512_v1  ;;  %v5028_v37 = vmul.f32 %v4964_v31, %v4516_v60  ;;  %v4962_v29 = vadd.f32 1.0, %v6745_v47 }
 0xac2   : > { %v4780_v15 = vadd.f32 %v4716_v43, %v9293_v22  ;;  %6752 = vtanh.f32 %v4840_v0  ;;  %v4843_v44 = vmul.f32 0.7978846, %v4779_v58  ;;  %v4966_v48 = vadd.f32 1.0, %v6749_v32  ;;  %v4355_v0 = vpop.f32.mrf.mxu1  ;;  %v4468_v40 = vpop.f32.mrf.mxu0 }
 0xac3   : > { %6754 = vtanh.f32 %v4839_v11  ;;  %v4655_v25 = vmul.f32 %v4591_v4, %v9324_v6  ;;  %v4963_v24 = vadd.f32 1.0, %v6747_v52  ;;  %v4965_v59 = vadd.f32 1.0, %v6751_v50 }
 0xac4   : > { %v4844_v56 = vmul.f32 0.7978846, %v4780_v15  ;;  %v4713_v54 = vmul.f32 0.044715, %v4649_v20  ;;  %v4778_v36 = vadd.f32 %v4714_v57, %v9283_v53  ;;  %v5068_v38 = vpack.c.bf16 %v5028_v37, %v5024_v21 }
 0xac5   : > { %v5026_v19 = vmul.f32 %v4962_v29, %v4514_v42  ;;  %v5030_v33 = vmul.f32 %v4966_v48, %v4518_v16  ;;  %v5027_v61 = vmul.f32 %v4963_v24, %v4515_v14  ;;  %v5029_v1 = vmul.f32 %v4965_v59, %v9296_v55 }
 0xac6   : > { %6756 = vtanh.f32 %v4844_v56  ;;  %v4781_v60 = vadd.f32 %v4717_v17, %v9288_v12  ;;  %5407 = vmatprep.mubr.bf16.mxu1 %v5068_v38  ;;  %v9342_v5 = vadd.f32 %v4351_v39, %v9644_v49  ;;  %v9345_v10 = vadd.f32 %v4464_v27, %v9645_v34 }
 0xac7   : > { %6758 = vtanh.f32 %v4843_v44  ;;  %v9348_v46 = vadd.f32 %v4353_v28, %v9642_v13  ;;  %v4782_v42 = vadd.f32 %v4718_v8, %v9303_v41  ;;  %v4719_v58 = vmul.f32 0.044715, %v4655_v25 }
 0xac8   : > { %v5070_v30 = vpack.c.bf16 %v5030_v33, %v5026_v19  ;;  %v5067_v47 = vpack.c.bf16 %v5027_v61, %v5023_v23  ;;  %v5069_v55 = vpack.c.bf16 %v5029_v1, %v5025_v62  ;;  %v4592_v11 = vmul.f32 %v9342_v5, %v9342_v5 }
 0xac9   : > { %v4594_v35 = vmul.f32 %v9345_v10, %v9345_v10  ;;  %v4595_v43 = vmul.f32 %v9348_v46, %v9348_v46  ;;  %v9358_v13 = vadd.f32 %v4466_v63, %v9643_v18  ;;  %v9361_v26 = vadd.f32 %v4355_v0, %v9644_v49 }
 0xaca   : > { %5504 = vmatprep.mubr.bf16.mxu0 %v5070_v30  ;;  %5408 = vmatmul.mubr.bf16.gmra.mxu1 %v5067_v47  ;;  %v9364_v52 = vadd.f32 %v4468_v40, %v9645_v34  ;;  %v4842_v51 = vmul.f32 0.7978846, %v4778_v36  ;;  %v9368_v31 = vadd.f32 %v9317_v45, %v9643_v18  ;;  %v4656_v16 = vmul.f32 %v4592_v11, %v9342_v5 }
 0xacb   : > { %5505 = vmatmul.mubr.bf16.gmra.mxu0 %v5069_v55  ;;  %v4783_v14 = vadd.f32 %v4719_v58, %v9324_v6  ;;  %v4658_v39 = vmul.f32 %v4594_v35, %v9345_v10  ;;  %v4659_v27 = vmul.f32 %v4595_v43, %v9348_v46  ;;  %v4596_v49 = vmul.f32 %v9361_v26, %v9361_v26 }
 0xacc   : > { %v4777_v34 = vadd.f32 %v4713_v54, %v9299_v7  ;;  %v4720_v32 = vmul.f32 0.044715, %v4656_v16  ;;  %v4597_v20 = vmul.f32 %v9358_v13, %v9358_v13  ;;  %v4598_v18 = vmul.f32 %v9364_v52, %v9364_v52 }
 0xacd   : > { %v4845_v15 = vmul.f32 0.7978846, %v4781_v60  ;;  %v4846_v4 = vmul.f32 0.7978846, %v4782_v42  ;;  %v4723_v23 = vmul.f32 0.044715, %v4659_v27  ;;  %v4660_v50 = vmul.f32 %v4596_v49, %v9361_v26 }
 0xace   : > { %6760 = vtanh.f32 %v4842_v51  ;;  %v4593_v44 = vmul.f32 %v9368_v31, %v9368_v31  ;;  %v4784_v62 = vadd.f32 %v4720_v32, %v9342_v5  ;;  %v4662_v17 = vmul.f32 %v4598_v18, %v9364_v52 }
 0xacf   : > { %v6753_v45 = vpop.eup %6752  ;;  %v4847_v56 = vmul.f32 0.7978846, %v4783_v14  ;;  %v4722_v8 = vmul.f32 0.044715, %v4658_v39  ;;  %v4787_v21 = vadd.f32 %v4723_v23, %v9348_v46  ;;  %v4724_v37 = vmul.f32 0.044715, %v4660_v50 }
 0xad0   : > { %v6755_v57 = vpop.eup %6754  ;;  %v4848_v48 = vmul.f32 0.7978846, %v4784_v62  ;;  %v4661_v28 = vmul.f32 %v4597_v20, %v9358_v13  ;;  %v4726_v63 = vmul.f32 0.044715, %v4662_v17  ;;  %v4968_v25 = vadd.f32 1.0, %v6753_v45 }
 0xad1   : > { %6762 = vtanh.f32 %v4846_v4  ;;  %v4851_v59 = vmul.f32 0.7978846, %v4787_v21  ;;  %v4788_v54 = vadd.f32 %v4724_v37, %v9361_v26  ;;  %v4520_v36 = vmul.f32 0.5, %v9274_v3 }
 0xad2   : > { %6764 = vtanh.f32 %v4848_v48  ;;  %v4790_v38 = vadd.f32 %v4726_v63, %v9364_v52  ;;  %v4524_v19 = vmul.f32 0.5, %v9293_v22  ;;  %v4657_v61 = vmul.f32 %v4593_v44, %v9368_v31 }
 0xad3   : > { %v6757_v29 = vpop.eup %6756  ;;  %6766 = vtanh.f32 %v4847_v56  ;;  %v4786_v1 = vadd.f32 %v4722_v8, %v9345_v10  ;;  %v4852_v60 = vmul.f32 0.7978846, %v4788_v54  ;;  %v4725_v0 = vmul.f32 0.044715, %v4661_v28 }
 0xad4   : > { %v6759_v24 = vpop.eup %6758  ;;  %v4972_v33 = vadd.f32 1.0, %v6757_v29  ;;  %6768 = vtanh.f32 %v4851_v59  ;;  %v5032_v40 = vmul.f32 %v4968_v25, %v4520_v36  ;;  %v4519_v58 = vmul.f32 0.5, %v9269_v9 }
 0xad5   : > { %v4523_v3 = vmul.f32 0.5, %v9278_v2  ;;  %v4967_v30 = vadd.f32 1.0, %v6755_v57  ;;  %v4971_v47 = vadd.f32 1.0, %v6759_v24  ;;  %6770 = vtanh.f32 %v4852_v60 }
 0xad6   : > { %v5036_v42 = vmul.f32 %v4972_v33, %v4524_v19  ;;  %v4854_v55 = vmul.f32 0.7978846, %v4790_v38  ;;  %v4841_v11 = vmul.f32 0.7978846, %v4777_v34  ;;  %v4721_v35 = vmul.f32 0.044715, %v4657_v61 }
 0xad7   : > { %v5031_v43 = vmul.f32 %v4967_v30, %v4519_v58  ;;  %v5035_v51 = vmul.f32 %v4971_v47, %v4523_v3  ;;  %v4850_v16 = vmul.f32 0.7978846, %v4786_v1  ;;  %6772 = vtanh.f32 %v4845_v15 }
 0xad8   : > { %v5072_v22 = vpack.c.bf16 %v5036_v42, %v5032_v40  ;;  %v4789_v14 = vadd.f32 %v4725_v0, %v9358_v13  ;;  %6774 = vtanh.f32 %v4854_v55  ;;  %v4785_v9 = vadd.f32 %v4721_v35, %v9368_v31 }
 0xad9   : > { %v5071_v39 = vpack.c.bf16 %v5035_v51, %v5031_v43  ;;  %6776 = vtanh.f32 %v4841_v11  ;;  %v4528_v50 = vmul.f32 0.5, %v9342_v5  ;;  %v4531_v57 = vmul.f32 0.5, %v9348_v46 }
 0xada   : > { %5415 = vmatprep.mubr.bf16.mxu1 %v5072_v22  ;;  %6778 = vtanh.f32 %v4850_v16  ;;  %v4853_v2 = vmul.f32 0.7978846, %v4789_v14  ;;  %v4849_v34 = vmul.f32 0.7978846, %v4785_v9  ;;  %v4532_v62 = vmul.f32 0.5, %v9361_v26 }
 0xadb   : > { %v6761_v27 = vpop.eup %6760  ;;  %5416 = vmatmul.mubr.bf16.gmra.mxu1 %v5071_v39  ;;  %v4526_v56 = vmul.f32 0.5, %v9303_v41  ;;  %v4527_v21 = vmul.f32 0.5, %v9324_v6  ;;  %v4522_v63 = vmul.f32 0.5, %v9283_v53  ;;  %v4525_v6 = vmul.f32 0.5, %v9288_v12 }
 0xadc   : > { %6780 = vtanh.f32 %v4853_v2  ;;  %v4970_v8 = vadd.f32 1.0, %v6761_v27  ;;  %v4534_v61 = vmul.f32 0.5, %v9364_v52  ;;  %v4521_v1 = vmul.f32 0.5, %v9299_v7 }
 0xadd   : > { %6782 = vtanh.f32 %v4849_v34  ;;  %v4530_v40 = vmul.f32 0.5, %v9345_v10  ;;  %v4533_v12 = vmul.f32 0.5, %v9358_v13  ;;  %v4529_v7 = vmul.f32 0.5, %v9368_v31  ;;  %v9416_v31 = vld [vmem:[%s9530_s11] ss:$0 sm:$0xff] }
 0xade   : > { %v6763_v49 = vpop.eup %6762  ;;  %v5034_v54 = vmul.f32 %v4970_v8, %v4522_v63 }
 0xadf   : > { %v6765_v32 = vpop.eup %6764  ;;  %v4974_v15 = vadd.f32 1.0, %v6763_v49 }
 0xae0   : > { %v6767_v20 = vpop.eup %6766  ;;  %v4976_v45 = vadd.f32 1.0, %v6765_v32 }
 0xae1   : > { %v6769_v18 = vpop.eup %6768  ;;  %v4975_v44 = vadd.f32 1.0, %v6767_v20  ;;  %v5038_v25 = vmul.f32 %v4974_v15, %v4526_v56  ;;  %v9647_v56 = vld [vmem:[#allocation8_spill] sm:$0xff] }
 0xae2   : > { %v4979_v4 = vadd.f32 1.0, %v6769_v18  ;;  %v6771_v23 = vpop.eup %6770  ;;  %v5040_v48 = vmul.f32 %v4976_v45, %v4528_v50  ;;  %v9646_v18 = vld [vmem:[#allocation6_spill] sm:$0xff] }
 0xae3   : > { %v4980_v17 = vadd.f32 1.0, %v6771_v23  ;;  %v5039_v5 = vmul.f32 %v4975_v44, %v4527_v21  ;;  %v5074_v41 = vpack.c.bf16 %v5038_v25, %v5034_v54 }
 0xae4   : > { %v5043_v37 = vmul.f32 %v4979_v4, %v4531_v57  ;;  %v6773_v29 = vpop.eup %6772 }
 0xae5   : > { %v5044_v28 = vmul.f32 %v4980_v17, %v4532_v62  ;;  %v6775_v24 = vpop.eup %6774  ;;  %v4973_v26 = vadd.f32 1.0, %v6773_v29 }
 0xae6   : > { %v6777_v59 = vpop.eup %6776  ;;  %v5075_v38 = vpack.c.bf16 %v5043_v37, %v5039_v5  ;;  %v4982_v19 = vadd.f32 1.0, %v6775_v24  ;;  %v9648_v5 = vld [vmem:[#allocation7_spill] sm:$0xff] }
 0xae7   : > { %v5076_v46 = vpack.c.bf16 %v5044_v28, %v5040_v48  ;;  %v6779_v36 = vpop.eup %6778  ;;  %v4969_v33 = vadd.f32 1.0, %v6777_v59  ;;  %v5037_v60 = vmul.f32 %v4973_v26, %v4525_v6  ;;  %v9649_v6 = vld [vmem:[#allocation9_spill] sm:$0xff] }
 0xae8   : > { %v4978_v53 = vadd.f32 1.0, %v6779_v36  ;;  %v5046_v42 = vmul.f32 %v4982_v19, %v4534_v61 }
 0xae9   : > { %5423 = vmatprep.mubr.bf16.mxu1 %v5076_v46  ;;  %v6781_v0 = vpop.eup %6780  ;;  %v5033_v58 = vmul.f32 %v4969_v33, %v4521_v1 }
 0xaea   : > { %5424 = vmatmul.mubr.bf16.gmra.mxu1 %v5075_v38  ;;  %v6783_v3 = vpop.eup %6782  ;;  %v5042_v30 = vmul.f32 %v4978_v53, %v4530_v40  ;;  %v4981_v55 = vadd.f32 1.0, %v6781_v0 }
 0xaeb   : > { %5512 = vmatprep.mubr.bf16.mxu1 %v5074_v41  ;;  %v5073_v47 = vpack.c.bf16 %v5037_v60, %v5033_v58  ;;  %v4977_v11 = vadd.f32 1.0, %v6783_v3 }
 0xaec   : > { %v5078_v22 = vpack.c.bf16 %v5046_v42, %v5042_v30  ;;  %v5045_v52 = vmul.f32 %v4981_v55, %v4533_v12  ;;  %v9650_v30 = vld [vmem:[#allocation10_spill] sm:$0xff] }
 0xaed   : > { %v5041_v35 = vmul.f32 %v4977_v11, %v4529_v7 }
 0xaef   : > { %v5077_v43 = vpack.c.bf16 %v5045_v52, %v5041_v35 }
 0xaf2   : > { %5513 = vmatmul.mubr.bf16.vlgmr.msra.gmra.mxu1 %v5073_v47 }
 0xaf3   : > { %5520 = vmatprep.mubr.bf16.mxu1 %v5078_v22 }
 0xafa   : > { %5521 = vmatmul.mubr.bf16.gmra.mxu1 %v5077_v43 }
 0xb2d   : > { %v6038_v10 = vpop.f32.mrf.mxu1 }
 0xb2f   : > { %v6039_v51 = vpop.f32.mrf.mxu1 }
 0xb30   : > { %v6040_v39 = vadd.f32 %v6039_v51, %v6038_v10  ;;  %v9651_v10 = vld [vmem:[#allocation12_spill] sm:$0xff] }
 0xb31   : > { %v6041_v16 = vpop.f32.mrf.mxu1 }
 0xb33   : > { %v6042_v27 = vpop.f32.mrf.mxu1 }
 0xb34   : > { %v6102_v14 = vpop.f32.mrf.mxu0  ;;  %v6043_v32 = vadd.f32 %v6042_v27, %v6041_v16 }
 0xb36   : > { %v6103_v9 = vpop.f32.mrf.mxu0 }
 0xb37   : > { %v6104_v2 = vadd.f32 %v6103_v9, %v6102_v14  ;;  %v6044_v34 = vpop.f32.mrf.mxu1 }
 0xb38   : > { %v6105_v13 = vpop.f32.mrf.mxu0 }
 0xb39   : > { %v5467_v49 = vadd.f32 %v6104_v2, %v6040_v39  ;;  %v6045_v15 = vpop.f32.mrf.mxu1 }
 0xb3a   : > { %v6106_v20 = vpop.f32.mrf.mxu0  ;;  %v6046_v44 = vadd.f32 %v6045_v15, %v6044_v34 }
 0xb3b   : > { %v5529_v45 = vadd.f32 %v5467_v49, %v9646_v18  ;;  %v6107_v4 = vadd.f32 %v6106_v20, %v6105_v13  ;;  %v6047_v62 = vpop.f32.mrf.mxu1  ;;  %v9652_v49 = vld [vmem:[#allocation11_spill] sm:$0xff] }
 0xb3c   : > { %v6108_v23 = vpop.f32.mrf.mxu0 }
 0xb3d   : > { %v5552_v50 = vadd.f32 %v9416_v31, %v5529_v45  ;;  %v5470_v57 = vadd.f32 %v6107_v4, %v6043_v32  ;;  %v6048_v37 = vpop.f32.mrf.mxu1  ;;  %v9653_v45 = vld [vmem:[#allocation13_spill] sm:$0xff] }
 0xb3e   : > { %v6109_v17 = vpop.f32.mrf.mxu0  ;;  %v6049_v63 = vadd.f32 %v6048_v37, %v6047_v62 }
 0xb3f   : > { %5568 = vst [vmem:[%s9420_s0] sm:$0xff] %v5552_v50  ;;  %v5530_v8 = vadd.f32 %v5470_v57, %v9647_v56  ;;  %v6110_v21 = vadd.f32 %v6109_v17, %v6108_v23  ;;  %v6050_v25 = vpop.f32.mrf.mxu1 }
 0xb40   : > { %v6111_v29 = vpop.f32.mrf.mxu0 }
 0xb41   : > { %v5553_v48 = vadd.f32 %v9416_v31, %v5530_v8  ;;  %v5475_v28 = vadd.f32 %v6110_v21, %v6046_v44  ;;  %v6051_v54 = vpop.f32.mrf.mxu1 }
 0xb42   : > { %v6112_v24 = vpop.f32.mrf.mxu0  ;;  %v6052_v41 = vadd.f32 %v6051_v54, %v6050_v25 }
 0xb43   : > { %5569 = vst [vmem:[%s9420_s0 + $0x8] sm:$0xff] %v5553_v48  ;;  %v5531_v59 = vadd.f32 %v5475_v28, %v9648_v5  ;;  %v6113_v46 = vadd.f32 %v6112_v24, %v6111_v29  ;;  %v6053_v19 = vpop.f32.mrf.mxu1  ;;  %v9654_v28 = vld [vmem:[#allocation14_spill] sm:$0xff] }
 0xb44   : > { %v6114_v36 = vpop.f32.mrf.mxu0 }
 0xb45   : > { %v5554_v26 = vadd.f32 %v9416_v31, %v5531_v59  ;;  %v5478_v38 = vadd.f32 %v6113_v46, %v6049_v63  ;;  %v6054_v1 = vpop.f32.mrf.mxu1  ;;  %v9655_v59 = vld [vmem:[#allocation16_spill] sm:$0xff] }
 0xb46   : > { %v6115_v33 = vpop.f32.mrf.mxu0  ;;  %v6055_v42 = vadd.f32 %v6054_v1, %v6053_v19 }
 0xb47   : > { %5570 = vst [vmem:[%s9420_s0 + $0x10] sm:$0xff] %v5554_v26  ;;  %v5532_v61 = vadd.f32 %v5478_v38, %v9649_v6  ;;  %v6116_v53 = vadd.f32 %v6115_v33, %v6114_v36  ;;  %v6056_v58 = vpop.f32.mrf.mxu1 }
 0xb48   : > { %v6117_v60 = vpop.f32.mrf.mxu0 }
 0xb49   : > { %v5555_v0 = vadd.f32 %v9416_v31, %v5532_v61  ;;  %v5483_v40 = vadd.f32 %v6116_v53, %v6052_v41  ;;  %v6057_v22 = vpop.f32.mrf.mxu1 }
 0xb4a   : > { %v6118_v3 = vpop.f32.mrf.mxu0  ;;  %v6058_v52 = vadd.f32 %v6057_v22, %v6056_v58 }
 0xb4b   : > { %5571 = vst [vmem:[%s9420_s0 + $0x18] sm:$0xff] %v5555_v0  ;;  %v5533_v47 = vadd.f32 %v5483_v40, %v9650_v30  ;;  %v6119_v55 = vadd.f32 %v6118_v3, %v6117_v60  ;;  %v6059_v35 = vpop.f32.mrf.mxu1  ;;  %v9656_v40 = vld [vmem:[#allocation15_spill] sm:$0xff] }
 0xb4c   : > { %v6120_v12 = vpop.f32.mrf.mxu0 }
 0xb4d   : > { %v5556_v11 = vadd.f32 %v9416_v31, %v5533_v47  ;;  %v5486_v7 = vadd.f32 %v6119_v55, %v6055_v42  ;;  %v6060_v14 = vpop.f32.mrf.mxu1  ;;  %v9657_v47 = vld [vmem:[#allocation17_spill] sm:$0xff] }
 0xb4e   : > { %v6121_v43 = vpop.f32.mrf.mxu0  ;;  %v6061_v2 = vadd.f32 %v6060_v14, %v6059_v35 }
 0xb4f   : > { %5572 = vst [vmem:[%s9420_s0 + $0x20] sm:$0xff] %v5556_v11  ;;  %v5534_v51 = vadd.f32 %v5486_v7, %v9651_v10  ;;  %v6122_v16 = vadd.f32 %v6121_v43, %v6120_v12 }
 0xb50   : > { %v6123_v39 = vpop.f32.mrf.mxu0 }
 0xb51   : > { %v5557_v27 = vadd.f32 %v9416_v31, %v5534_v51  ;;  %v5491_v9 = vadd.f32 %v6122_v16, %v6058_v52 }
 0xb52   : > { %v6124_v13 = vpop.f32.mrf.mxu0 }
 0xb53   : > { %5573 = vst [vmem:[%s9420_s0 + $0x28] sm:$0xff] %v5557_v27  ;;  %v5535_v32 = vadd.f32 %v5491_v9, %v9652_v49  ;;  %v6125_v34 = vadd.f32 %v6124_v13, %v6123_v39 }
 0xb55   : > { %v5558_v20 = vadd.f32 %v9416_v31, %v5535_v32  ;;  %v5494_v18 = vadd.f32 %v6125_v34, %v6061_v2  ;;  %v9658_v32 = vld [vmem:[#allocation18_spill] sm:$0xff] }
 0xb57   : > { %5574 = vst [vmem:[%s9420_s0 + $0x30] sm:$0xff] %v5558_v20  ;;  %v5536_v4 = vadd.f32 %v5494_v18, %v9653_v45 }
 0xb59   : > { %v5559_v15 = vadd.f32 %v9416_v31, %v5536_v4 }
 0xb5b   : > { %5575 = vst [vmem:[%s9420_s0 + $0x38] sm:$0xff] %v5559_v15 }
 0xb74   : > { %v6062_v23 = vpop.f32.mrf.mxu1 }
 0xb76   : > { %v6063_v50 = vpop.f32.mrf.mxu1  ;;  %v6126_v57 = vpop.f32.mrf.mxu0 }
 0xb77   : > { %v6064_v44 = vadd.f32 %v6063_v50, %v6062_v23  ;;  %v9659_v50 = vld [vmem:[#allocation20_spill] sm:$0xff] }
 0xb78   : > { %v6065_v62 = vpop.f32.mrf.mxu1  ;;  %v6127_v17 = vpop.f32.mrf.mxu0 }
 0xb79   : > { %v6128_v56 = vadd.f32 %v6127_v17, %v6126_v57 }
 0xb7a   : > { %v6066_v8 = vpop.f32.mrf.mxu1  ;;  %v6129_v21 = vpop.f32.mrf.mxu0 }
 0xb7b   : > { %v5499_v37 = vadd.f32 %v6128_v56, %v6064_v44  ;;  %v6067_v29 = vadd.f32 %v6066_v8, %v6065_v62 }
 0xb7c   : > { %v6130_v48 = vpop.f32.mrf.mxu0 }
 0xb7d   : > { %v5537_v63 = vadd.f32 %v5499_v37, %v9654_v28  ;;  %v6131_v25 = vadd.f32 %v6130_v48, %v6129_v21  ;;  %v9660_v37 = vld [vmem:[#allocation19_spill] sm:$0xff] }
 0xb7f   : > { %v5560_v24 = vadd.f32 %v9416_v31, %v5537_v63  ;;  %v5502_v5 = vadd.f32 %v6131_v25, %v6067_v29  ;;  %v9661_v25 = vld [vmem:[#allocation21_spill] sm:$0xff] }
 0xb81   : > { %5576 = vst [vmem:[%s9420_s0 + $0x40] sm:$0xff] %v5560_v24  ;;  %v5538_v46 = vadd.f32 %v5502_v5, %v9655_v59 }
 0xb83   : > { %v5561_v54 = vadd.f32 %v9416_v31, %v5538_v46 }
 0xb85   : > { %5577 = vst [vmem:[%s9420_s0 + $0x48] sm:$0xff] %v5561_v54 }
 0xb8a   : > { %v6068_v36 = vpop.f32.mrf.mxu1 }
 0xb8b   : > { %v6132_v26 = vpop.f32.mrf.mxu0 }
 0xb8c   : > { %v6069_v38 = vpop.f32.mrf.mxu1 }
 0xb8d   : > { %v6070_v41 = vadd.f32 %v6069_v38, %v6068_v36  ;;  %v6133_v19 = vpop.f32.mrf.mxu0 }
 0xb8e   : > { %v6134_v33 = vadd.f32 %v6133_v19, %v6132_v26  ;;  %v6071_v6 = vpop.f32.mrf.mxu1 }
 0xb8f   : > { %v6135_v61 = vpop.f32.mrf.mxu0 }
 0xb90   : > { %v5507_v53 = vadd.f32 %v6134_v33, %v6070_v41  ;;  %v6072_v1 = vpop.f32.mrf.mxu1 }
 0xb91   : > { %v6073_v60 = vadd.f32 %v6072_v1, %v6071_v6  ;;  %v6136_v0 = vpop.f32.mrf.mxu0 }
 0xb92   : > { %v5539_v42 = vadd.f32 %v5507_v53, %v9656_v40  ;;  %v6137_v58 = vadd.f32 %v6136_v0, %v6135_v61 }
 0xb94   : > { %v5562_v3 = vadd.f32 %v9416_v31, %v5539_v42  ;;  %v5510_v30 = vadd.f32 %v6137_v58, %v6073_v60 }
 0xb96   : > { %5578 = vst [vmem:[%s9420_s0 + $0x50] sm:$0xff] %v5562_v3  ;;  %v5540_v55 = vadd.f32 %v5510_v30, %v9657_v47 }
 0xb98   : > { %v5563_v22 = vadd.f32 %v9416_v31, %v5540_v55 }
 0xb9a   : > { %5579 = vst [vmem:[%s9420_s0 + $0x58] sm:$0xff] %v5563_v22 }
 0xb9b   : > { %v6074_v12 = vpop.f32.mrf.mxu1 }
 0xb9d   : > { %v6075_v11 = vpop.f32.mrf.mxu1 }
 0xb9e   : > { %v6076_v39 = vadd.f32 %v6075_v11, %v6074_v12 }
 0xb9f   : > { %v6077_v7 = vpop.f32.mrf.mxu1 }
 0xba1   : > { %v6078_v52 = vpop.f32.mrf.mxu1 }
 0xba2   : > { %v6079_v49 = vadd.f32 %v6078_v52, %v6077_v7 }
 0xbaa   : > { %v6080_v35 = vpop.f32.mrf.mxu1 }
 0xbac   : > { %v6081_v43 = vpop.f32.mrf.mxu1 }
 0xbad   : > { %v6082_v23 = vadd.f32 %v6081_v43, %v6080_v35 }
 0xbae   : > { %v6083_v10 = vpop.f32.mrf.mxu1 }
 0xbb0   : > { %v6084_v51 = vpop.f32.mrf.mxu1 }
 0xbb1   : > { %v6085_v21 = vadd.f32 %v6084_v51, %v6083_v10 }
 0xbb2   : > { %v6138_v16 = vpop.f32.mrf.mxu1 }
 0xbb4   : > { %v6139_v14 = vpop.f32.mrf.mxu1 }
 0xbb5   : > { %v6140_v27 = vadd.f32 %v6139_v14, %v6138_v16 }
 0xbb6   : > { %v6141_v9 = vpop.f32.mrf.mxu1 }
 0xbb7   : > { %v5515_v2 = vadd.f32 %v6140_v27, %v6076_v39 }
 0xbb8   : > { %v6142_v13 = vpop.f32.mrf.mxu1 }
 0xbb9   : > { %v5541_v34 = vadd.f32 %v5515_v2, %v9658_v32  ;;  %v6143_v20 = vadd.f32 %v6142_v13, %v6141_v9 }
 0xbba   : > { %v6144_v18 = vpop.f32.mrf.mxu1 }
 0xbbb   : > { %v5564_v45 = vadd.f32 %v9416_v31, %v5541_v34  ;;  %v5518_v4 = vadd.f32 %v6143_v20, %v6079_v49 }
 0xbbc   : > { %v6145_v15 = vpop.f32.mrf.mxu1 }
 0xbbd   : > { %5580 = vst [vmem:[%s9420_s0 + $0x60] sm:$0xff] %v5564_v45  ;;  %v5542_v57 = vadd.f32 %v5518_v4, %v9659_v50  ;;  %v6146_v44 = vadd.f32 %v6145_v15, %v6144_v18 }
 0xbbe   : > { %v6147_v62 = vpop.f32.mrf.mxu1 }
 0xbbf   : > { %v5565_v17 = vadd.f32 %v9416_v31, %v5542_v57  ;;  %v5523_v56 = vadd.f32 %v6146_v44, %v6082_v23 }
 0xbc0   : > { %v6148_v8 = vpop.f32.mrf.mxu1 }
 0xbc1   : > { %5581 = vst [vmem:[%s9420_s0 + $0x68] sm:$0xff] %v5565_v17  ;;  %v5543_v29 = vadd.f32 %v5523_v56, %v9660_v37  ;;  %v6149_v48 = vadd.f32 %v6148_v8, %v6147_v62 }
 0xbc3   : > { %v5566_v28 = vadd.f32 %v9416_v31, %v5543_v29  ;;  %v5526_v63 = vadd.f32 %v6149_v48, %v6085_v21 }
 0xbc5   : > { %5582 = vst [vmem:[%s9420_s0 + $0x70] sm:$0xff] %v5566_v28  ;;  %v5544_v24 = vadd.f32 %v5526_v63, %v9661_v25 }
 0xbc7   : > { %v5567_v5 = vadd.f32 %v9416_v31, %v5544_v24 }
 0xbc9   : > { %5583 = vst [vmem:[%s9420_s0 + $0x78] sm:$0xff] %v5567_v5 }
 0xbca   : > { %6813 = shalt.err (!%p6810_p3)
}
 0xbcb   : > { %s6814_s29 = scalar_lea.hbm %s9471_s28, 2048  ;;  %s6818_s26 = scalar_lea.hbm %s9531_s12, 8192 }
 0xbcc   : > { %p6815_p4 = scmp.ne.s32.totalorder %s9471_s28, %s6814_s29  ;;  %p6819_p9 = scmp.lt.s32.totalorder %s9471_s28, %s9531_s12 }
 0xbcd   : > { %p6820_p10 = scmp.lt.s32.totalorder %s6818_s26, %s6814_s29 }
 0xbce   : > { %p6816_p7 = pnand %p6815_p4, %p6969_p5 }
 0xbcf   : > { %p6821_p11 = por %p6820_p10, %p6819_p9 }
 0xbd0   : > { %p6817_p8 = pneg %p6816_p7 }
 0xbd2   : > { %p6822_p12 = pnand %p6821_p11, %p6817_p8 }
 0xbd4   : > { %6825 = shalt.err (!%p6822_p12)
}
 0xbd5   : > { %s6864_s25 = smov 128   ;;  %s6865_s19 = smov 8  }
 0xbd6   : > { %6230 = dma.vmem_to_hbm [thread:$0]  (%p6969_p5), %s9473_s18, 2048, %s9471_s28, %s9479_s15, %s6864_s25, %s6864_s25, %s6865_s19  }
 0xbd7 PF: > { %p6236_p13 = scmp.ge.s32.totalorder %s6860_s24, 2  ;;  %s5613_s17 = sand.u32 1, %s6848_s21  }
 0xbd8   : > { %s5614_s1 = scalar_lea.sflag [#allocation4], %s5613_s17 }
 0xbd9   : > { %p6233_p0 = pnand %p6236_p13, %p6973_p6 }
 0xbdb   : > { %p6234_p1 = pneg %p6233_p0 }
 0xbdd   : > { %6843 = dma.done.wait (%p6234_p1), %s5614_s1, 2048  }
 0xbde   : > { %6845 = vsyncadd (%p6234_p1), %s5614_s1, 4294965248  ;;  %p22_p2 = scmp.ge.s32.totalorder %s6956_s27, 6   ;;  %s9662_s21 = smov %s6852_s22 }
 0xbdf   : > { %s9663_s22 = smov %s6856_s23  ;;  %s9664_s23 = smov %s6967_s30 }
 0xbe0   : > { %s9665_s24 = smov %s6956_s27  ;;  %24 = sbr.rel (!%p22_p2) target bundleno = 6 (0x6), region = 103 }
 0xbe5   :  { %5619 = vsyncpa [#allocation4], 1 }
 0xbe6   :  { %5621 = vsyncpa [#allocation4 + $0x1], 1 }

</bundles_post_ra>
